<compile_context>
chip_gen: v6e
topology: v6e:2x2x1
jax: 0.10.0
libtpu: 0.0.40
codegen_flags: <defaults>
</compile_context>

<pallas_src>
import functools

import jax
import jax.numpy as jnp
from jax.experimental import pallas as pl
from jax.experimental.pallas import tpu as pltpu

EPS = 1e-5
LANE = 128                      # every output-channel dim padded to one lane width
TILE_ROWS = 512                 # pooled-row tile for the two-pass (large batch) path
VMEM_LIMIT = 32 * 1024 * 1024   # safe on v5e/v6e (128 MiB) and v7x (64 MiB) VMEM


def _round_up(x, m):
    return (x + m - 1) // m * m


def _pad_to(a, shape):
    return jnp.pad(a, [(0, t - s) for s, t in zip(a.shape, shape)])


# ------------------------------ kernel helpers -------------------------------

def _bn_scale_shift(s, ss, gamma, beta, inv_count):
    # Training-mode BatchNorm from raw sums (biased variance, E[y^2]-mean^2
    # form; fine at f32 / LeNet activation scale).
    mean = s * inv_count
    var = jnp.maximum(ss * inv_count - mean * mean, 0.0)
    scale = gamma * jax.lax.rsqrt(var + EPS)
    shift = beta - mean * scale
    return scale, shift


def _pool_relu(z, rows):
    # z: (4*rows, 128); the 4 leading slabs are the 2x2 pooling offsets.
    z4 = z.reshape(4, rows, z.shape[-1])          # sublane-aligned slab split
    m = jnp.maximum(jnp.maximum(z4[0], z4[1]), jnp.maximum(z4[2], z4[3]))
    return jnp.maximum(m, 0.0)                    # ReLU commutes with max


# ------------------------------ Pallas kernels -------------------------------

def conv_bn_pool_kernel(p_ref, w_ref, gb_ref, o_ref, *, inv_count):
    """Single-block fused conv(im2col) + BN(batch stats) + ReLU + 2x2 maxpool.

    p: (4, R, K) bf16 stacked pooling-offset patches; w: (K, 128) bf16;
    gb: (8, 128) f32 packed [gamma, beta, ...] (conv bias dropped, cancels in BN).
    """
    rows = p_ref.shape[1]
    p = p_ref[...].reshape(4 * rows, p_ref.shape[2])                     # (4R, K)
    y = jnp.dot(p, w_ref[...], preferred_element_type=jnp.float32)       # (4R, 128)
    s = jnp.sum(y, axis=0, keepdims=True)
    ss = jnp.sum(y * y, axis=0, keepdims=True)
    scale, shift = _bn_scale_shift(s, ss, gb_ref[0:1, :], gb_ref[1:2, :], inv_count)
    o_ref[...] = _pool_relu(y * scale + shift, rows)


def conv_bn_pool_tiled_kernel(p_ref, w_ref, gb_ref, o_ref, s_ref, ss_ref, *,
                              inv_count):
    """Row-tiled two-pass variant, grid = (2, num_tiles); pass axis outermost.

    Pass 0: matmul + accumulate per-channel sum / sum-of-squares into VMEM
    scratch.  Pass 1: recompute tile matmul, apply scale/shift + pool + ReLU.
    (Trades ~2x MXU flops for bounded VMEM and a pipelined grid.)
    """
    phase = pl.program_id(0)
    tile = pl.program_id(1)
    rows = p_ref.shape[1]
    p = p_ref[...].reshape(4 * rows, p_ref.shape[2])
    y = jnp.dot(p, w_ref[...], preferred_element_type=jnp.float32)

    @pl.when(jnp.logical_and(phase == 0, tile == 0))
    def _():
        s_ref[...] = jnp.zeros_like(s_ref)
        ss_ref[...] = jnp.zeros_like(ss_ref)

    @pl.when(phase == 0)
    def _():
        s_ref[...] = s_ref[...] + jnp.sum(y, axis=0, keepdims=True)
        ss_ref[...] = ss_ref[...] + jnp.sum(y * y, axis=0, keepdims=True)

    @pl.when(phase == 1)
    def _():
        scale, shift = _bn_scale_shift(s_ref[...], ss_ref[...],
                                       gb_ref[0:1, :], gb_ref[1:2, :], inv_count)
        o_ref[...] = _pool_relu(y * scale + shift, rows)


def tail_kernel(x_ref, w3_ref, wf1_ref, wf2_ref, pkt_ref, o_ref):
    """conv3 (1x1 spatial => matmul) + BN4 + ReLU + fc1 + ReLU + fc2.

    pkt rows: 0=gamma4, 1=beta4, 2=fc1 bias, 3=fc2 bias.  conv3 bias is dropped
    (cancels under training-mode BN4).  All padded lanes stay exactly 0.
    """
    y = jnp.dot(x_ref[...], w3_ref[...], preferred_element_type=jnp.float32)  # (N,128)
    inv_n = 1.0 / y.shape[0]
    s = jnp.sum(y, axis=0, keepdims=True)
    ss = jnp.sum(y * y, axis=0, keepdims=True)
    scale, shift = _bn_scale_shift(s, ss, pkt_ref[0:1, :], pkt_ref[1:2, :], inv_n)
    h = jnp.maximum(y * scale + shift, 0.0)
    h1 = jnp.dot(h.astype(jnp.bfloat16), wf1_ref[...],
                 preferred_element_type=jnp.float32) + pkt_ref[2:3, :]
    h1 = jnp.maximum(h1, 0.0)
    o_ref[...] = jnp.dot(h1.astype(jnp.bfloat16), wf2_ref[...],
                         preferred_element_type=jnp.float32) + pkt_ref[3:4, :]


# ------------------------------ pallas_call glue ------------------------------

def _stacked_pool_patches(xp, ksize, ohh, owh):
    """(4, R, K) im2col patches; axis 0 = 2x2 pooling offsets (dh, dw),
    rows ordered (n, i, j), columns ordered (kh, kw, c)."""
    n, _, _, c = xp.shape
    offs = []
    for dh in (0, 1):
        for dw in (0, 1):
            parts = []
            for kh in range(ksize):
                for kw in range(ksize):
                    parts.append(xp[:, dh + kh:dh + kh + 2 * (ohh - 1) + 1:2,
                                    dw + kw:dw + kw + 2 * (owh - 1) + 1:2, :])
            pat = jnp.stack(parts, axis=3)                   # (N, ohh, owh, ks*ks, C)
            offs.append(pat.reshape(n * ohh * owh, ksize * ksize * c))
    return jnp.stack(offs, axis=0)


def conv_bn_relu_pool(x_nhwc, wm, gb, *, cout, ksize, padding):
    n, h, w, cin = x_nhwc.shape
    oh = h + 2 * padding - ksize + 1
    ow = w + 2 * padding - ksize + 1
    ohh, owh = oh // 2, ow // 2
    rows = n * ohh * owh
    k = ksize * ksize * cin

    xp = x_nhwc.astype(jnp.bfloat16)      # bf16 patches: MXU-native, 2x fewer HBM bytes
    if padding:
        xp = jnp.pad(xp, ((0, 0), (padding, padding), (padding, padding), (0, 0)))
    patches = _stacked_pool_patches(xp, ksize, ohh, owh)      # (4, rows, k)

    tile_rows = _round_up(rows, 16) if rows <= TILE_ROWS else TILE_ROWS
    rows_pad = _round_up(rows, tile_rows)
    if rows_pad != rows:
        # Zero rows contribute nothing to the BN sums (no conv bias); their
        # garbage outputs are sliced off below.  inv_count uses the true count.
        patches = jnp.pad(patches, ((0, 0), (0, rows_pad - rows), (0, 0)))
    num_tiles = rows_pad // tile_rows
    inv_count = 1.0 / (4.0 * rows)
    out_shape = jax.ShapeDtypeStruct((rows_pad, LANE), jnp.float32)

    if num_tiles == 1:
        out = pl.pallas_call(
            functools.partial(conv_bn_pool_kernel, inv_count=inv_count),
            grid=(1,),
            in_specs=[pl.BlockSpec((4, rows_pad, k), lambda i: (0, 0, 0)),
                      pl.BlockSpec((k, LANE), lambda i: (0, 0)),
                      pl.BlockSpec((8, LANE), lambda i: (0, 0))],
            out_specs=pl.BlockSpec((rows_pad, LANE), lambda i: (0, 0)),
            out_shape=out_shape,
            compiler_params=pltpu.CompilerParams(
                dimension_semantics=("arbitrary",),
                vmem_limit_bytes=VMEM_LIMIT),
        )(patches, wm, gb)
    else:
        out = pl.pallas_call(
            functools.partial(conv_bn_pool_tiled_kernel, inv_count=inv_count),
            grid=(2, num_tiles),                 # (pass, row tile); pass is outermost
            in_specs=[pl.BlockSpec((4, tile_rows, k), lambda p, t: (0, t, 0)),
                      pl.BlockSpec((k, LANE), lambda p, t: (0, 0)),
                      pl.BlockSpec((8, LANE), lambda p, t: (0, 0))],
            out_specs=pl.BlockSpec((tile_rows, LANE), lambda p, t: (t, 0)),
            out_shape=out_shape,
            scratch_shapes=[pltpu.VMEM((1, LANE), jnp.float32),
                            pltpu.VMEM((1, LANE), jnp.float32)],
            # TODO(synk): "parallel" tile axis for v7x needs cross-core BN-stat
            # reduction; sequential "arbitrary" keeps the scratch sums exact.
            compiler_params=pltpu.CompilerParams(
                dimension_semantics=("arbitrary", "arbitrary"),
                vmem_limit_bytes=VMEM_LIMIT),
        )(patches, wm, gb)

    out = out[:rows].reshape(n, ohh, owh, LANE)
    return out[..., :cout]


def conv3_bn_fc_tail(x_nhwc, w3m, wf1, wf2, pkt):
    n = x_nhwc.shape[0]
    k3 = x_nhwc.shape[1] * x_nhwc.shape[2] * x_nhwc.shape[3]     # 400, (h,w,c) order
    x_flat = x_nhwc.reshape(n, k3).astype(jnp.bfloat16)
    # TODO(synk): row-tile over N (two-pass BN4) for very large batches.
    out = pl.pallas_call(
        tail_kernel,
        grid=(1,),
        in_specs=[pl.BlockSpec((n, k3), lambda i: (0, 0)),
                  pl.BlockSpec(w3m.shape, lambda i: (0, 0)),
                  pl.BlockSpec(wf1.shape, lambda i: (0, 0)),
                  pl.BlockSpec(wf2.shape, lambda i: (0, 0)),
                  pl.BlockSpec(pkt.shape, lambda i: (0, 0))],
        out_specs=pl.BlockSpec((n, LANE), lambda i: (0, 0)),
        out_shape=jax.ShapeDtypeStruct((n, LANE), jnp.float32),
        compiler_params=pltpu.CompilerParams(
            dimension_semantics=("arbitrary",),
            vmem_limit_bytes=VMEM_LIMIT),
    )(x_flat, w3m, wf1, wf2, pkt)
    return out[:, :10]                                           # fc2 out features


# ------------------------------ parameters -----------------------------------

def init_params(key):
    def conv_init(k, cout, cin, ks):
        k1, k2 = jax.random.split(k)
        bound = float(cin * ks * ks) ** -0.5
        w = jax.random.uniform(k1, (cout, cin, ks, ks), jnp.float32, -bound, bound)
        b = jax.random.uniform(k2, (cout,), jnp.float32, -bound, bound)
        return w, b

    def lin_init(k, out_f, in_f):
        k1, k2 = jax.random.split(k)
        bound = float(in_f) ** -0.5
        w = jax.random.uniform(k1, (out_f, in_f), jnp.float32, -bound, bound)
        b = jax.random.uniform(k2, (out_f,), jnp.float32, -bound, bound)
        return w, b

    keys = jax.random.split(key, 5)
    return {
        "conv1": conv_init(keys[0], 6, 1, 5),
        "conv2": conv_init(keys[1], 16, 6, 5),
        "conv3": conv_init(keys[2], 120, 16, 5),
        "fc1": lin_init(keys[3], 84, 120),
        "fc2": lin_init(keys[4], 10, 84),
        # BatchNorm affine params at fresh init: gamma=1, beta=0
        "bn1": (jnp.ones((1,), jnp.float32), jnp.zeros((1,), jnp.float32)),
        "bn2": (jnp.ones((6,), jnp.float32), jnp.zeros((6,), jnp.float32)),
        "bn3": (jnp.ones((16,), jnp.float32), jnp.zeros((16,), jnp.float32)),
        "bn4": (jnp.ones((120,), jnp.float32), jnp.zeros((120,), jnp.float32)),
    }


def prepare_params(params):
    """One-time preprocessing, hoisted off the per-forward path: weight
    transpose/pad/bf16-cast and packed (8,128) BN/bias tiles.  Conv biases are
    intentionally dropped (they cancel exactly under batch-stats BatchNorm)."""
    def conv_pack(w_oihw, gamma, beta):
        cout, cin, kh, kw = w_oihw.shape
        wm = w_oihw.transpose(2, 3, 1, 0).reshape(kh * kw * cin, cout)  # (kh,kw,c)
        wm = _pad_to(wm, (kh * kw * cin, LANE)).astype(jnp.bfloat16)
        gb = jnp.zeros((8, LANE), jnp.float32)
        gb = gb.at[0, :cout].set(gamma).at[1, :cout].set(beta)
        return wm, gb

    w1, _ = params["conv1"]
    w2, _ = params["conv2"]
    w3, _ = params["conv3"]
    wm1, gb1 = conv_pack(w1, *params["bn2"])
    wm2, gb2 = conv_pack(w2, *params["bn3"])

    k3 = w3.shape[1] * w3.shape[2] * w3.shape[3]
    w3m = _pad_to(w3.transpose(2, 3, 1, 0).reshape(k3, w3.shape[0]),
                  (k3, LANE)).astype(jnp.bfloat16)
    wf1, bf1 = params["fc1"]
    wf2, bf2 = params["fc2"]
    wf1m = _pad_to(wf1.T, (LANE, LANE)).astype(jnp.bfloat16)   # (120,84) -> (128,128)
    wf2m = _pad_to(wf2.T, (LANE, LANE)).astype(jnp.bfloat16)   # (84,10)  -> (128,128)
    g4, be4 = params["bn4"]
    pkt = jnp.zeros((8, LANE), jnp.float32)
    pkt = (pkt.at[0, :g4.shape[0]].set(g4)
              .at[1, :be4.shape[0]].set(be4)
              .at[2, :bf1.shape[0]].set(bf1)
              .at[3, :bf2.shape[0]].set(bf2))

    return {"wm1": wm1, "gb1": gb1, "wm2": wm2, "gb2": gb2,
            "w3m": w3m, "wf1": wf1m, "wf2": wf2m, "pkt": pkt,
            "bn1_gamma": params["bn1"][0], "bn1_beta": params["bn1"][1]}


# ------------------------------ forward ---------------------------------------

def netbn_forward(prep, x_nchw):
    x = jnp.transpose(x_nchw.astype(jnp.float32), (0, 2, 3, 1))   # NCHW -> NHWC

    # BN1 (training-mode batch stats over N,H,W per channel; C=1 => scalar
    # affine).  One-pass sum / sum-of-squares; the affine is fused by XLA into
    # the conv1 patch gather.  Zero-padding for conv1 is applied AFTER this
    # affine, matching PyTorch (pads are zeros in the post-BN1 domain).
    cnt = x.shape[0] * x.shape[1] * x.shape[2]
    s = jnp.sum(x, axis=(0, 1, 2), keepdims=True)
    ss = jnp.sum(x * x, axis=(0, 1, 2), keepdims=True)
    mean = s / cnt
    var = jnp.maximum(ss / cnt - mean * mean, 0.0)
    scale = prep["bn1_gamma"].reshape(1, 1, 1, -1) * jax.lax.rsqrt(var + EPS)
    shift = prep["bn1_beta"].reshape(1, 1, 1, -1) - mean * scale
    x = x * scale + shift

    x = conv_bn_relu_pool(x, prep["wm1"], prep["gb1"],
                          cout=6, ksize=5, padding=2)    # (N, 14, 14, 6)
    x = conv_bn_relu_pool(x, prep["wm2"], prep["gb2"],
                          cout=16, ksize=5, padding=0)   # (N, 5, 5, 16)
    return conv3_bn_fc_tail(x, prep["w3m"], prep["wf1"],
                            prep["wf2"], prep["pkt"])    # (N, 10)


if __name__ == "__main__":
    key = jax.random.PRNGKey(0)
    kx, kp = jax.random.split(key)
    # LeNet-5 geometry implies a 28x28 single-channel input (MNIST-like).
    x = jax.random.normal(kx, (2, 1, 28, 28), dtype=jnp.float32)
    params = init_params(kp)
    prep = prepare_params(params)          # one-time, off the per-forward path
    fwd = jax.jit(netbn_forward)

    out = fwd(prep, x)
    jax.block_until_ready(out)
    assert out.shape == (2, 10) and out.dtype == jnp.float32
    print("KERNEL_OK")
</pallas_src>

<mosaic_0001>
module attributes {stable_mosaic.version = 11 : i64} {
  func.func @conv_bn_pool_kernel(%arg0: i32, %arg1: memref<4x400x25xbf16, #tpu.memory_space<vmem>>, %arg2: memref<25x128xbf16, #tpu.memory_space<vmem>>, %arg3: memref<8x128xf32, #tpu.memory_space<vmem>>, %arg4: memref<400x128xf32, #tpu.memory_space<vmem>>) attributes {dimension_semantics = [#tpu.dimension_semantics<arbitrary>], iteration_bounds = array<i64: 1>, scalar_prefetch = 0 : i64, scratch_operands = 0 : i64, tpu.core_type = #tpu.core_type<tc>, window_params = [{pipeline_mode = #tpu.pipeline_mode<synchronous>, transform_indices = @transform_0, window_bounds = array<i64: 4, 400, 25>}, {pipeline_mode = #tpu.pipeline_mode<synchronous>, transform_indices = @transform_1, window_bounds = array<i64: 25, 128>}, {pipeline_mode = #tpu.pipeline_mode<synchronous>, transform_indices = @transform_2, window_bounds = array<i64: 8, 128>}, {pipeline_mode = #tpu.pipeline_mode<synchronous>, transform_indices = @transform_3, window_bounds = array<i64: 400, 128>}]} {
    %c0 = arith.constant 0 : index
    %c0_0 = arith.constant 0 : index
    %c0_1 = arith.constant 0 : index
    %0 = vector.load %arg1[%c0, %c0_0, %c0_1] : memref<4x400x25xbf16, #tpu.memory_space<vmem>>, vector<4x400x25xbf16>
    %1 = vector.shape_cast %0 : vector<4x400x25xbf16> to vector<1600x25xbf16>
    %c0_2 = arith.constant 0 : index
    %c0_3 = arith.constant 0 : index
    %2 = vector.load %arg2[%c0_2, %c0_3] : memref<25x128xbf16, #tpu.memory_space<vmem>>, vector<25x128xbf16>
    %cst = arith.constant dense<0.000000e+00> : vector<1600x128xf32>
    %3 = tpu.matmul %1, %2, %cst {dimension_numbers = #tpu.dot_dimension_numbers<[1], [0], [0], [1], [0, 0, 1, 1], [], []>} : vector<1600x25xbf16>, vector<25x128xbf16>, vector<1600x128xf32> -> vector<1600x128xf32>
    %cst_4 = arith.constant dense<0.000000e+00> : vector<128xf32>
    %4 = vector.multi_reduction <add>, %3, %cst_4 [0] : vector<1600x128xf32> to vector<128xf32>
    %5 = vector.shape_cast %4 : vector<128xf32> to vector<1x128xf32>
    %6 = arith.mulf %3, %3 : vector<1600x128xf32>
    %cst_5 = arith.constant dense<0.000000e+00> : vector<128xf32>
    %7 = vector.multi_reduction <add>, %6, %cst_5 [0] : vector<1600x128xf32> to vector<128xf32>
    %8 = vector.shape_cast %7 : vector<128xf32> to vector<1x128xf32>
    %c0_6 = arith.constant 0 : index
    %c0_7 = arith.constant 0 : index
    %9 = vector.load %arg3[%c0_6, %c0_7] : memref<8x128xf32, #tpu.memory_space<vmem>>, vector<1x128xf32>
    %c1 = arith.constant 1 : index
    %c0_8 = arith.constant 0 : index
    %10 = vector.load %arg3[%c1, %c0_8] : memref<8x128xf32, #tpu.memory_space<vmem>>, vector<1x128xf32>
    %cst_9 = arith.constant 6.37755089E-4 : f32
    %11 = vector.broadcast %cst_9 : f32 to vector<1x128xf32>
    %12 = arith.mulf %5, %11 : vector<1x128xf32>
    %cst_10 = arith.constant 6.37755089E-4 : f32
    %13 = vector.broadcast %cst_10 : f32 to vector<1x128xf32>
    %14 = arith.mulf %8, %13 : vector<1x128xf32>
    %15 = arith.mulf %12, %12 : vector<1x128xf32>
    %16 = arith.subf %14, %15 : vector<1x128xf32>
    %cst_11 = arith.constant 0.000000e+00 : f32
    %17 = vector.broadcast %cst_11 : f32 to vector<1x128xf32>
    %18 = arith.maximumf %16, %17 : vector<1x128xf32>
    %cst_12 = arith.constant 9.99999974E-6 : f32
    %19 = vector.broadcast %cst_12 : f32 to vector<1x128xf32>
    %20 = arith.addf %18, %19 : vector<1x128xf32>
    %21 = math.rsqrt %20 : vector<1x128xf32>
    %22 = arith.mulf %9, %21 : vector<1x128xf32>
    %23 = arith.mulf %12, %22 : vector<1x128xf32>
    %24 = arith.subf %10, %23 : vector<1x128xf32>
    %25 = vector.broadcast %22 : vector<1x128xf32> to vector<1600x128xf32>
    %26 = arith.mulf %3, %25 : vector<1600x128xf32>
    %27 = vector.broadcast %24 : vector<1x128xf32> to vector<1600x128xf32>
    %28 = arith.addf %26, %27 : vector<1600x128xf32>
    %29 = vector.shape_cast %28 : vector<1600x128xf32> to vector<4x400x128xf32>
    %30 = vector.extract_strided_slice %29 {offsets = [0, 0, 0], sizes = [1, 400, 128], strides = [1, 1, 1]} : vector<4x400x128xf32> to vector<1x400x128xf32>
    %31 = vector.shape_cast %30 : vector<1x400x128xf32> to vector<400x128xf32>
    %32 = vector.extract_strided_slice %29 {offsets = [1, 0, 0], sizes = [1, 400, 128], strides = [1, 1, 1]} : vector<4x400x128xf32> to vector<1x400x128xf32>
    %33 = vector.shape_cast %32 : vector<1x400x128xf32> to vector<400x128xf32>
    %34 = arith.maximumf %31, %33 : vector<400x128xf32>
    %35 = vector.extract_strided_slice %29 {offsets = [2, 0, 0], sizes = [1, 400, 128], strides = [1, 1, 1]} : vector<4x400x128xf32> to vector<1x400x128xf32>
    %36 = vector.shape_cast %35 : vector<1x400x128xf32> to vector<400x128xf32>
    %37 = vector.extract_strided_slice %29 {offsets = [3, 0, 0], sizes = [1, 400, 128], strides = [1, 1, 1]} : vector<4x400x128xf32> to vector<1x400x128xf32>
    %38 = vector.shape_cast %37 : vector<1x400x128xf32> to vector<400x128xf32>
    %39 = arith.maximumf %36, %38 : vector<400x128xf32>
    %40 = arith.maximumf %34, %39 : vector<400x128xf32>
    %cst_13 = arith.constant 0.000000e+00 : f32
    %41 = vector.broadcast %cst_13 : f32 to vector<400x128xf32>
    %42 = arith.maximumf %40, %41 : vector<400x128xf32>
    %c0_14 = arith.constant 0 : index
    %c0_15 = arith.constant 0 : index
    %43 = vector.load %arg4[%c0_14, %c0_15] : memref<400x128xf32, #tpu.memory_space<vmem>>, vector<400x128xf32>
    tpu.vector_store %arg4[%c0_14, %c0_15], %42 {strides = array<i32>} : memref<400x128xf32, #tpu.memory_space<vmem>>, vector<400x128xf32>,
    return
  }
  func.func @transform_0(%arg0: i32) -> (i32, i32, i32) {
    %c0_i32 = arith.constant 0 : i32
    %c0_i32_0 = arith.constant 0 : i32
    %c0_i32_1 = arith.constant 0 : i32
    %c0_i32_2 = arith.constant 0 : i32
    return %c0_i32, %c0_i32_0, %c0_i32_1 : i32, i32, i32
  }
  func.func @transform_1(%arg0: i32) -> (i32, i32) {
    %c0_i32 = arith.constant 0 : i32
    %c0_i32_0 = arith.constant 0 : i32
    %c0_i32_1 = arith.constant 0 : i32
    return %c0_i32, %c0_i32_0 : i32, i32
  }
  func.func @transform_2(%arg0: i32) -> (i32, i32) {
    %c0_i32 = arith.constant 0 : i32
    %c0_i32_0 = arith.constant 0 : i32
    %c0_i32_1 = arith.constant 0 : i32
    return %c0_i32, %c0_i32_0 : i32, i32
  }
  func.func @transform_3(%arg0: i32) -> (i32, i32) {
    %c0_i32 = arith.constant 0 : i32
    %c0_i32_0 = arith.constant 0 : i32
    %c0_i32_1 = arith.constant 0 : i32
    return %c0_i32, %c0_i32_0 : i32, i32
  }
}

module attributes {stable_mosaic.version = 11 : i64} {
  func.func @conv_bn_pool_kernel(%arg0: i32, %arg1: memref<4x64x150xbf16, #tpu.memory_space<vmem>>, %arg2: memref<150x128xbf16, #tpu.memory_space<vmem>>, %arg3: memref<8x128xf32, #tpu.memory_space<vmem>>, %arg4: memref<64x128xf32, #tpu.memory_space<vmem>>) attributes {dimension_semantics = [#tpu.dimension_semantics<arbitrary>], iteration_bounds = array<i64: 1>, scalar_prefetch = 0 : i64, scratch_operands = 0 : i64, tpu.core_type = #tpu.core_type<tc>, window_params = [{pipeline_mode = #tpu.pipeline_mode<synchronous>, transform_indices = @transform_0, window_bounds = array<i64: 4, 64, 150>}, {pipeline_mode = #tpu.pipeline_mode<synchronous>, transform_indices = @transform_1, window_bounds = array<i64: 150, 128>}, {pipeline_mode = #tpu.pipeline_mode<synchronous>, transform_indices = @transform_2, window_bounds = array<i64: 8, 128>}, {pipeline_mode = #tpu.pipeline_mode<synchronous>, transform_indices = @transform_3, window_bounds = array<i64: 64, 128>}]} {
    %c0 = arith.constant 0 : index
    %c0_0 = arith.constant 0 : index
    %c0_1 = arith.constant 0 : index
    %0 = vector.load %arg1[%c0, %c0_0, %c0_1] : memref<4x64x150xbf16, #tpu.memory_space<vmem>>, vector<4x64x150xbf16>
    %1 = vector.shape_cast %0 : vector<4x64x150xbf16> to vector<256x150xbf16>
    %c0_2 = arith.constant 0 : index
    %c0_3 = arith.constant 0 : index
    %2 = vector.load %arg2[%c0_2, %c0_3] : memref<150x128xbf16, #tpu.memory_space<vmem>>, vector<150x128xbf16>
    %cst = arith.constant dense<0.000000e+00> : vector<256x128xf32>
    %3 = tpu.matmul %1, %2, %cst {dimension_numbers = #tpu.dot_dimension_numbers<[1], [0], [0], [1], [0, 0, 1, 1], [], []>} : vector<256x150xbf16>, vector<150x128xbf16>, vector<256x128xf32> -> vector<256x128xf32>
    %cst_4 = arith.constant dense<0.000000e+00> : vector<128xf32>
    %4 = vector.multi_reduction <add>, %3, %cst_4 [0] : vector<256x128xf32> to vector<128xf32>
    %5 = vector.shape_cast %4 : vector<128xf32> to vector<1x128xf32>
    %6 = arith.mulf %3, %3 : vector<256x128xf32>
    %cst_5 = arith.constant dense<0.000000e+00> : vector<128xf32>
    %7 = vector.multi_reduction <add>, %6, %cst_5 [0] : vector<256x128xf32> to vector<128xf32>
    %8 = vector.shape_cast %7 : vector<128xf32> to vector<1x128xf32>
    %c0_6 = arith.constant 0 : index
    %c0_7 = arith.constant 0 : index
    %9 = vector.load %arg3[%c0_6, %c0_7] : memref<8x128xf32, #tpu.memory_space<vmem>>, vector<1x128xf32>
    %c1 = arith.constant 1 : index
    %c0_8 = arith.constant 0 : index
    %10 = vector.load %arg3[%c1, %c0_8] : memref<8x128xf32, #tpu.memory_space<vmem>>, vector<1x128xf32>
    %cst_9 = arith.constant 5.000000e-03 : f32
    %11 = vector.broadcast %cst_9 : f32 to vector<1x128xf32>
    %12 = arith.mulf %5, %11 : vector<1x128xf32>
    %cst_10 = arith.constant 5.000000e-03 : f32
    %13 = vector.broadcast %cst_10 : f32 to vector<1x128xf32>
    %14 = arith.mulf %8, %13 : vector<1x128xf32>
    %15 = arith.mulf %12, %12 : vector<1x128xf32>
    %16 = arith.subf %14, %15 : vector<1x128xf32>
    %cst_11 = arith.constant 0.000000e+00 : f32
    %17 = vector.broadcast %cst_11 : f32 to vector<1x128xf32>
    %18 = arith.maximumf %16, %17 : vector<1x128xf32>
    %cst_12 = arith.constant 9.99999974E-6 : f32
    %19 = vector.broadcast %cst_12 : f32 to vector<1x128xf32>
    %20 = arith.addf %18, %19 : vector<1x128xf32>
    %21 = math.rsqrt %20 : vector<1x128xf32>
    %22 = arith.mulf %9, %21 : vector<1x128xf32>
    %23 = arith.mulf %12, %22 : vector<1x128xf32>
    %24 = arith.subf %10, %23 : vector<1x128xf32>
    %25 = vector.broadcast %22 : vector<1x128xf32> to vector<256x128xf32>
    %26 = arith.mulf %3, %25 : vector<256x128xf32>
    %27 = vector.broadcast %24 : vector<1x128xf32> to vector<256x128xf32>
    %28 = arith.addf %26, %27 : vector<256x128xf32>
    %29 = vector.shape_cast %28 : vector<256x128xf32> to vector<4x64x128xf32>
    %30 = vector.extract_strided_slice %29 {offsets = [0, 0, 0], sizes = [1, 64, 128], strides = [1, 1, 1]} : vector<4x64x128xf32> to vector<1x64x128xf32>
    %31 = vector.shape_cast %30 : vector<1x64x128xf32> to vector<64x128xf32>
    %32 = vector.extract_strided_slice %29 {offsets = [1, 0, 0], sizes = [1, 64, 128], strides = [1, 1, 1]} : vector<4x64x128xf32> to vector<1x64x128xf32>
    %33 = vector.shape_cast %32 : vector<1x64x128xf32> to vector<64x128xf32>
    %34 = arith.maximumf %31, %33 : vector<64x128xf32>
    %35 = vector.extract_strided_slice %29 {offsets = [2, 0, 0], sizes = [1, 64, 128], strides = [1, 1, 1]} : vector<4x64x128xf32> to vector<1x64x128xf32>
    %36 = vector.shape_cast %35 : vector<1x64x128xf32> to vector<64x128xf32>
    %37 = vector.extract_strided_slice %29 {offsets = [3, 0, 0], sizes = [1, 64, 128], strides = [1, 1, 1]} : vector<4x64x128xf32> to vector<1x64x128xf32>
    %38 = vector.shape_cast %37 : vector<1x64x128xf32> to vector<64x128xf32>
    %39 = arith.maximumf %36, %38 : vector<64x128xf32>
    %40 = arith.maximumf %34, %39 : vector<64x128xf32>
    %cst_13 = arith.constant 0.000000e+00 : f32
    %41 = vector.broadcast %cst_13 : f32 to vector<64x128xf32>
    %42 = arith.maximumf %40, %41 : vector<64x128xf32>
    %c0_14 = arith.constant 0 : index
    %c0_15 = arith.constant 0 : index
    %43 = vector.load %arg4[%c0_14, %c0_15] : memref<64x128xf32, #tpu.memory_space<vmem>>, vector<64x128xf32>
    tpu.vector_store %arg4[%c0_14, %c0_15], %42 {strides = array<i32>} : memref<64x128xf32, #tpu.memory_space<vmem>>, vector<64x128xf32>,
    return
  }
  func.func @transform_0(%arg0: i32) -> (i32, i32, i32) {
    %c0_i32 = arith.constant 0 : i32
    %c0_i32_0 = arith.constant 0 : i32
    %c0_i32_1 = arith.constant 0 : i32
    %c0_i32_2 = arith.constant 0 : i32
    return %c0_i32, %c0_i32_0, %c0_i32_1 : i32, i32, i32
  }
  func.func @transform_1(%arg0: i32) -> (i32, i32) {
    %c0_i32 = arith.constant 0 : i32
    %c0_i32_0 = arith.constant 0 : i32
    %c0_i32_1 = arith.constant 0 : i32
    return %c0_i32, %c0_i32_0 : i32, i32
  }
  func.func @transform_2(%arg0: i32) -> (i32, i32) {
    %c0_i32 = arith.constant 0 : i32
    %c0_i32_0 = arith.constant 0 : i32
    %c0_i32_1 = arith.constant 0 : i32
    return %c0_i32, %c0_i32_0 : i32, i32
  }
  func.func @transform_3(%arg0: i32) -> (i32, i32) {
    %c0_i32 = arith.constant 0 : i32
    %c0_i32_0 = arith.constant 0 : i32
    %c0_i32_1 = arith.constant 0 : i32
    return %c0_i32, %c0_i32_0 : i32, i32
  }
}

module attributes {stable_mosaic.version = 11 : i64} {
  func.func @tail_kernel(%arg0: i32, %arg1: memref<2x400xbf16, #tpu.memory_space<vmem>>, %arg2: memref<400x128xbf16, #tpu.memory_space<vmem>>, %arg3: memref<128x128xbf16, #tpu.memory_space<vmem>>, %arg4: memref<128x128xbf16, #tpu.memory_space<vmem>>, %arg5: memref<8x128xf32, #tpu.memory_space<vmem>>, %arg6: memref<2x128xf32, #tpu.memory_space<vmem>>) attributes {dimension_semantics = [#tpu.dimension_semantics<arbitrary>], iteration_bounds = array<i64: 1>, scalar_prefetch = 0 : i64, scratch_operands = 0 : i64, tpu.core_type = #tpu.core_type<tc>, window_params = [{pipeline_mode = #tpu.pipeline_mode<synchronous>, transform_indices = @transform_0, window_bounds = array<i64: 2, 400>}, {pipeline_mode = #tpu.pipeline_mode<synchronous>, transform_indices = @transform_1, window_bounds = array<i64: 400, 128>}, {pipeline_mode = #tpu.pipeline_mode<synchronous>, transform_indices = @transform_2, window_bounds = array<i64: 128, 128>}, {pipeline_mode = #tpu.pipeline_mode<synchronous>, transform_indices = @transform_3, window_bounds = array<i64: 128, 128>}, {pipeline_mode = #tpu.pipeline_mode<synchronous>, transform_indices = @transform_4, window_bounds = array<i64: 8, 128>}, {pipeline_mode = #tpu.pipeline_mode<synchronous>, transform_indices = @transform_5, window_bounds = array<i64: 2, 128>}]} {
    %c0 = arith.constant 0 : index
    %c0_0 = arith.constant 0 : index
    %0 = vector.load %arg1[%c0, %c0_0] : memref<2x400xbf16, #tpu.memory_space<vmem>>, vector<2x400xbf16>
    %c0_1 = arith.constant 0 : index
    %c0_2 = arith.constant 0 : index
    %1 = vector.load %arg2[%c0_1, %c0_2] : memref<400x128xbf16, #tpu.memory_space<vmem>>, vector<400x128xbf16>
    %cst = arith.constant dense<0.000000e+00> : vector<2x128xf32>
    %2 = tpu.matmul %0, %1, %cst {dimension_numbers = #tpu.dot_dimension_numbers<[1], [0], [0], [1], [0, 0, 1, 1], [], []>} : vector<2x400xbf16>, vector<400x128xbf16>, vector<2x128xf32> -> vector<2x128xf32>
    %cst_3 = arith.constant dense<0.000000e+00> : vector<128xf32>
    %3 = vector.multi_reduction <add>, %2, %cst_3 [0] : vector<2x128xf32> to vector<128xf32>
    %4 = vector.shape_cast %3 : vector<128xf32> to vector<1x128xf32>
    %5 = arith.mulf %2, %2 : vector<2x128xf32>
    %cst_4 = arith.constant dense<0.000000e+00> : vector<128xf32>
    %6 = vector.multi_reduction <add>, %5, %cst_4 [0] : vector<2x128xf32> to vector<128xf32>
    %7 = vector.shape_cast %6 : vector<128xf32> to vector<1x128xf32>
    %c0_5 = arith.constant 0 : index
    %c0_6 = arith.constant 0 : index
    %8 = vector.load %arg5[%c0_5, %c0_6] : memref<8x128xf32, #tpu.memory_space<vmem>>, vector<1x128xf32>
    %c1 = arith.constant 1 : index
    %c0_7 = arith.constant 0 : index
    %9 = vector.load %arg5[%c1, %c0_7] : memref<8x128xf32, #tpu.memory_space<vmem>>, vector<1x128xf32>
    %cst_8 = arith.constant 5.000000e-01 : f32
    %10 = vector.broadcast %cst_8 : f32 to vector<1x128xf32>
    %11 = arith.mulf %4, %10 : vector<1x128xf32>
    %cst_9 = arith.constant 5.000000e-01 : f32
    %12 = vector.broadcast %cst_9 : f32 to vector<1x128xf32>
    %13 = arith.mulf %7, %12 : vector<1x128xf32>
    %14 = arith.mulf %11, %11 : vector<1x128xf32>
    %15 = arith.subf %13, %14 : vector<1x128xf32>
    %cst_10 = arith.constant 0.000000e+00 : f32
    %16 = vector.broadcast %cst_10 : f32 to vector<1x128xf32>
    %17 = arith.maximumf %15, %16 : vector<1x128xf32>
    %cst_11 = arith.constant 9.99999974E-6 : f32
    %18 = vector.broadcast %cst_11 : f32 to vector<1x128xf32>
    %19 = arith.addf %17, %18 : vector<1x128xf32>
    %20 = math.rsqrt %19 : vector<1x128xf32>
    %21 = arith.mulf %8, %20 : vector<1x128xf32>
    %22 = arith.mulf %11, %21 : vector<1x128xf32>
    %23 = arith.subf %9, %22 : vector<1x128xf32>
    %24 = vector.broadcast %21 : vector<1x128xf32> to vector<2x128xf32>
    %25 = arith.mulf %2, %24 : vector<2x128xf32>
    %26 = vector.broadcast %23 : vector<1x128xf32> to vector<2x128xf32>
    %27 = arith.addf %25, %26 : vector<2x128xf32>
    %cst_12 = arith.constant 0.000000e+00 : f32
    %28 = vector.broadcast %cst_12 : f32 to vector<2x128xf32>
    %29 = arith.maximumf %27, %28 : vector<2x128xf32>
    %30 = arith.truncf %29 : vector<2x128xf32> to vector<2x128xbf16>
    %c0_13 = arith.constant 0 : index
    %c0_14 = arith.constant 0 : index
    %31 = vector.load %arg3[%c0_13, %c0_14] : memref<128x128xbf16, #tpu.memory_space<vmem>>, vector<128x128xbf16>
    %cst_15 = arith.constant dense<0.000000e+00> : vector<2x128xf32>
    %32 = tpu.matmul %30, %31, %cst_15 {dimension_numbers = #tpu.dot_dimension_numbers<[1], [0], [0], [1], [0, 0, 1, 1], [], []>} : vector<2x128xbf16>, vector<128x128xbf16>, vector<2x128xf32> -> vector<2x128xf32>
    %c2 = arith.constant 2 : index
    %c0_16 = arith.constant 0 : index
    %33 = vector.load %arg5[%c2, %c0_16] : memref<8x128xf32, #tpu.memory_space<vmem>>, vector<1x128xf32>
    %34 = vector.broadcast %33 : vector<1x128xf32> to vector<2x128xf32>
    %35 = arith.addf %32, %34 : vector<2x128xf32>
    %cst_17 = arith.constant 0.000000e+00 : f32
    %36 = vector.broadcast %cst_17 : f32 to vector<2x128xf32>
    %37 = arith.maximumf %35, %36 : vector<2x128xf32>
    %38 = arith.truncf %37 : vector<2x128xf32> to vector<2x128xbf16>
    %c0_18 = arith.constant 0 : index
    %c0_19 = arith.constant 0 : index
    %39 = vector.load %arg4[%c0_18, %c0_19] : memref<128x128xbf16, #tpu.memory_space<vmem>>, vector<128x128xbf16>
    %cst_20 = arith.constant dense<0.000000e+00> : vector<2x128xf32>
    %40 = tpu.matmul %38, %39, %cst_20 {dimension_numbers = #tpu.dot_dimension_numbers<[1], [0], [0], [1], [0, 0, 1, 1], [], []>} : vector<2x128xbf16>, vector<128x128xbf16>, vector<2x128xf32> -> vector<2x128xf32>
    %c3 = arith.constant 3 : index
    %c0_21 = arith.constant 0 : index
    %41 = vector.load %arg5[%c3, %c0_21] : memref<8x128xf32, #tpu.memory_space<vmem>>, vector<1x128xf32>
    %42 = vector.broadcast %41 : vector<1x128xf32> to vector<2x128xf32>
    %43 = arith.addf %40, %42 : vector<2x128xf32>
    %c0_22 = arith.constant 0 : index
    %c0_23 = arith.constant 0 : index
    %44 = vector.load %arg6[%c0_22, %c0_23] : memref<2x128xf32, #tpu.memory_space<vmem>>, vector<2x128xf32>
    tpu.vector_store %arg6[%c0_22, %c0_23], %43 {strides = array<i32>} : memref<2x128xf32, #tpu.memory_space<vmem>>, vector<2x128xf32>,
    return
  }
  func.func @transform_0(%arg0: i32) -> (i32, i32) {
    %c0_i32 = arith.constant 0 : i32
    %c0_i32_0 = arith.constant 0 : i32
    %c0_i32_1 = arith.constant 0 : i32
    return %c0_i32, %c0_i32_0 : i32, i32
  }
  func.func @transform_1(%arg0: i32) -> (i32, i32) {
    %c0_i32 = arith.constant 0 : i32
    %c0_i32_0 = arith.constant 0 : i32
    %c0_i32_1 = arith.constant 0 : i32
    return %c0_i32, %c0_i32_0 : i32, i32
  }
  func.func @transform_2(%arg0: i32) -> (i32, i32) {
    %c0_i32 = arith.constant 0 : i32
    %c0_i32_0 = arith.constant 0 : i32
    %c0_i32_1 = arith.constant 0 : i32
    return %c0_i32, %c0_i32_0 : i32, i32
  }
  func.func @transform_3(%arg0: i32) -> (i32, i32) {
    %c0_i32 = arith.constant 0 : i32
    %c0_i32_0 = arith.constant 0 : i32
    %c0_i32_1 = arith.constant 0 : i32
    return %c0_i32, %c0_i32_0 : i32, i32
  }
  func.func @transform_4(%arg0: i32) -> (i32, i32) {
    %c0_i32 = arith.constant 0 : i32
    %c0_i32_0 = arith.constant 0 : i32
    %c0_i32_1 = arith.constant 0 : i32
    return %c0_i32, %c0_i32_0 : i32, i32
  }
  func.func @transform_5(%arg0: i32) -> (i32, i32) {
    %c0_i32 = arith.constant 0 : i32
    %c0_i32_0 = arith.constant 0 : i32
    %c0_i32_1 = arith.constant 0 : i32
    return %c0_i32, %c0_i32_0 : i32, i32
  }
}

</mosaic_0001>

<bundles_post_ra>
// kernel: netbn_forward.3
= control target key start
LH: loop header
LB: loop body
LE: loop exit
PB: predicated region body
PF: predicated region fallthrough
CT: control target
= control target key end

     0   :  { %vm1031_vm0 = vcmask 1043456   ;;  %vm1032_vm1 = vcmask 1044480   ;;  %v3772_v1 = vmov 65535   ;;  %vm730_vm2 = vcmask 203776   ;;  %s7469_s1 = inlined_call_operand.vmem [shape: bf16[25,128], index: 1, kind: input, shape index: {}]   ;;  %s7470_s0 = inlined_call_operand.vmem [shape: bf16[4,400,25], index: 0, kind: input, shape index: {}]   ;;  %s7471_s2 = inlined_call_operand.vmem [shape: f32[8,128], index: 2, kind: input, shape index: {}]   ;;  %s7472_s3 = inlined_call_operand.vmem [shape: f32[400,128], index: 3, kind: output, shape index: {}]  }
   0x1   :  { %v3668_v0 = vld [vmem:[%s7469_s1 + $0x8] sm:$0x1f]   ;;  %v1033_v2 = vsel %vm1031_vm0, 4294967295, %v3772_v1  ;;  %v3670_v4 = vld [vmem:[%s7470_s0] sm:$0xff]   ;;  %v3672_v8 = vld [vmem:[%s7470_s0 + $0x10] sm:$0xff]  }
   0x2   :  { %v1034_v3 = vsel %vm1032_vm1, %v1033_v2, 0  ;;  %v3669_v6 = vld [vmem:[%s7469_s1] sm:$0xff]   ;;  %3463 = vmatprep.mubr.msk.bf16.mxu0 %vm730_vm2, %v3670_v4  ;;  %v3671_v7 = vld [vmem:[%s7470_s0 + $0x8] sm:$0xff]   ;;  %v3673_v9 = vld [vmem:[%s7470_s0 + $0x18] sm:$0xff]  }
   0x3   :  { %v1036_v5 = vand.u32 %v3668_v0, %v1034_v3  ;;  %v3674_v10 = vld [vmem:[%s7470_s0 + $0x20] sm:$0xff]   ;;  %v3675_v11 = vld [vmem:[%s7470_s0 + $0x28] sm:$0xff]   ;;  %v3676_v12 = vld [vmem:[%s7470_s0 + $0x30] sm:$0xff]  }
   0x4   :  { %v3677_v13 = vld [vmem:[%s7470_s0 + $0x38] sm:$0xff]   ;;  %v3678_v14 = vld [vmem:[%s7470_s0 + $0x40] sm:$0xff]   ;;  %v3679_v15 = vld [vmem:[%s7470_s0 + $0x48] sm:$0xff]  }
   0x5   :  { %3459 = vmatprep.subr.bf16.mxu0 %v1036_v5  ;;  %3663 = vmatprep.subr.bf16.mxu1 %v1036_v5  ;;  %v3680_v16 = vld [vmem:[%s7470_s0 + $0x50] sm:$0xff]   ;;  %v3681_v17 = vld [vmem:[%s7470_s0 + $0x58] sm:$0xff]   ;;  %v3682_v18 = vld [vmem:[%s7470_s0 + $0x60] sm:$0xff]  }
   0x6   :  { %3460 = vmatpush3.bf16.msra.mxu0 %v1036_v5  ;;  %3665 = vmatpush3.bf16.msra.mxu1 %v1036_v5  ;;  %v3683_v19 = vld [vmem:[%s7470_s0 + $0x68] sm:$0xff]   ;;  %v3684_v20 = vld [vmem:[%s7470_s0 + $0x70] sm:$0xff]   ;;  %v3685_v21 = vld [vmem:[%s7470_s0 + $0x78] sm:$0xff]  }
   0x7   :  { %3461 = vmatprep.subr.bf16.mxu0 %v3669_v6  ;;  %3664 = vmatprep.subr.bf16.mxu1 %v3669_v6  ;;  %v3686_v22 = vld [vmem:[%s7470_s0 + $0x80] sm:$0xff]   ;;  %v3687_v23 = vld [vmem:[%s7470_s0 + $0x88] sm:$0xff]   ;;  %v3688_v24 = vld [vmem:[%s7470_s0 + $0x90] sm:$0xff]  }
   0x8   :  { %v3720_v25 = vld [vmem:[%s7470_s0 + $0x190] sm:$0xff]   ;;  %v3721_v26 = vld [vmem:[%s7470_s0 + $0x198] sm:$0xff]   ;;  %v3690_v28 = vld [vmem:[%s7470_s0 + $0xa0] sm:$0xff]  }
   0x9   :  { %3563 = vmatprep.mubr.msk.bf16.mxu1 %vm730_vm2, %v3720_v25  ;;  %v3689_v27 = vld [vmem:[%s7470_s0 + $0x98] sm:$0xff]   ;;  %v3722_v29 = vld [vmem:[%s7470_s0 + $0x1a0] sm:$0xff]   ;;  %v3723_v30 = vld [vmem:[%s7470_s0 + $0x1a8] sm:$0xff]  }
   0xa   :  { %3462 = vmatpush3.bf16.msra.mxu0 %v3669_v6  ;;  %3666 = vmatpush3.bf16.msra.mxu1 %v3669_v6  ;;  %v3691_v31 = vld [vmem:[%s7470_s0 + $0xa8] sm:$0xff]   ;;  %v3692_v32 = vld [vmem:[%s7470_s0 + $0xb0] sm:$0xff]   ;;  %v3725_v34 = vld [vmem:[%s7470_s0 + $0x1b8] sm:$0xff]  }
   0xb   :  { %v3724_v33 = vld [vmem:[%s7470_s0 + $0x1b0] sm:$0xff]   ;;  %v3693_v35 = vld [vmem:[%s7470_s0 + $0xb8] sm:$0xff]   ;;  %v3694_v36 = vld [vmem:[%s7470_s0 + $0xc0] sm:$0xff]  }
   0xc   :  { %v3726_v37 = vld [vmem:[%s7470_s0 + $0x1c0] sm:$0xff]   ;;  %v3727_v38 = vld [vmem:[%s7470_s0 + $0x1c8] sm:$0xff]   ;;  %v3696_v40 = vld [vmem:[%s7470_s0 + $0xd0] sm:$0xff]  }
   0xd   :  { %3464 = vmatmul.mubr.msk.bf16.vlgmr.msra.gmra.mxu0 %vm730_vm2, %v3671_v7  ;;  %3564 = vmatmul.mubr.msk.bf16.vlgmr.msra.gmra.mxu1 %vm730_vm2, %v3721_v26  ;;  %v3695_v39 = vld [vmem:[%s7470_s0 + $0xc8] sm:$0xff]   ;;  %v3728_v41 = vld [vmem:[%s7470_s0 + $0x1d0] sm:$0xff]   ;;  %v3729_v42 = vld [vmem:[%s7470_s0 + $0x1d8] sm:$0xff]  }
   0xe   :  { %3467 = vmatprep.mubr.msk.bf16.mxu0 %vm730_vm2, %v3672_v8  ;;  %3567 = vmatprep.mubr.msk.bf16.mxu1 %vm730_vm2, %v3722_v29  ;;  %v3697_v43 = vld [vmem:[%s7470_s0 + $0xd8] sm:$0xff]   ;;  %v3698_v44 = vld [vmem:[%s7470_s0 + $0xe0] sm:$0xff]   ;;  %v3731_v46 = vld [vmem:[%s7470_s0 + $0x1e8] sm:$0xff]  }
   0xf   :  { %v3730_v45 = vld [vmem:[%s7470_s0 + $0x1e0] sm:$0xff]   ;;  %v3699_v47 = vld [vmem:[%s7470_s0 + $0xe8] sm:$0xff]   ;;  %v3700_v48 = vld [vmem:[%s7470_s0 + $0xf0] sm:$0xff]  }
  0x10   :  { %v3732_v49 = vld [vmem:[%s7470_s0 + $0x1f0] sm:$0xff]   ;;  %v3733_v50 = vld [vmem:[%s7470_s0 + $0x1f8] sm:$0xff]   ;;  %v3702_v52 = vld [vmem:[%s7470_s0 + $0x100] sm:$0xff]  }
  0x11   :  { %v3701_v51 = vld [vmem:[%s7470_s0 + $0xf8] sm:$0xff]   ;;  %v3734_v53 = vld [vmem:[%s7470_s0 + $0x200] sm:$0xff]   ;;  %v3735_v54 = vld [vmem:[%s7470_s0 + $0x208] sm:$0xff]  }
  0x12   :  { %v3703_v55 = vld [vmem:[%s7470_s0 + $0x108] sm:$0xff]   ;;  %v3704_v56 = vld [vmem:[%s7470_s0 + $0x110] sm:$0xff]   ;;  %v3737_v58 = vld [vmem:[%s7470_s0 + $0x218] sm:$0xff]  }
  0x13   :  { %v3736_v57 = vld [vmem:[%s7470_s0 + $0x210] sm:$0xff]   ;;  %v3705_v59 = vld [vmem:[%s7470_s0 + $0x118] sm:$0xff]   ;;  %v3706_v60 = vld [vmem:[%s7470_s0 + $0x120] sm:$0xff]  }
  0x14   :  { %v3738_v61 = vld [vmem:[%s7470_s0 + $0x220] sm:$0xff]   ;;  %v3739_v62 = vld [vmem:[%s7470_s0 + $0x228] sm:$0xff]   ;;  %v3708_v0 = vld [vmem:[%s7470_s0 + $0x130] sm:$0xff]  }
  0x15   :  { %3468 = vmatmul.mubr.msk.bf16.gmra.mxu0 %vm730_vm2, %v3673_v9  ;;  %3568 = vmatmul.mubr.msk.bf16.gmra.mxu1 %vm730_vm2, %v3723_v30  ;;  %v3707_v63 = vld [vmem:[%s7470_s0 + $0x128] sm:$0xff]   ;;  %v3740_v1 = vld [vmem:[%s7470_s0 + $0x230] sm:$0xff]   ;;  %v3741_v2 = vld [vmem:[%s7470_s0 + $0x238] sm:$0xff]  }
  0x16   :  { %3471 = vmatprep.mubr.msk.bf16.mxu0 %vm730_vm2, %v3674_v10  ;;  %3571 = vmatprep.mubr.msk.bf16.mxu1 %vm730_vm2, %v3724_v33  ;;  %v3709_v3 = vld [vmem:[%s7470_s0 + $0x138] sm:$0xff]   ;;  %v3710_v4 = vld [vmem:[%s7470_s0 + $0x140] sm:$0xff]   ;;  %v3743_v6 = vld [vmem:[%s7470_s0 + $0x248] sm:$0xff]  }
  0x17   :  { %v3742_v5 = vld [vmem:[%s7470_s0 + $0x240] sm:$0xff]   ;;  %v3711_v7 = vld [vmem:[%s7470_s0 + $0x148] sm:$0xff]   ;;  %v3712_v8 = vld [vmem:[%s7470_s0 + $0x150] sm:$0xff]  }
  0x18   :  { %v3744_v9 = vld [vmem:[%s7470_s0 + $0x250] sm:$0xff]   ;;  %v3745_v10 = vld [vmem:[%s7470_s0 + $0x258] sm:$0xff]   ;;  %v3754_v33 = vld [vmem:[%s7470_s0 + $0x2a0] sm:$0xff]  }
  0x19   :  { %v3753_v26 = vld [vmem:[%s7470_s0 + $0x298] sm:$0xff]  }
  0x1d   :  { %3472 = vmatmul.mubr.msk.bf16.gmra.mxu0 %vm730_vm2, %v3675_v11  ;;  %3572 = vmatmul.mubr.msk.bf16.gmra.mxu1 %vm730_vm2, %v3725_v34  ;;  %v3713_v11 = vld [vmem:[%s7470_s0 + $0x158] sm:$0xff]  }
  0x1e   :  { %3475 = vmatprep.mubr.msk.bf16.mxu0 %vm730_vm2, %v3676_v12  ;;  %3575 = vmatprep.mubr.msk.bf16.mxu1 %vm730_vm2, %v3726_v37  ;;  %v3714_v12 = vld [vmem:[%s7470_s0 + $0x160] sm:$0xff]  }
  0x25   :  { %3476 = vmatmul.mubr.msk.bf16.gmra.mxu0 %vm730_vm2, %v3677_v13  ;;  %3576 = vmatmul.mubr.msk.bf16.gmra.mxu1 %vm730_vm2, %v3727_v38  ;;  %v3746_v13 = vld [vmem:[%s7470_s0 + $0x260] sm:$0xff]  }
  0x26   :  { %3479 = vmatprep.mubr.msk.bf16.mxu0 %vm730_vm2, %v3678_v14  ;;  %3579 = vmatprep.mubr.msk.bf16.mxu1 %vm730_vm2, %v3728_v41  ;;  %v3747_v14 = vld [vmem:[%s7470_s0 + $0x268] sm:$0xff]  }
  0x2d   :  { %3480 = vmatmul.mubr.msk.bf16.gmra.mxu0 %vm730_vm2, %v3679_v15  ;;  %3580 = vmatmul.mubr.msk.bf16.gmra.mxu1 %vm730_vm2, %v3729_v42  ;;  %v3715_v15 = vld [vmem:[%s7470_s0 + $0x168] sm:$0xff]  }
  0x2e   :  { %3483 = vmatprep.mubr.msk.bf16.mxu0 %vm730_vm2, %v3680_v16  ;;  %3583 = vmatprep.mubr.msk.bf16.mxu1 %vm730_vm2, %v3730_v45  ;;  %v3716_v16 = vld [vmem:[%s7470_s0 + $0x170] sm:$0xff]  }
  0x35   :  { %3484 = vmatmul.mubr.msk.bf16.gmra.mxu0 %vm730_vm2, %v3681_v17  ;;  %3584 = vmatmul.mubr.msk.bf16.gmra.mxu1 %vm730_vm2, %v3731_v46  ;;  %v3748_v17 = vld [vmem:[%s7470_s0 + $0x270] sm:$0xff]  }
  0x36   :  { %3487 = vmatprep.mubr.msk.bf16.mxu0 %vm730_vm2, %v3682_v18  ;;  %3587 = vmatprep.mubr.msk.bf16.mxu1 %vm730_vm2, %v3732_v49  ;;  %v3749_v18 = vld [vmem:[%s7470_s0 + $0x278] sm:$0xff]  }
  0x3d   :  { %3488 = vmatmul.mubr.msk.bf16.gmra.mxu0 %vm730_vm2, %v3683_v19  ;;  %3588 = vmatmul.mubr.msk.bf16.gmra.mxu1 %vm730_vm2, %v3733_v50  ;;  %v3717_v19 = vld [vmem:[%s7470_s0 + $0x178] sm:$0xff]  }
  0x3e   :  { %3491 = vmatprep.mubr.msk.bf16.mxu0 %vm730_vm2, %v3684_v20  ;;  %3591 = vmatprep.mubr.msk.bf16.mxu1 %vm730_vm2, %v3734_v53  ;;  %v3718_v20 = vld [vmem:[%s7470_s0 + $0x180] sm:$0xff]   ;;  %v3757_v53 = vld [vmem:[%s7470_s0 + $0x2b8] sm:$0xff]  }
  0x45   :  { %3492 = vmatmul.mubr.msk.bf16.gmra.mxu0 %vm730_vm2, %v3685_v21  ;;  %3592 = vmatmul.mubr.msk.bf16.gmra.mxu1 %vm730_vm2, %v3735_v54  ;;  %v3750_v21 = vld [vmem:[%s7470_s0 + $0x280] sm:$0xff]  }
  0x46   :  { %3495 = vmatprep.mubr.msk.bf16.mxu0 %vm730_vm2, %v3686_v22  ;;  %3595 = vmatprep.mubr.msk.bf16.mxu1 %vm730_vm2, %v3736_v57  ;;  %v3751_v22 = vld [vmem:[%s7470_s0 + $0x288] sm:$0xff]  }
  0x4d   :  { %3496 = vmatmul.mubr.msk.bf16.gmra.mxu0 %vm730_vm2, %v3687_v23  ;;  %3596 = vmatmul.mubr.msk.bf16.gmra.mxu1 %vm730_vm2, %v3737_v58  ;;  %v3719_v23 = vld [vmem:[%s7470_s0 + $0x188] sm:$0xff]  }
  0x4e   :  { %3499 = vmatprep.mubr.msk.bf16.mxu0 %vm730_vm2, %v3688_v24  ;;  %3599 = vmatprep.mubr.msk.bf16.mxu1 %vm730_vm2, %v3738_v61  ;;  %v3752_v24 = vld [vmem:[%s7470_s0 + $0x290] sm:$0xff]  }
  0x55   :  { %3500 = vmatmul.mubr.msk.bf16.gmra.mxu0 %vm730_vm2, %v3689_v27  ;;  %3600 = vmatmul.mubr.msk.bf16.gmra.mxu1 %vm730_vm2, %v3739_v62 }
  0x56   :  { %3503 = vmatprep.mubr.msk.bf16.mxu0 %vm730_vm2, %v3690_v28  ;;  %3603 = vmatprep.mubr.msk.bf16.mxu1 %vm730_vm2, %v3740_v1 }
  0x5d   :  { %3504 = vmatmul.mubr.msk.bf16.gmra.mxu0 %vm730_vm2, %v3691_v31  ;;  %3604 = vmatmul.mubr.msk.bf16.gmra.mxu1 %vm730_vm2, %v3741_v2 }
  0x5e   :  { %3507 = vmatprep.mubr.msk.bf16.mxu0 %vm730_vm2, %v3692_v32  ;;  %3607 = vmatprep.mubr.msk.bf16.mxu1 %vm730_vm2, %v3742_v5  ;;  %v3758_v5 = vld [vmem:[%s7470_s0 + $0x2c0] sm:$0xff]  }
  0x65   :  { %3508 = vmatmul.mubr.msk.bf16.gmra.mxu0 %vm730_vm2, %v3693_v35  ;;  %3608 = vmatmul.mubr.msk.bf16.gmra.mxu1 %vm730_vm2, %v3743_v6  ;;  %v3755_v35 = vld [vmem:[%s7470_s0 + $0x2a8] sm:$0xff]  }
  0x66   :  { %3511 = vmatprep.mubr.msk.bf16.mxu0 %vm730_vm2, %v3694_v36  ;;  %3611 = vmatprep.mubr.msk.bf16.mxu1 %vm730_vm2, %v3744_v9 }
  0x6d   :  { %3512 = vmatmul.mubr.msk.bf16.gmra.mxu0 %vm730_vm2, %v3695_v39  ;;  %3612 = vmatmul.mubr.msk.bf16.gmra.mxu1 %vm730_vm2, %v3745_v10 }
  0x6e   :  { %3515 = vmatprep.mubr.msk.bf16.mxu0 %vm730_vm2, %v3696_v40  ;;  %3615 = vmatprep.mubr.msk.bf16.mxu1 %vm730_vm2, %v3746_v13 }
  0x75   :  { %3516 = vmatmul.mubr.msk.bf16.gmra.mxu0 %vm730_vm2, %v3697_v43  ;;  %3616 = vmatmul.mubr.msk.bf16.gmra.mxu1 %vm730_vm2, %v3747_v14 }
  0x76   :  { %3519 = vmatprep.mubr.msk.bf16.mxu0 %vm730_vm2, %v3698_v44  ;;  %3619 = vmatprep.mubr.msk.bf16.mxu1 %vm730_vm2, %v3748_v17 }
  0x7d   :  { %3520 = vmatmul.mubr.msk.bf16.gmra.mxu0 %vm730_vm2, %v3699_v47  ;;  %3620 = vmatmul.mubr.msk.bf16.gmra.mxu1 %vm730_vm2, %v3749_v18 }
  0x7e   :  { %3523 = vmatprep.mubr.msk.bf16.mxu0 %vm730_vm2, %v3700_v48  ;;  %3623 = vmatprep.mubr.msk.bf16.mxu1 %vm730_vm2, %v3750_v21 }
  0x85   :  { %3524 = vmatmul.mubr.msk.bf16.gmra.mxu0 %vm730_vm2, %v3701_v51  ;;  %3624 = vmatmul.mubr.msk.bf16.gmra.mxu1 %vm730_vm2, %v3751_v22  ;;  %v3756_v51 = vld [vmem:[%s7470_s0 + $0x2b0] sm:$0xff]  }
  0x86   :  { %3527 = vmatprep.mubr.msk.bf16.mxu0 %vm730_vm2, %v3702_v52  ;;  %3627 = vmatprep.mubr.msk.bf16.mxu1 %vm730_vm2, %v3752_v24 }
  0x8d   :  { %3528 = vmatmul.mubr.msk.bf16.gmra.mxu0 %vm730_vm2, %v3703_v55  ;;  %3628 = vmatmul.mubr.msk.bf16.gmra.mxu1 %vm730_vm2, %v3753_v26  ;;  %v3761_v26 = vld [vmem:[%s7470_s0 + $0x2d8] sm:$0xff]  }
  0x8e   :  { %3531 = vmatprep.mubr.msk.bf16.mxu0 %vm730_vm2, %v3704_v56  ;;  %3631 = vmatprep.mubr.msk.bf16.mxu1 %vm730_vm2, %v3754_v33 }
  0x95   :  { %3532 = vmatmul.mubr.msk.bf16.gmra.mxu0 %vm730_vm2, %v3705_v59  ;;  %3632 = vmatmul.mubr.msk.bf16.gmra.mxu1 %vm730_vm2, %v3755_v35 }
  0x96   :  { %3535 = vmatprep.mubr.msk.bf16.mxu0 %vm730_vm2, %v3706_v60  ;;  %3635 = vmatprep.mubr.msk.bf16.mxu1 %vm730_vm2, %v3756_v51  ;;  %v3763_v51 = vld [vmem:[%s7470_s0 + $0x2e8] sm:$0xff]  }
  0x9d   :  { %3536 = vmatmul.mubr.msk.bf16.gmra.mxu0 %vm730_vm2, %v3707_v63  ;;  %3636 = vmatmul.mubr.msk.bf16.gmra.mxu1 %vm730_vm2, %v3757_v53 }
  0x9e   :  { %3539 = vmatprep.mubr.msk.bf16.mxu0 %vm730_vm2, %v3708_v0  ;;  %3639 = vmatprep.mubr.msk.bf16.mxu1 %vm730_vm2, %v3758_v5 }
  0xa5   :  { %3540 = vmatmul.mubr.msk.bf16.gmra.mxu0 %vm730_vm2, %v3709_v3 }
  0xa6   :  { %3543 = vmatprep.mubr.msk.bf16.mxu0 %vm730_vm2, %v3710_v4 }
  0xad   :  { %3544 = vmatmul.mubr.msk.bf16.gmra.mxu0 %vm730_vm2, %v3711_v7  ;;  %v3759_v7 = vld [vmem:[%s7470_s0 + $0x2c8] sm:$0xff]  }
  0xae   :  { %3547 = vmatprep.mubr.msk.bf16.mxu0 %vm730_vm2, %v3712_v8  ;;  %3640 = vmatmul.mubr.msk.bf16.gmra.mxu1 %vm730_vm2, %v3759_v7 }
  0xb5   :  { %3548 = vmatmul.mubr.msk.bf16.gmra.mxu0 %vm730_vm2, %v3713_v11 }
  0xb6   :  { %3551 = vmatprep.mubr.msk.bf16.mxu0 %vm730_vm2, %v3714_v12 }
  0xbd   :  { %3552 = vmatmul.mubr.msk.bf16.gmra.mxu0 %vm730_vm2, %v3715_v15 }
  0xbe   :  { %3555 = vmatprep.mubr.msk.bf16.mxu0 %vm730_vm2, %v3716_v16 }
  0xc5   :  { %3556 = vmatmul.mubr.msk.bf16.gmra.mxu0 %vm730_vm2, %v3717_v19 }
  0xc6   :  { %3559 = vmatprep.mubr.msk.bf16.mxu0 %vm730_vm2, %v3718_v20 }
  0xcd   :  { %v4129_v25 = vpop.f32.mrf.mxu0  ;;  %3560 = vmatmul.mubr.msk.bf16.gmra.mxu0 %vm730_vm2, %v3719_v23  ;;  %v3760_v23 = vld [vmem:[%s7470_s0 + $0x2d0] sm:$0xff]  }
  0xce   :  { %7738 = vst [vmem:[#allocation2_spill] sm:$0xff] %v4129_v25  ;;  %v2078_v36 = vmul.f32 %v4129_v25, %v4129_v25  ;;  %3643 = vmatprep.mubr.msk.bf16.mxu1 %vm730_vm2, %v3760_v23 }
  0xcf   :  { %v4136_v27 = vpop.f32.mrf.mxu0  ;;  %3644 = vmatmul.mubr.msk.bf16.gmra.mxu1 %vm730_vm2, %v3761_v26 }
  0xd0   :  { %7739 = vst [vmem:[#allocation3_spill] sm:$0xff] %v4136_v27  ;;  %v2076_v30 = vmul.f32 %v4136_v27, %v4136_v27 }
  0xd1   :  { %v4139_v28 = vpop.f32.mrf.mxu0 }
  0xd2   :  { %7740 = vst [vmem:[#allocation4_spill] sm:$0xff] %v4139_v28  ;;  %v2079_v40 = vmul.f32 %v4139_v28, %v4139_v28 }
  0xd3   :  { %v4141_v29 = vpop.f32.mrf.mxu0 }
  0xd4   :  { %7741 = vst [vmem:[#allocation5_spill] sm:$0xff] %v4141_v29  ;;  %v1871_v31 = vadd.f32 %v4141_v29, %v4136_v27  ;;  %v2077_v32 = vmul.f32 %v4141_v29, %v4141_v29 }
  0xd5   :  { %v4152_v34 = vpop.f32.mrf.mxu0 }
  0xd6   :  { %7742 = vst [vmem:[#allocation6_spill] sm:$0xff] %v4152_v34  ;;  %v1872_v37 = vadd.f32 %v4129_v25, %v1871_v31  ;;  %v2276_v38 = vadd.f32 %v2077_v32, %v2076_v30  ;;  %v2082_v54 = vmul.f32 %v4152_v34, %v4152_v34 }
  0xd7   :  { %v4161_v39 = vpop.f32.mrf.mxu0 }
  0xd8   :  { %7743 = vst [vmem:[#allocation7_spill] sm:$0xff] %v4161_v39  ;;  %v1873_v41 = vadd.f32 %v4139_v28, %v1872_v37  ;;  %v2277_v42 = vadd.f32 %v2276_v38, %v2078_v36  ;;  %v2080_v46 = vmul.f32 %v4161_v39, %v4161_v39 }
  0xd9   :  { %v4167_v43 = vpop.f32.mrf.mxu0 }
  0xda   :  { %7744 = vst [vmem:[#allocation8_spill] sm:$0xff] %v4167_v43  ;;  %v2278_v44 = vadd.f32 %v2277_v42, %v2079_v40  ;;  %v1874_v45 = vadd.f32 %v1873_v41, %v4161_v39  ;;  %v2083_v58 = vmul.f32 %v4167_v43, %v4167_v43 }
  0xdb   :  { %v4172_v47 = vpop.f32.mrf.mxu0 }
  0xdc   :  { %7745 = vst [vmem:[#allocation9_spill] sm:$0xff] %v4172_v47  ;;  %v2279_v48 = vadd.f32 %v2278_v44, %v2080_v46  ;;  %v1875_v49 = vadd.f32 %v1874_v45, %v4172_v47  ;;  %v2081_v50 = vmul.f32 %v4172_v47, %v4172_v47 }
  0xdd   :  { %v4180_v52 = vpop.f32.mrf.mxu0 }
  0xde   :  { %7746 = vst [vmem:[#allocation10_spill] sm:$0xff] %v4180_v52  ;;  %v1876_v55 = vadd.f32 %v4152_v34, %v1875_v49  ;;  %v2280_v56 = vadd.f32 %v2279_v48, %v2081_v50  ;;  %v2086_v8 = vmul.f32 %v4180_v52, %v4180_v52  ;;  %v3762_v49 = vld [vmem:[%s7470_s0 + $0x2e0] sm:$0xff]  }
  0xdf   :  { %v4189_v57 = vpop.f32.mrf.mxu0  ;;  %3647 = vmatprep.mubr.msk.bf16.mxu1 %vm730_vm2, %v3762_v49 }
  0xe0   :  { %7747 = vst [vmem:[#allocation11_spill] sm:$0xff] %v4189_v57  ;;  %v1877_v59 = vadd.f32 %v4167_v43, %v1876_v55  ;;  %v2281_v60 = vadd.f32 %v2280_v56, %v2082_v54  ;;  %v2084_v0 = vmul.f32 %v4189_v57, %v4189_v57  ;;  %3648 = vmatmul.mubr.msk.bf16.gmra.mxu1 %vm730_vm2, %v3763_v51 }
  0xe1   :  { %v4195_v61 = vpop.f32.mrf.mxu0 }
  0xe2   :  { %7748 = vst [vmem:[#allocation12_spill] sm:$0xff] %v4195_v61  ;;  %v2282_v62 = vadd.f32 %v2281_v60, %v2083_v58  ;;  %v1878_v63 = vadd.f32 %v1877_v59, %v4189_v57  ;;  %v2087_v12 = vmul.f32 %v4195_v61, %v4195_v61 }
  0xe3   :  { %v4200_v1 = vpop.f32.mrf.mxu0 }
  0xe4   :  { %7749 = vst [vmem:[#allocation13_spill] sm:$0xff] %v4200_v1  ;;  %v2283_v2 = vadd.f32 %v2282_v62, %v2084_v0  ;;  %v1879_v3 = vadd.f32 %v1878_v63, %v4200_v1  ;;  %v2085_v4 = vmul.f32 %v4200_v1, %v4200_v1 }
  0xe5   :  { %v4208_v6 = vpop.f32.mrf.mxu0 }
  0xe6   :  { %7750 = vst [vmem:[#allocation14_spill] sm:$0xff] %v4208_v6  ;;  %v1880_v9 = vadd.f32 %v4180_v52, %v1879_v3  ;;  %v2284_v10 = vadd.f32 %v2283_v2, %v2085_v4  ;;  %v2090_v30 = vmul.f32 %v4208_v6, %v4208_v6 }
  0xe7   :  { %v4217_v11 = vpop.f32.mrf.mxu0 }
  0xe8   :  { %7751 = vst [vmem:[#allocation15_spill] sm:$0xff] %v4217_v11  ;;  %v1881_v13 = vadd.f32 %v4195_v61, %v1880_v9  ;;  %v2285_v14 = vadd.f32 %v2284_v10, %v2086_v8  ;;  %v2088_v18 = vmul.f32 %v4217_v11, %v4217_v11  ;;  %v3764_v8 = vld [vmem:[%s7470_s0 + $0x2f0] sm:$0xff]   ;;  %v3765_v10 = vld [vmem:[%s7470_s0 + $0x2f8] sm:$0xff]  }
  0xe9   :  { %v4223_v15 = vpop.f32.mrf.mxu0  ;;  %3651 = vmatprep.mubr.msk.bf16.mxu1 %vm730_vm2, %v3764_v8 }
  0xea   :  { %7752 = vst [vmem:[#allocation16_spill] sm:$0xff] %v4223_v15  ;;  %v2286_v16 = vadd.f32 %v2285_v14, %v2087_v12  ;;  %v1882_v17 = vadd.f32 %v1881_v13, %v4217_v11  ;;  %v2091_v35 = vmul.f32 %v4223_v15, %v4223_v15  ;;  %3652 = vmatmul.mubr.msk.bf16.gmra.mxu1 %vm730_vm2, %v3765_v10 }
  0xeb   :  { %v4228_v19 = vpop.f32.mrf.mxu0 }
  0xec   :  { %7753 = vst [vmem:[#allocation17_spill] sm:$0xff] %v4228_v19  ;;  %v2287_v20 = vadd.f32 %v2286_v16, %v2088_v18  ;;  %v1883_v21 = vadd.f32 %v1882_v17, %v4228_v19  ;;  %v2089_v22 = vmul.f32 %v4228_v19, %v4228_v19 }
  0xed   :  { %v4236_v24 = vpop.f32.mrf.mxu0 }
  0xee   :  { %7754 = vst [vmem:[#allocation18_spill] sm:$0xff] %v4236_v24  ;;  %v1884_v31 = vadd.f32 %v4208_v6, %v1883_v21  ;;  %v2288_v32 = vadd.f32 %v2287_v20, %v2089_v22  ;;  %v2094_v53 = vmul.f32 %v4236_v24, %v4236_v24 }
  0xef   :  { %v4245_v33 = vpop.f32.mrf.mxu0 }
  0xf0   :  { %7755 = vst [vmem:[#allocation19_spill] sm:$0xff] %v4245_v33  ;;  %v1885_v36 = vadd.f32 %v4223_v15, %v1884_v31  ;;  %v2289_v37 = vadd.f32 %v2288_v32, %v2090_v30  ;;  %v2092_v42 = vmul.f32 %v4245_v33, %v4245_v33 }
  0xf1   :  { %v4251_v38 = vpop.f32.mrf.mxu0 }
  0xf2   :  { %7756 = vst [vmem:[#allocation20_spill] sm:$0xff] %v4251_v38  ;;  %v2290_v40 = vadd.f32 %v2289_v37, %v2091_v35  ;;  %v1886_v41 = vadd.f32 %v1885_v36, %v4245_v33  ;;  %v2095_v58 = vmul.f32 %v4251_v38, %v4251_v38  ;;  %v3766_v36 = vld [vmem:[%s7470_s0 + $0x300] sm:$0xff]  }
  0xf3   :  { %v4256_v44 = vpop.f32.mrf.mxu0  ;;  %3655 = vmatprep.mubr.msk.bf16.mxu1 %vm730_vm2, %v3766_v36 }
  0xf4   :  { %7757 = vst [vmem:[#allocation21_spill] sm:$0xff] %v4256_v44  ;;  %v2291_v45 = vadd.f32 %v2290_v40, %v2092_v42  ;;  %v1887_v46 = vadd.f32 %v1886_v41, %v4256_v44  ;;  %v2093_v48 = vmul.f32 %v4256_v44, %v4256_v44  ;;  %v3767_v40 = vld [vmem:[%s7470_s0 + $0x308] sm:$0xff]  }
  0xf5   :  { %v4264_v50 = vpop.f32.mrf.mxu0  ;;  %3656 = vmatmul.mubr.msk.bf16.gmra.mxu1 %vm730_vm2, %v3767_v40 }
  0xf6   :  { %7758 = vst [vmem:[#allocation22_spill] sm:$0xff] %v4264_v50  ;;  %v1888_v54 = vadd.f32 %v4236_v24, %v1887_v46  ;;  %v2292_v55 = vadd.f32 %v2291_v45, %v2093_v48  ;;  %v2098_v12 = vmul.f32 %v4264_v50, %v4264_v50 }
  0xf7   :  { %v4273_v56 = vpop.f32.mrf.mxu0 }
  0xf8   :  { %7759 = vst [vmem:[#allocation23_spill] sm:$0xff] %v4273_v56  ;;  %v1889_v59 = vadd.f32 %v4251_v38, %v1888_v54  ;;  %v2293_v60 = vadd.f32 %v2292_v55, %v2094_v53  ;;  %v2096_v2 = vmul.f32 %v4273_v56, %v4273_v56 }
  0xf9   :  { %v4279_v62 = vpop.f32.mrf.mxu0 }
  0xfa   :  { %7760 = vst [vmem:[#allocation24_spill] sm:$0xff] %v4279_v62  ;;  %v2294_v63 = vadd.f32 %v2293_v60, %v2095_v58  ;;  %v1890_v0 = vadd.f32 %v1889_v59, %v4273_v56  ;;  %v2099_v17 = vmul.f32 %v4279_v62, %v4279_v62 }
  0xfb   :  { %v4284_v3 = vpop.f32.mrf.mxu0 }
  0xfc   :  { %7761 = vst [vmem:[#allocation25_spill] sm:$0xff] %v4284_v3  ;;  %v2295_v4 = vadd.f32 %v2294_v63, %v2096_v2  ;;  %v1891_v5 = vadd.f32 %v1890_v0, %v4284_v3  ;;  %v2097_v7 = vmul.f32 %v4284_v3, %v4284_v3  ;;  %v3768_v2 = vld [vmem:[%s7470_s0 + $0x310] sm:$0xff]  }
  0xfd   :  { %v4292_v9 = vpop.f32.mrf.mxu0  ;;  %3659 = vmatprep.mubr.msk.bf16.mxu1 %vm730_vm2, %v3768_v2 }
  0xfe   :  { %7762 = vst [vmem:[#allocation26_spill] sm:$0xff] %v4292_v9  ;;  %v1892_v13 = vadd.f32 %v4264_v50, %v1891_v5  ;;  %v2296_v14 = vadd.f32 %v2295_v4, %v2097_v7  ;;  %v2102_v41 = vmul.f32 %v4292_v9, %v4292_v9  ;;  %v3769_v5 = vld [vmem:[%s7470_s0 + $0x318] sm:$0xff]  }
  0xff   :  { %v4301_v16 = vpop.f32.mrf.mxu0  ;;  %3660 = vmatmul.mubr.msk.bf16.gmra.mxu1 %vm730_vm2, %v3769_v5 }
 0x100   :  { %7763 = vst [vmem:[#allocation27_spill] sm:$0xff] %v4301_v16  ;;  %v1893_v18 = vadd.f32 %v4279_v62, %v1892_v13  ;;  %v2297_v20 = vadd.f32 %v2296_v14, %v2098_v12  ;;  %v2100_v26 = vmul.f32 %v4301_v16, %v4301_v16  ;;  %v4359_v13 = vpop.f32.mrf.mxu1 }
 0x101   :  { %v4307_v21 = vpop.f32.mrf.mxu0 }
 0x102   :  { %7764 = vst [vmem:[#allocation28_spill] sm:$0xff] %v4307_v21  ;;  %v2298_v22 = vadd.f32 %v2297_v20, %v2099_v17  ;;  %v1894_v23 = vadd.f32 %v1893_v18, %v4301_v16  ;;  %v2103_v48 = vmul.f32 %v4307_v21, %v4307_v21 }
 0x103   :  { %v4312_v30 = vpop.f32.mrf.mxu0 }
 0x104   :  { %7765 = vst [vmem:[#allocation29_spill] sm:$0xff] %v4312_v30  ;;  %v2299_v31 = vadd.f32 %v2298_v22, %v2100_v26  ;;  %v1895_v32 = vadd.f32 %v1894_v23, %v4312_v30  ;;  %v2101_v35 = vmul.f32 %v4312_v30, %v4312_v30  ;;  %v4367_v22 = vpop.f32.mrf.mxu1 }
 0x105   :  { %v4320_v37 = vpop.f32.mrf.mxu0  ;;  %7773 = vst [vmem:[#allocation37_spill] sm:$0xff] %v4367_v22 }
 0x106   :  { %7766 = vst [vmem:[#allocation30_spill] sm:$0xff] %v4320_v37  ;;  %v1896_v42 = vadd.f32 %v4292_v9, %v1895_v32  ;;  %v2300_v45 = vadd.f32 %v2299_v31, %v2101_v35  ;;  %v2106_v7 = vmul.f32 %v4320_v37, %v4320_v37  ;;  %v4374_v35 = vpop.f32.mrf.mxu1 }
 0x107   :  { %v4329_v46 = vpop.f32.mrf.mxu0 }
 0x108   :  { %7767 = vst [vmem:[#allocation31_spill] sm:$0xff] %v4329_v46  ;;  %v1897_v49 = vadd.f32 %v4307_v21, %v1896_v42  ;;  %v2301_v51 = vadd.f32 %v2300_v45, %v2102_v41  ;;  %v2104_v58 = vmul.f32 %v4329_v46, %v4329_v46  ;;  %v4381_v45 = vpop.f32.mrf.mxu1 }
 0x109   :  { %v4335_v53 = vpop.f32.mrf.mxu0  ;;  %7776 = vst [vmem:[#allocation40_spill] sm:$0xff] %v4381_v45 }
 0x10a   :  { %7768 = vst [vmem:[#allocation32_spill] sm:$0xff] %v4335_v53  ;;  %v2302_v54 = vadd.f32 %v2301_v51, %v2103_v48  ;;  %v1898_v55 = vadd.f32 %v1897_v49, %v4329_v46  ;;  %v2107_v14 = vmul.f32 %v4335_v53, %v4335_v53 }
 0x10b   :  { %v4340_v59 = vpop.f32.mrf.mxu0 }
 0x10c   :  { %7769 = vst [vmem:[#allocation33_spill] sm:$0xff] %v4340_v59  ;;  %v2303_v60 = vadd.f32 %v2302_v54, %v2104_v58  ;;  %v1899_v63 = vadd.f32 %v1898_v55, %v4340_v59  ;;  %v2105_v0 = vmul.f32 %v4340_v59, %v4340_v59  ;;  %v4388_v55 = vpop.f32.mrf.mxu1 }
 0x10d   :  { %v4348_v4 = vpop.f32.mrf.mxu0 }
 0x10e   :  { %7770 = vst [vmem:[#allocation34_spill] sm:$0xff] %v4348_v4  ;;  %v1900_v8 = vadd.f32 %v4320_v37, %v1899_v63  ;;  %v2304_v10 = vadd.f32 %v2303_v60, %v2105_v0  ;;  %v2110_v48 = vmul.f32 %v4348_v4, %v4348_v4  ;;  %v4395_v2 = vpop.f32.mrf.mxu1 }
 0x10f   :  { %v4357_v12 = vpop.f32.mrf.mxu0  ;;  %7779 = vst [vmem:[#allocation43_spill] sm:$0xff] %v4395_v2 }
 0x110   :  { %7771 = vst [vmem:[#allocation35_spill] sm:$0xff] %v4357_v12  ;;  %v1901_v17 = vadd.f32 %v4335_v53, %v1900_v8  ;;  %v2305_v18 = vadd.f32 %v2304_v10, %v2106_v7  ;;  %v2108_v31 = vmul.f32 %v4357_v12, %v4357_v12 }
 0x111   :  { %v4365_v20 = vpop.f32.mrf.mxu0 }
 0x112   :  { %7772 = vst [vmem:[#allocation36_spill] sm:$0xff] %v4365_v20  ;;  %v2306_v23 = vadd.f32 %v2305_v18, %v2107_v14  ;;  %v1902_v26 = vadd.f32 %v1901_v17, %v4357_v12  ;;  %v2111_v58 = vmul.f32 %v4365_v20, %v4365_v20  ;;  %v4402_v14 = vpop.f32.mrf.mxu1 }
 0x113   :  { %v4372_v32 = vpop.f32.mrf.mxu0 }
 0x114   :  { %7774 = vst [vmem:[#allocation38_spill] sm:$0xff] %v4372_v32  ;;  %v2307_v36 = vadd.f32 %v2306_v23, %v2108_v31  ;;  %v1903_v40 = vadd.f32 %v1902_v26, %v4372_v32  ;;  %v2109_v41 = vmul.f32 %v4372_v32, %v4372_v32  ;;  %v4409_v31 = vpop.f32.mrf.mxu1 }
 0x115   :  { %v4379_v42 = vpop.f32.mrf.mxu0  ;;  %7782 = vst [vmem:[#allocation46_spill] sm:$0xff] %v4409_v31 }
 0x116   :  { %7775 = vst [vmem:[#allocation39_spill] sm:$0xff] %v4379_v42  ;;  %v1904_v49 = vadd.f32 %v4348_v4, %v1903_v40  ;;  %v2308_v51 = vadd.f32 %v2307_v36, %v2109_v41  ;;  %v2114_v36 = vmul.f32 %v4379_v42, %v4379_v42 }
 0x117   :  { %v4386_v54 = vpop.f32.mrf.mxu0 }
 0x118   :  { %7777 = vst [vmem:[#allocation41_spill] sm:$0xff] %v4386_v54  ;;  %v1905_v60 = vadd.f32 %v4365_v20, %v1904_v49  ;;  %v2309_v63 = vadd.f32 %v2308_v51, %v2110_v48  ;;  %v2112_v8 = vmul.f32 %v4386_v54, %v4386_v54  ;;  %v4416_v49 = vpop.f32.mrf.mxu1 }
 0x119   :  { %v4393_v0 = vpop.f32.mrf.mxu0 }
 0x11a   :  { %7778 = vst [vmem:[#allocation42_spill] sm:$0xff] %v4393_v0  ;;  %v2310_v5 = vadd.f32 %v2309_v63, %v2111_v58  ;;  %v1906_v7 = vadd.f32 %v1905_v60, %v4386_v54  ;;  %v2115_v51 = vmul.f32 %v4393_v0, %v4393_v0 }
 0x11b   :  { %v4400_v10 = vpop.f32.mrf.mxu0 }
 0x11c   :  { %7780 = vst [vmem:[#allocation44_spill] sm:$0xff] %v4400_v10  ;;  %v2311_v17 = vadd.f32 %v2310_v5, %v2112_v8  ;;  %v1907_v18 = vadd.f32 %v1906_v7, %v4400_v10  ;;  %v2113_v23 = vmul.f32 %v4400_v10, %v4400_v10  ;;  %v4423_v5 = vpop.f32.mrf.mxu1 }
 0x11d   :  { %v4407_v26 = vpop.f32.mrf.mxu0  ;;  %7785 = vst [vmem:[#allocation49_spill] sm:$0xff] %v4423_v5 }
 0x11e   :  { %7781 = vst [vmem:[#allocation45_spill] sm:$0xff] %v4407_v26  ;;  %v1908_v40 = vadd.f32 %v4379_v42, %v1907_v18  ;;  %v2312_v41 = vadd.f32 %v2311_v17, %v2113_v23  ;;  %v4430_v23 = vpop.f32.mrf.mxu1 }
 0x11f   :  { %v4414_v48 = vpop.f32.mrf.mxu0 }
 0x120   :  { %7783 = vst [vmem:[#allocation47_spill] sm:$0xff] %v4414_v48  ;;  %v1909_v58 = vadd.f32 %v4393_v0, %v1908_v40  ;;  %v2313_v60 = vadd.f32 %v2312_v41, %v2114_v36  ;;  %v2116_v17 = vmul.f32 %v4414_v48, %v4414_v48  ;;  %v4437_v41 = vpop.f32.mrf.mxu1 }
 0x121   :  { %v4421_v63 = vpop.f32.mrf.mxu0  ;;  %7788 = vst [vmem:[#allocation52_spill] sm:$0xff] %v4437_v41 }
 0x122   :  { %7784 = vst [vmem:[#allocation48_spill] sm:$0xff] %v4421_v63  ;;  %v2314_v7 = vadd.f32 %v2313_v60, %v2115_v51  ;;  %v1910_v8 = vadd.f32 %v1909_v58, %v4414_v48  ;;  %v2118_v51 = vmul.f32 %v4407_v26, %v4407_v26  ;;  %v4444_v0 = vpop.f32.mrf.mxu1 }
 0x123   :  { %v4428_v18 = vpop.f32.mrf.mxu0 }
 0x124   :  { %7786 = vst [vmem:[#allocation50_spill] sm:$0xff] %v4428_v18  ;;  %v2315_v42 = vadd.f32 %v2314_v7, %v2116_v17  ;;  %v1911_v10 = vadd.f32 %v1910_v8, %v4428_v18  ;;  %v2117_v36 = vmul.f32 %v4428_v18, %v4428_v18  ;;  %v2119_v7 = vmul.f32 %v4421_v63, %v4421_v63  ;;  %v4451_v54 = vpop.f32.mrf.mxu1 }
 0x125   :  { %v4435_v40 = vpop.f32.mrf.mxu0  ;;  %7791 = vst [vmem:[#allocation55_spill] sm:$0xff] %v4451_v54 }
 0x126   :  { %7787 = vst [vmem:[#allocation51_spill] sm:$0xff] %v4435_v40  ;;  %v1912_v58 = vadd.f32 %v4407_v26, %v1911_v10  ;;  %v2316_v60 = vadd.f32 %v2315_v42, %v2117_v36  ;;  %v4458_v26 = vpop.f32.mrf.mxu1 }
 0x127   :  { %v4442_v48 = vpop.f32.mrf.mxu0 }
 0x128   :  { %7789 = vst [vmem:[#allocation53_spill] sm:$0xff] %v4442_v48  ;;  %v2317_v8 = vadd.f32 %v2316_v60, %v2118_v51  ;;  %v1913_v17 = vadd.f32 %v4421_v63, %v1912_v58  ;;  %v2120_v10 = vmul.f32 %v4442_v48, %v4442_v48  ;;  %v4465_v60 = vpop.f32.mrf.mxu1 }
 0x129   :  { %v4449_v18 = vpop.f32.mrf.mxu0  ;;  %7794 = vst [vmem:[#allocation58_spill] sm:$0xff] %v4465_v60 }
 0x12a   :  { %7790 = vst [vmem:[#allocation54_spill] sm:$0xff] %v4449_v18  ;;  %v1914_v20 = vadd.f32 %v1913_v17, %v4442_v48  ;;  %v2318_v42 = vadd.f32 %v2317_v8, %v2119_v7  ;;  %v2122_v17 = vmul.f32 %v4435_v40, %v4435_v40  ;;  %v4472_v63 = vpop.f32.mrf.mxu1 }
 0x12b   :  { %v4456_v36 = vpop.f32.mrf.mxu0 }
 0x12c   :  { %7792 = vst [vmem:[#allocation56_spill] sm:$0xff] %v4456_v36  ;;  %v2319_v4 = vadd.f32 %v2318_v42, %v2120_v10  ;;  %v1915_v32 = vadd.f32 %v1914_v20, %v4456_v36  ;;  %v2121_v51 = vmul.f32 %v4456_v36, %v4456_v36  ;;  %v2123_v20 = vmul.f32 %v4449_v18, %v4449_v18  ;;  %v4479_v12 = vpop.f32.mrf.mxu1 }
 0x12d   :  { %v4463_v58 = vpop.f32.mrf.mxu0  ;;  %7797 = vst [vmem:[#allocation61_spill] sm:$0xff] %v4479_v12 }
 0x12e   :  { %7793 = vst [vmem:[#allocation57_spill] sm:$0xff] %v4463_v58  ;;  %v1916_v48 = vadd.f32 %v4435_v40, %v1915_v32  ;;  %v2320_v7 = vadd.f32 %v2319_v4, %v2121_v51  ;;  %v4486_v40 = vpop.f32.mrf.mxu1 }
 0x12f   :  { %v4470_v8 = vpop.f32.mrf.mxu0 }
 0x130   :  { %7795 = vst [vmem:[#allocation59_spill] sm:$0xff] %v4470_v8  ;;  %v2321_v10 = vadd.f32 %v2320_v7, %v2122_v17  ;;  %v1917_v42 = vadd.f32 %v4449_v18, %v1916_v48  ;;  %v2124_v32 = vmul.f32 %v4470_v8, %v4470_v8  ;;  %v4493_v7 = vpop.f32.mrf.mxu1 }
 0x131   :  { %v4477_v36 = vpop.f32.mrf.mxu0  ;;  %7800 = vst [vmem:[#allocation64_spill] sm:$0xff] %v4493_v7 }
 0x132   :  { %7796 = vst [vmem:[#allocation60_spill] sm:$0xff] %v4477_v36  ;;  %v1918_v53 = vadd.f32 %v1917_v42, %v4470_v8  ;;  %v2322_v4 = vadd.f32 %v2321_v10, %v2123_v20  ;;  %v2126_v42 = vmul.f32 %v4463_v58, %v4463_v58  ;;  %v4500_v18 = vpop.f32.mrf.mxu1 }
 0x133   :  { %v4484_v51 = vpop.f32.mrf.mxu0 }
 0x134   :  { %7798 = vst [vmem:[#allocation62_spill] sm:$0xff] %v4484_v51  ;;  %v2323_v37 = vadd.f32 %v2322_v4, %v2124_v32  ;;  %v1919_v59 = vadd.f32 %v1918_v53, %v4484_v51  ;;  %v2125_v48 = vmul.f32 %v4484_v51, %v4484_v51  ;;  %v2127_v53 = vmul.f32 %v4477_v36, %v4477_v36  ;;  %v4507_v46 = vpop.f32.mrf.mxu1 }
 0x135   :  { %v4491_v17 = vpop.f32.mrf.mxu0  ;;  %7803 = vst [vmem:[#allocation67_spill] sm:$0xff] %v4507_v46 }
 0x136   :  { %7799 = vst [vmem:[#allocation63_spill] sm:$0xff] %v4491_v17  ;;  %v1920_v8 = vadd.f32 %v4463_v58, %v1919_v59  ;;  %v2324_v20 = vadd.f32 %v2323_v37, %v2125_v48  ;;  %v4514_v58 = vpop.f32.mrf.mxu1 }
 0x137   :  { %v4498_v10 = vpop.f32.mrf.mxu0 }
 0x138   :  { %7801 = vst [vmem:[#allocation65_spill] sm:$0xff] %v4498_v10  ;;  %v2325_v32 = vadd.f32 %v2324_v20, %v2126_v42  ;;  %v1921_v4 = vadd.f32 %v4477_v36, %v1920_v8  ;;  %v2128_v59 = vmul.f32 %v4498_v10, %v4498_v10  ;;  %v4521_v20 = vpop.f32.mrf.mxu1 }
 0x139   :  { %v4505_v51 = vpop.f32.mrf.mxu0  ;;  %7806 = vst [vmem:[#allocation70_spill] sm:$0xff] %v4521_v20 }
 0x13a   :  { %7802 = vst [vmem:[#allocation66_spill] sm:$0xff] %v4505_v51  ;;  %v1922_v21 = vadd.f32 %v1921_v4, %v4498_v10  ;;  %v2326_v37 = vadd.f32 %v2325_v32, %v2127_v53  ;;  %v2130_v4 = vmul.f32 %v4491_v17, %v4491_v17  ;;  %v4528_v36 = vpop.f32.mrf.mxu1 }
 0x13b   :  { %v4512_v48 = vpop.f32.mrf.mxu0 }
 0x13c   :  { %7804 = vst [vmem:[#allocation68_spill] sm:$0xff] %v4512_v48  ;;  %v2327_v9 = vadd.f32 %v2326_v37, %v2128_v59  ;;  %v1923_v30 = vadd.f32 %v1922_v21, %v4512_v48  ;;  %v2129_v8 = vmul.f32 %v4512_v48, %v4512_v48  ;;  %v2131_v21 = vmul.f32 %v4505_v51, %v4505_v51  ;;  %v4535_v16 = vpop.f32.mrf.mxu1 }
 0x13d   :  { %v4519_v42 = vpop.f32.mrf.mxu0  ;;  %7809 = vst [vmem:[#allocation73_spill] sm:$0xff] %v4535_v16 }
 0x13e   :  { %7805 = vst [vmem:[#allocation69_spill] sm:$0xff] %v4519_v42  ;;  %v1924_v10 = vadd.f32 %v4491_v17, %v1923_v30  ;;  %v2328_v53 = vadd.f32 %v2327_v9, %v2129_v8  ;;  %v4542_v17 = vpop.f32.mrf.mxu1 }
 0x13f   :  { %v4526_v32 = vpop.f32.mrf.mxu0 }
 0x140   :  { %7807 = vst [vmem:[#allocation71_spill] sm:$0xff] %v4526_v32  ;;  %v2329_v59 = vadd.f32 %v2328_v53, %v2130_v4  ;;  %v1925_v37 = vadd.f32 %v4505_v51, %v1924_v10  ;;  %v2132_v30 = vmul.f32 %v4526_v32, %v4526_v32  ;;  %v4549_v53 = vpop.f32.mrf.mxu1 }
 0x141   :  { %v4533_v48 = vpop.f32.mrf.mxu0  ;;  %7812 = vst [vmem:[#allocation76_spill] sm:$0xff] %v4549_v53 }
 0x142   :  { %7808 = vst [vmem:[#allocation72_spill] sm:$0xff] %v4533_v48  ;;  %v1926_v62 = vadd.f32 %v1925_v37, %v4526_v32  ;;  %v2330_v9 = vadd.f32 %v2329_v59, %v2131_v21  ;;  %v2134_v37 = vmul.f32 %v4519_v42, %v4519_v42  ;;  %v4556_v51 = vpop.f32.mrf.mxu1 }
 0x143   :  { %v4540_v8 = vpop.f32.mrf.mxu0 }
 0x144   :  { %7810 = vst [vmem:[#allocation74_spill] sm:$0xff] %v4540_v8  ;;  %v2331_v50 = vadd.f32 %v2330_v9, %v2132_v30  ;;  %v1927_v3 = vadd.f32 %v1926_v62, %v4540_v8  ;;  %v2133_v10 = vmul.f32 %v4540_v8, %v4540_v8  ;;  %v2135_v62 = vmul.f32 %v4533_v48, %v4533_v48  ;;  %v4563_v56 = vpop.f32.mrf.mxu1 }
 0x145   :  { %v4547_v4 = vpop.f32.mrf.mxu0  ;;  %7815 = vst [vmem:[#allocation79_spill] sm:$0xff] %v4563_v56 }
 0x146   :  { %7811 = vst [vmem:[#allocation75_spill] sm:$0xff] %v4547_v4  ;;  %v1928_v32 = vadd.f32 %v4519_v42, %v1927_v3  ;;  %v2332_v21 = vadd.f32 %v2331_v50, %v2133_v10  ;;  %v4570_v42 = vpop.f32.mrf.mxu1 }
 0x147   :  { %v4554_v59 = vpop.f32.mrf.mxu0 }
 0x148   :  { %7813 = vst [vmem:[#allocation77_spill] sm:$0xff] %v4554_v59  ;;  %v2333_v30 = vadd.f32 %v2332_v21, %v2134_v37  ;;  %v1929_v9 = vadd.f32 %v4533_v48, %v1928_v32  ;;  %v2136_v3 = vmul.f32 %v4554_v59, %v4554_v59  ;;  %v4577_v21 = vpop.f32.mrf.mxu1 }
 0x149   :  { %v4561_v8 = vpop.f32.mrf.mxu0  ;;  %7818 = vst [vmem:[#allocation82_spill] sm:$0xff] %v4577_v21 }
 0x14a   :  { %7814 = vst [vmem:[#allocation78_spill] sm:$0xff] %v4561_v8  ;;  %v1930_v38 = vadd.f32 %v1929_v9, %v4554_v59  ;;  %v2334_v50 = vadd.f32 %v2333_v30, %v2135_v62  ;;  %v2138_v9 = vmul.f32 %v4547_v4, %v4547_v4  ;;  %v4584_v48 = vpop.f32.mrf.mxu1 }
 0x14b   :  { %v4568_v10 = vpop.f32.mrf.mxu0 }
 0x14c   :  { %7816 = vst [vmem:[#allocation80_spill] sm:$0xff] %v4568_v10  ;;  %v2335_v24 = vadd.f32 %v2334_v50, %v2136_v3  ;;  %v1931_v44 = vadd.f32 %v1930_v38, %v4568_v10  ;;  %v2137_v32 = vmul.f32 %v4568_v10, %v4568_v10  ;;  %v2139_v38 = vmul.f32 %v4561_v8, %v4561_v8  ;;  %v4591_v33 = vpop.f32.mrf.mxu1 }
 0x14d   :  { %v4575_v37 = vpop.f32.mrf.mxu0  ;;  %7821 = vst [vmem:[#allocation85_spill] sm:$0xff] %v4591_v33 }
 0x14e   :  { %7817 = vst [vmem:[#allocation81_spill] sm:$0xff] %v4575_v37  ;;  %v1932_v59 = vadd.f32 %v4547_v4, %v1931_v44  ;;  %v2336_v62 = vadd.f32 %v2335_v24, %v2137_v32 }
 0x14f   :  { %v4582_v30 = vpop.f32.mrf.mxu0 }
 0x150   :  { %7819 = vst [vmem:[#allocation83_spill] sm:$0xff] %v4582_v30  ;;  %v2337_v3 = vadd.f32 %v2336_v62, %v2138_v9  ;;  %v1933_v50 = vadd.f32 %v4561_v8, %v1932_v59  ;;  %v2140_v44 = vmul.f32 %v4582_v30, %v4582_v30  ;;  %v4603_v59 = vpop.f32.mrf.mxu1  ;;  %v2142_v8 = vmul.f32 %v4575_v37, %v4575_v37 }
 0x151   :  { %v4589_v10 = vpop.f32.mrf.mxu0 }
 0x152   :  { %7820 = vst [vmem:[#allocation84_spill] sm:$0xff] %v4589_v10  ;;  %v1934_v15 = vadd.f32 %v1933_v50, %v4582_v30  ;;  %v2338_v24 = vadd.f32 %v2337_v3, %v2139_v38  ;;  %v2143_v38 = vmul.f32 %v4589_v10, %v4589_v10 }
 0x153   :  { %v4596_v32 = vpop.f32.mrf.mxu0 }
 0x154   :  { %7822 = vst [vmem:[#allocation86_spill] sm:$0xff] %v4596_v32  ;;  %v2339_v4 = vadd.f32 %v2338_v24, %v2140_v44  ;;  %v1935_v6 = vadd.f32 %v1934_v15, %v4596_v32  ;;  %v2141_v9 = vmul.f32 %v4596_v32, %v4596_v32  ;;  %v4615_v24 = vpop.f32.mrf.mxu1 }
 0x155   :  { %v4601_v62 = vpop.f32.mrf.mxu0  ;;  %7826 = vst [vmem:[#allocation90_spill] sm:$0xff] %v4615_v24 }
 0x156   :  { %7823 = vst [vmem:[#allocation87_spill] sm:$0xff] %v4601_v62  ;;  %v1936_v50 = vadd.f32 %v4575_v37, %v1935_v6  ;;  %v2340_v19 = vadd.f32 %v2339_v4, %v2141_v9 }
 0x157   :  { %v4608_v30 = vpop.f32.mrf.mxu0 }
 0x158   :  { %7824 = vst [vmem:[#allocation88_spill] sm:$0xff] %v4608_v30  ;;  %v2341_v3 = vadd.f32 %v2340_v19, %v2142_v8  ;;  %v1937_v15 = vadd.f32 %v4589_v10, %v1936_v50  ;;  %v2144_v11 = vmul.f32 %v4608_v30, %v4608_v30  ;;  %v4627_v50 = vpop.f32.mrf.mxu1  ;;  %v2146_v10 = vmul.f32 %v4601_v62, %v4601_v62 }
 0x159   :  { %v4613_v44 = vpop.f32.mrf.mxu0 }
 0x15a   :  { %7825 = vst [vmem:[#allocation89_spill] sm:$0xff] %v4613_v44  ;;  %v1938_v32 = vadd.f32 %v1937_v15, %v4608_v30  ;;  %v2342_v61 = vadd.f32 %v2341_v3, %v2143_v38  ;;  %v4639_v3 = vpop.f32.mrf.mxu1 }
 0x15b   :  { %v4620_v6 = vpop.f32.mrf.mxu0  ;;  %7831 = vst [vmem:[#allocation95_spill] sm:$0xff] %v4639_v3 }
 0x15c   :  { %7827 = vst [vmem:[#allocation91_spill] sm:$0xff] %v4620_v6  ;;  %v2343_v4 = vadd.f32 %v2342_v61, %v2144_v11  ;;  %v1939_v9 = vadd.f32 %v1938_v32, %v4620_v6  ;;  %v2145_v19 = vmul.f32 %v4620_v6, %v4620_v6  ;;  %v2147_v61 = vmul.f32 %v4613_v44, %v4613_v44 }
 0x15d   :  { %v4625_v8 = vpop.f32.mrf.mxu0 }
 0x15e   :  { %7828 = vst [vmem:[#allocation92_spill] sm:$0xff] %v4625_v8  ;;  %v1940_v15 = vadd.f32 %v4601_v62, %v1939_v9  ;;  %v2344_v37 = vadd.f32 %v2343_v4, %v2145_v19 }
 0x15f   :  { %v4632_v30 = vpop.f32.mrf.mxu0 }
 0x160   :  { %7829 = vst [vmem:[#allocation93_spill] sm:$0xff] %v4632_v30  ;;  %v2345_v11 = vadd.f32 %v2344_v37, %v2146_v10  ;;  %v1941_v32 = vadd.f32 %v4613_v44, %v1940_v15  ;;  %v2148_v52 = vmul.f32 %v4632_v30, %v4632_v30  ;;  %v4651_v15 = vpop.f32.mrf.mxu1  ;;  %v2150_v44 = vmul.f32 %v4625_v8, %v4625_v8 }
 0x161   :  { %v4637_v38 = vpop.f32.mrf.mxu0 }
 0x162   :  { %7830 = vst [vmem:[#allocation94_spill] sm:$0xff] %v4637_v38  ;;  %v1942_v6 = vadd.f32 %v1941_v32, %v4632_v30  ;;  %v2346_v1 = vadd.f32 %v2345_v11, %v2147_v61  ;;  %v4663_v11 = vpop.f32.mrf.mxu1 }
 0x163   :  { %v4644_v9 = vpop.f32.mrf.mxu0  ;;  %7836 = vst [vmem:[#allocation100_spill] sm:$0xff] %v4663_v11 }
 0x164   :  { %7832 = vst [vmem:[#allocation96_spill] sm:$0xff] %v4644_v9  ;;  %v2347_v4 = vadd.f32 %v2346_v1, %v2148_v52  ;;  %v1943_v19 = vadd.f32 %v1942_v6, %v4644_v9  ;;  %v2149_v10 = vmul.f32 %v4644_v9, %v4644_v9  ;;  %v2151_v52 = vmul.f32 %v4637_v38, %v4637_v38 }
 0x165   :  { %v4649_v37 = vpop.f32.mrf.mxu0 }
 0x166   :  { %7833 = vst [vmem:[#allocation97_spill] sm:$0xff] %v4649_v37  ;;  %v1944_v32 = vadd.f32 %v4625_v8, %v1943_v19  ;;  %v2348_v62 = vadd.f32 %v2347_v4, %v2149_v10 }
 0x167   :  { %v4656_v30 = vpop.f32.mrf.mxu0 }
 0x168   :  { %7834 = vst [vmem:[#allocation98_spill] sm:$0xff] %v4656_v30  ;;  %v2349_v1 = vadd.f32 %v2348_v62, %v2150_v44  ;;  %v1945_v6 = vadd.f32 %v4637_v38, %v1944_v32  ;;  %v2152_v57 = vmul.f32 %v4656_v30, %v4656_v30  ;;  %v4675_v32 = vpop.f32.mrf.mxu1  ;;  %v2154_v38 = vmul.f32 %v4649_v37, %v4649_v37 }
 0x169   :  { %v4661_v61 = vpop.f32.mrf.mxu0  ;;  %7839 = vst [vmem:[#allocation103_spill] sm:$0xff] %v4675_v32 }
 0x16a   :  { %7835 = vst [vmem:[#allocation99_spill] sm:$0xff] %v4661_v61  ;;  %v1946_v9 = vadd.f32 %v1945_v6, %v4656_v30  ;;  %v2350_v43 = vadd.f32 %v2349_v1, %v2151_v52  ;;  %v4687_v1 = vpop.f32.mrf.mxu1 }
 0x16b   :  { %v4668_v19 = vpop.f32.mrf.mxu0  ;;  %7842 = vst [vmem:[#allocation106_spill] sm:$0xff] %v4687_v1 }
 0x16c   :  { %7837 = vst [vmem:[#allocation101_spill] sm:$0xff] %v4668_v19  ;;  %v2351_v4 = vadd.f32 %v2350_v43, %v2152_v57  ;;  %v1947_v10 = vadd.f32 %v1946_v9, %v4668_v19  ;;  %v2153_v62 = vmul.f32 %v4668_v19, %v4668_v19  ;;  %v2155_v43 = vmul.f32 %v4661_v61, %v4661_v61 }
 0x16d   :  { %v4673_v44 = vpop.f32.mrf.mxu0 }
 0x16e   :  { %7838 = vst [vmem:[#allocation102_spill] sm:$0xff] %v4673_v44  ;;  %v1948_v6 = vadd.f32 %v4649_v37, %v1947_v10  ;;  %v2352_v8 = vadd.f32 %v2351_v4, %v2153_v62 }
 0x16f   :  { %v4680_v30 = vpop.f32.mrf.mxu0 }
 0x170   :  { %7840 = vst [vmem:[#allocation104_spill] sm:$0xff] %v4680_v30  ;;  %v2353_v57 = vadd.f32 %v2352_v8, %v2154_v38  ;;  %v1949_v9 = vadd.f32 %v4661_v61, %v1948_v6  ;;  %v2156_v34 = vmul.f32 %v4680_v30, %v4680_v30  ;;  %v4699_v6 = vpop.f32.mrf.mxu1  ;;  %v2158_v61 = vmul.f32 %v4673_v44, %v4673_v44 }
 0x171   :  { %v4685_v52 = vpop.f32.mrf.mxu0  ;;  %7845 = vst [vmem:[#allocation109_spill] sm:$0xff] %v4699_v6 }
 0x172   :  { %7841 = vst [vmem:[#allocation105_spill] sm:$0xff] %v4685_v52  ;;  %v1950_v19 = vadd.f32 %v1949_v9, %v4680_v30  ;;  %v2354_v47 = vadd.f32 %v2353_v57, %v2155_v43  ;;  %v4711_v57 = vpop.f32.mrf.mxu1 }
 0x173   :  { %v4692_v10 = vpop.f32.mrf.mxu0  ;;  %7848 = vst [vmem:[#allocation112_spill] sm:$0xff] %v4711_v57 }
 0x174   :  { %7843 = vst [vmem:[#allocation107_spill] sm:$0xff] %v4692_v10  ;;  %v2355_v4 = vadd.f32 %v2354_v47, %v2156_v34  ;;  %v1951_v62 = vadd.f32 %v1950_v19, %v4692_v10  ;;  %v2157_v8 = vmul.f32 %v4692_v10, %v4692_v10  ;;  %v2159_v34 = vmul.f32 %v4685_v52, %v4685_v52 }
 0x175   :  { %v4697_v38 = vpop.f32.mrf.mxu0 }
 0x176   :  { %7844 = vst [vmem:[#allocation108_spill] sm:$0xff] %v4697_v38  ;;  %v1952_v9 = vadd.f32 %v4673_v44, %v1951_v62  ;;  %v2356_v37 = vadd.f32 %v2355_v4, %v2157_v8 }
 0x177   :  { %v4704_v30 = vpop.f32.mrf.mxu0 }
 0x178   :  { %7846 = vst [vmem:[#allocation110_spill] sm:$0xff] %v4704_v30  ;;  %v2357_v47 = vadd.f32 %v2356_v37, %v2158_v61  ;;  %v1953_v19 = vadd.f32 %v4685_v52, %v1952_v9  ;;  %v2160_v39 = vmul.f32 %v4704_v30, %v4704_v30  ;;  %v4723_v9 = vpop.f32.mrf.mxu1  ;;  %v2162_v52 = vmul.f32 %v4697_v38, %v4697_v38 }
 0x179   :  { %v4709_v43 = vpop.f32.mrf.mxu0  ;;  %7851 = vst [vmem:[#allocation115_spill] sm:$0xff] %v4723_v9 }
 0x17a   :  { %7847 = vst [vmem:[#allocation111_spill] sm:$0xff] %v4709_v43  ;;  %v1954_v10 = vadd.f32 %v1953_v19, %v4704_v30  ;;  %v2358_v28 = vadd.f32 %v2357_v47, %v2159_v34  ;;  %v4735_v47 = vpop.f32.mrf.mxu1 }
 0x17b   :  { %v4716_v62 = vpop.f32.mrf.mxu0  ;;  %7854 = vst [vmem:[#allocation118_spill] sm:$0xff] %v4735_v47 }
 0x17c   :  { %7849 = vst [vmem:[#allocation113_spill] sm:$0xff] %v4716_v62  ;;  %v2359_v4 = vadd.f32 %v2358_v28, %v2160_v39  ;;  %v1955_v8 = vadd.f32 %v1954_v10, %v4716_v62  ;;  %v2161_v37 = vmul.f32 %v4716_v62, %v4716_v62  ;;  %v2163_v28 = vmul.f32 %v4709_v43, %v4709_v43 }
 0x17d   :  { %v4721_v61 = vpop.f32.mrf.mxu0 }
 0x17e   :  { %7850 = vst [vmem:[#allocation114_spill] sm:$0xff] %v4721_v61  ;;  %v1956_v19 = vadd.f32 %v4697_v38, %v1955_v8  ;;  %v2360_v44 = vadd.f32 %v2359_v4, %v2161_v37 }
 0x17f   :  { %v4728_v30 = vpop.f32.mrf.mxu0 }
 0x180   :  { %7852 = vst [vmem:[#allocation116_spill] sm:$0xff] %v4728_v30  ;;  %v2361_v39 = vadd.f32 %v2360_v44, %v2162_v52  ;;  %v1957_v10 = vadd.f32 %v4709_v43, %v1956_v19  ;;  %v2164_v25 = vmul.f32 %v4728_v30, %v4728_v30  ;;  %v4747_v19 = vpop.f32.mrf.mxu1  ;;  %v2166_v43 = vmul.f32 %v4721_v61, %v4721_v61 }
 0x181   :  { %v4733_v34 = vpop.f32.mrf.mxu0  ;;  %7857 = vst [vmem:[#allocation121_spill] sm:$0xff] %v4747_v19 }
 0x182   :  { %7853 = vst [vmem:[#allocation117_spill] sm:$0xff] %v4733_v34  ;;  %v1958_v62 = vadd.f32 %v1957_v10, %v4728_v30  ;;  %v2362_v29 = vadd.f32 %v2361_v39, %v2163_v28  ;;  %v4759_v39 = vpop.f32.mrf.mxu1 }
 0x183   :  { %v4740_v8 = vpop.f32.mrf.mxu0  ;;  %7860 = vst [vmem:[#allocation124_spill] sm:$0xff] %v4759_v39 }
 0x184   :  { %7855 = vst [vmem:[#allocation119_spill] sm:$0xff] %v4740_v8  ;;  %v2363_v4 = vadd.f32 %v2362_v29, %v2164_v25  ;;  %v1959_v37 = vadd.f32 %v1958_v62, %v4740_v8  ;;  %v2165_v44 = vmul.f32 %v4740_v8, %v4740_v8  ;;  %v2167_v25 = vmul.f32 %v4733_v34, %v4733_v34 }
 0x185   :  { %v4745_v52 = vpop.f32.mrf.mxu0 }
 0x186   :  { %7856 = vst [vmem:[#allocation120_spill] sm:$0xff] %v4745_v52  ;;  %v1960_v10 = vadd.f32 %v4721_v61, %v1959_v37  ;;  %v2364_v38 = vadd.f32 %v2363_v4, %v2165_v44 }
 0x187   :  { %v4752_v30 = vpop.f32.mrf.mxu0 }
 0x188   :  { %7858 = vst [vmem:[#allocation122_spill] sm:$0xff] %v4752_v30  ;;  %v2365_v29 = vadd.f32 %v2364_v38, %v2166_v43  ;;  %v1961_v62 = vadd.f32 %v4733_v34, %v1960_v10  ;;  %v2168_v27 = vmul.f32 %v4752_v30, %v4752_v30  ;;  %v4771_v10 = vpop.f32.mrf.mxu1  ;;  %v2170_v34 = vmul.f32 %v4745_v52, %v4745_v52 }
 0x189   :  { %v4757_v28 = vpop.f32.mrf.mxu0  ;;  %7862 = vst [vmem:[#allocation126_spill] sm:$0xff] %v4771_v10 }
 0x18a   :  { %7859 = vst [vmem:[#allocation123_spill] sm:$0xff] %v4757_v28  ;;  %v1962_v8 = vadd.f32 %v1961_v62, %v4752_v30  ;;  %v2366_v19 = vadd.f32 %v2365_v29, %v2167_v25  ;;  %v4783_v29 = vpop.f32.mrf.mxu1 }
 0x18b   :  { %v4764_v37 = vpop.f32.mrf.mxu0  ;;  %7864 = vst [vmem:[#allocation128_spill] sm:$0xff] %v4783_v29 }
 0x18c   :  { %7861 = vst [vmem:[#allocation125_spill] sm:$0xff] %v4764_v37  ;;  %v2367_v4 = vadd.f32 %v2366_v19, %v2168_v27  ;;  %v1963_v44 = vadd.f32 %v1962_v8, %v4764_v37  ;;  %v2169_v38 = vmul.f32 %v4764_v37, %v4764_v37  ;;  %v2171_v27 = vmul.f32 %v4757_v28, %v4757_v28 }
 0x18d   :  { %v4769_v43 = vpop.f32.mrf.mxu0 }
 0x18e   :  { %v1964_v62 = vadd.f32 %v4745_v52, %v1963_v44  ;;  %v2368_v61 = vadd.f32 %v2367_v4, %v2169_v38 }
 0x18f   :  { %v4776_v30 = vpop.f32.mrf.mxu0 }
 0x190   :  { %7863 = vst [vmem:[#allocation127_spill] sm:$0xff] %v4776_v30  ;;  %v2369_v19 = vadd.f32 %v2368_v61, %v2170_v34  ;;  %v1965_v8 = vadd.f32 %v4757_v28, %v1964_v62  ;;  %v2172_v10 = vmul.f32 %v4776_v30, %v4776_v30  ;;  %v4793_v34 = vpop.f32.mrf.mxu1  ;;  %v2174_v62 = vmul.f32 %v4769_v43, %v4769_v43 }
 0x191   :  { %v4781_v25 = vpop.f32.mrf.mxu0  ;;  %7866 = vst [vmem:[#allocation130_spill] sm:$0xff] %v4793_v34 }
 0x192   :  { %v1966_v37 = vadd.f32 %v1965_v8, %v4776_v30  ;;  %v2370_v9 = vadd.f32 %v2369_v19, %v2171_v27  ;;  %v2175_v30 = vmul.f32 %v4781_v25, %v4781_v25 }
 0x193   :  { %v4788_v44 = vpop.f32.mrf.mxu0 }
 0x194   :  { %7865 = vst [vmem:[#allocation129_spill] sm:$0xff] %v4788_v44  ;;  %v2371_v4 = vadd.f32 %v2370_v9, %v2172_v10  ;;  %v1967_v38 = vadd.f32 %v1966_v37, %v4788_v44  ;;  %v2173_v61 = vmul.f32 %v4788_v44, %v4788_v44  ;;  %v4801_v9 = vpop.f32.mrf.mxu1  ;;  %v2176_v37 = vmul.f32 %v4367_v22, %v4367_v22 }
 0x195   :  { %7867 = vst [vmem:[#allocation131_spill] sm:$0xff] %v4801_v9 }
 0x196   :  { %v1968_v28 = vadd.f32 %v4769_v43, %v1967_v38  ;;  %v2372_v8 = vadd.f32 %v2371_v4, %v2173_v61  ;;  %v2177_v4 = vmul.f32 %v4381_v45, %v4381_v45  ;;  %v4809_v38 = vpop.f32.mrf.mxu1 }
 0x198   :  { %v1969_v27 = vadd.f32 %v4781_v25, %v1968_v28  ;;  %v2373_v19 = vadd.f32 %v2372_v8, %v2174_v62  ;;  %v2178_v28 = vmul.f32 %v4359_v13, %v4359_v13  ;;  %v2179_v8 = vmul.f32 %v4374_v35, %v4374_v35 }
 0x19a   :  { %v1970_v10 = vadd.f32 %v1969_v27, %v4367_v22  ;;  %v2374_v44 = vadd.f32 %v2373_v19, %v2175_v30 }
 0x19c   :  { %v2375_v52 = vadd.f32 %v2374_v44, %v2176_v37  ;;  %v1971_v34 = vadd.f32 %v1970_v10, %v4381_v45  ;;  %v4817_v44 = vpop.f32.mrf.mxu1  ;;  %v2180_v10 = vmul.f32 %v4395_v2, %v4395_v2 }
 0x19d   :  { %7868 = vst [vmem:[#allocation132_spill] sm:$0xff] %v4817_v44 }
 0x19e   :  { %v1972_v61 = vadd.f32 %v4359_v13, %v1971_v34  ;;  %v2376_v62 = vadd.f32 %v2375_v52, %v2177_v4  ;;  %v2181_v52 = vmul.f32 %v4409_v31, %v4409_v31  ;;  %v4825_v34 = vpop.f32.mrf.mxu1  ;;  %v2182_v4 = vmul.f32 %v4388_v55, %v4388_v55 }
 0x1a0   :  { %v1973_v27 = vadd.f32 %v4374_v35, %v1972_v61  ;;  %v2377_v30 = vadd.f32 %v2376_v62, %v2178_v28  ;;  %v2183_v62 = vmul.f32 %v4402_v14, %v4402_v14 }
 0x1a2   :  { %v2378_v19 = vadd.f32 %v2377_v30, %v2179_v8  ;;  %v1974_v37 = vadd.f32 %v1973_v27, %v4395_v2  ;;  %v4833_v30 = vpop.f32.mrf.mxu1 }
 0x1a3   :  { %7869 = vst [vmem:[#allocation133_spill] sm:$0xff] %v4833_v30 }
 0x1a4   :  { %v2379_v45 = vadd.f32 %v2378_v19, %v2180_v10  ;;  %v1975_v22 = vadd.f32 %v1974_v37, %v4409_v31  ;;  %v2184_v10 = vmul.f32 %v4423_v5, %v4423_v5 }
 0x1a6   :  { %v1976_v28 = vadd.f32 %v4388_v55, %v1975_v22  ;;  %v2380_v61 = vadd.f32 %v2379_v45, %v2181_v52  ;;  %v2185_v22 = vmul.f32 %v4437_v41, %v4437_v41  ;;  %v4841_v45 = vpop.f32.mrf.mxu1  ;;  %v2186_v52 = vmul.f32 %v4416_v49, %v4416_v49 }
 0x1a8   :  { %v1977_v8 = vadd.f32 %v4402_v14, %v1976_v28  ;;  %v2381_v27 = vadd.f32 %v2380_v61, %v2182_v4  ;;  %v2187_v61 = vmul.f32 %v4430_v23, %v4430_v23 }
 0x1aa   :  { %v2382_v19 = vadd.f32 %v2381_v27, %v2183_v62  ;;  %v1978_v37 = vadd.f32 %v1977_v8, %v4423_v5  ;;  %v4849_v27 = vpop.f32.mrf.mxu1 }
 0x1ab   :  { %7870 = vst [vmem:[#allocation134_spill] sm:$0xff] %v4849_v27 }
 0x1ac   :  { %v2383_v31 = vadd.f32 %v2382_v19, %v2184_v10  ;;  %v1979_v2 = vadd.f32 %v1978_v37, %v4437_v41  ;;  %v2188_v10 = vmul.f32 %v4451_v54, %v4451_v54 }
 0x1ae   :  { %v1980_v4 = vadd.f32 %v4416_v49, %v1979_v2  ;;  %v2384_v28 = vadd.f32 %v2383_v31, %v2185_v22  ;;  %v2189_v2 = vmul.f32 %v4465_v60, %v4465_v60  ;;  %v4857_v31 = vpop.f32.mrf.mxu1  ;;  %v2190_v22 = vmul.f32 %v4444_v0, %v4444_v0 }
 0x1b0   :  { %v1981_v62 = vadd.f32 %v4430_v23, %v1980_v4  ;;  %v2385_v8 = vadd.f32 %v2384_v28, %v2186_v52  ;;  %v2191_v28 = vmul.f32 %v4458_v26, %v4458_v26 }
 0x1b2   :  { %v2386_v19 = vadd.f32 %v2385_v8, %v2187_v61  ;;  %v1982_v37 = vadd.f32 %v1981_v62, %v4451_v54  ;;  %v4865_v8 = vpop.f32.mrf.mxu1 }
 0x1b3   :  { %7871 = vst [vmem:[#allocation135_spill] sm:$0xff] %v4865_v8 }
 0x1b4   :  { %v2387_v41 = vadd.f32 %v2386_v19, %v2188_v10  ;;  %v1983_v5 = vadd.f32 %v1982_v37, %v4465_v60  ;;  %v2192_v10 = vmul.f32 %v4479_v12, %v4479_v12 }
 0x1b6   :  { %v1984_v52 = vadd.f32 %v4444_v0, %v1983_v5  ;;  %v2388_v4 = vadd.f32 %v2387_v41, %v2189_v2  ;;  %v2193_v5 = vmul.f32 %v4493_v7, %v4493_v7  ;;  %v4873_v41 = vpop.f32.mrf.mxu1  ;;  %v2194_v2 = vmul.f32 %v4472_v63, %v4472_v63 }
 0x1b8   :  { %v1985_v61 = vadd.f32 %v4458_v26, %v1984_v52  ;;  %v2389_v62 = vadd.f32 %v2388_v4, %v2190_v22  ;;  %v2195_v4 = vmul.f32 %v4486_v40, %v4486_v40 }
 0x1ba   :  { %v2390_v19 = vadd.f32 %v2389_v62, %v2191_v28  ;;  %v1986_v37 = vadd.f32 %v1985_v61, %v4479_v12  ;;  %v4881_v62 = vpop.f32.mrf.mxu1 }
 0x1bb   :  { %7872 = vst [vmem:[#allocation136_spill] sm:$0xff] %v4881_v62 }
 0x1bc   :  { %v2391_v60 = vadd.f32 %v2390_v19, %v2192_v10  ;;  %v1987_v54 = vadd.f32 %v1986_v37, %v4493_v7  ;;  %v2196_v10 = vmul.f32 %v4507_v46, %v4507_v46 }
 0x1be   :  { %v1988_v22 = vadd.f32 %v4472_v63, %v1987_v54  ;;  %v2392_v52 = vadd.f32 %v2391_v60, %v2193_v5  ;;  %v2197_v54 = vmul.f32 %v4521_v20, %v4521_v20  ;;  %v4889_v60 = vpop.f32.mrf.mxu1  ;;  %v2198_v5 = vmul.f32 %v4500_v18, %v4500_v18 }
 0x1c0   :  { %v1989_v28 = vadd.f32 %v4486_v40, %v1988_v22  ;;  %v2393_v61 = vadd.f32 %v2392_v52, %v2194_v2  ;;  %v2199_v52 = vmul.f32 %v4514_v58, %v4514_v58 }
 0x1c2   :  { %v2394_v19 = vadd.f32 %v2393_v61, %v2195_v4  ;;  %v1990_v37 = vadd.f32 %v1989_v28, %v4507_v46  ;;  %v4897_v61 = vpop.f32.mrf.mxu1 }
 0x1c3   :  { %7873 = vst [vmem:[#allocation137_spill] sm:$0xff] %v4897_v61 }
 0x1c4   :  { %v2395_v7 = vadd.f32 %v2394_v19, %v2196_v10  ;;  %v1991_v12 = vadd.f32 %v1990_v37, %v4521_v20  ;;  %v2200_v10 = vmul.f32 %v4535_v16, %v4535_v16 }
 0x1c6   :  { %v1992_v2 = vadd.f32 %v4500_v18, %v1991_v12  ;;  %v2396_v22 = vadd.f32 %v2395_v7, %v2197_v54  ;;  %v2201_v12 = vmul.f32 %v4549_v53, %v4549_v53  ;;  %v4905_v7 = vpop.f32.mrf.mxu1  ;;  %v2202_v54 = vmul.f32 %v4528_v36, %v4528_v36 }
 0x1c8   :  { %v1993_v4 = vadd.f32 %v4514_v58, %v1992_v2  ;;  %v2397_v28 = vadd.f32 %v2396_v22, %v2198_v5  ;;  %v2203_v22 = vmul.f32 %v4542_v17, %v4542_v17 }
 0x1ca   :  { %v2398_v19 = vadd.f32 %v2397_v28, %v2199_v52  ;;  %v1994_v37 = vadd.f32 %v1993_v4, %v4535_v16  ;;  %v4913_v28 = vpop.f32.mrf.mxu1 }
 0x1cb   :  { %7874 = vst [vmem:[#allocation138_spill] sm:$0xff] %v4913_v28 }
 0x1cc   :  { %v2399_v20 = vadd.f32 %v2398_v19, %v2200_v10  ;;  %v1995_v46 = vadd.f32 %v1994_v37, %v4549_v53  ;;  %v2204_v10 = vmul.f32 %v4563_v56, %v4563_v56 }
 0x1ce   :  { %v1996_v5 = vadd.f32 %v4528_v36, %v1995_v46  ;;  %v2400_v2 = vadd.f32 %v2399_v20, %v2201_v12  ;;  %v2205_v46 = vmul.f32 %v4577_v21, %v4577_v21  ;;  %v4921_v20 = vpop.f32.mrf.mxu1  ;;  %v2206_v12 = vmul.f32 %v4556_v51, %v4556_v51 }
 0x1d0   :  { %v1997_v52 = vadd.f32 %v4542_v17, %v1996_v5  ;;  %v2401_v4 = vadd.f32 %v2400_v2, %v2202_v54  ;;  %v2207_v2 = vmul.f32 %v4570_v42, %v4570_v42 }
 0x1d2   :  { %v2402_v19 = vadd.f32 %v2401_v4, %v2203_v22  ;;  %v1998_v37 = vadd.f32 %v1997_v52, %v4563_v56  ;;  %v4929_v4 = vpop.f32.mrf.mxu1 }
 0x1d3   :  { %7875 = vst [vmem:[#allocation139_spill] sm:$0xff] %v4929_v4 }
 0x1d4   :  { %v2403_v53 = vadd.f32 %v2402_v19, %v2204_v10  ;;  %v1999_v16 = vadd.f32 %v1998_v37, %v4577_v21  ;;  %v2208_v10 = vmul.f32 %v4591_v33, %v4591_v33 }
 0x1d6   :  { %v2000_v54 = vadd.f32 %v4556_v51, %v1999_v16  ;;  %v2404_v5 = vadd.f32 %v2403_v53, %v2205_v46  ;;  %v2209_v16 = vmul.f32 %v4615_v24, %v4615_v24  ;;  %v4937_v53 = vpop.f32.mrf.mxu1  ;;  %v2210_v46 = vmul.f32 %v4584_v48, %v4584_v48 }
 0x1d8   :  { %v2001_v22 = vadd.f32 %v4570_v42, %v2000_v54  ;;  %v2405_v52 = vadd.f32 %v2404_v5, %v2206_v12  ;;  %v2211_v5 = vmul.f32 %v4603_v59, %v4603_v59 }
 0x1da   :  { %v2406_v19 = vadd.f32 %v2405_v52, %v2207_v2  ;;  %v2002_v37 = vadd.f32 %v2001_v22, %v4591_v33  ;;  %v4945_v52 = vpop.f32.mrf.mxu1 }
 0x1db   :  { %7876 = vst [vmem:[#allocation140_spill] sm:$0xff] %v4945_v52 }
 0x1dc   :  { %v2407_v21 = vadd.f32 %v2406_v19, %v2208_v10  ;;  %v2003_v56 = vadd.f32 %v2002_v37, %v4615_v24  ;;  %v2212_v10 = vmul.f32 %v4639_v3, %v4639_v3 }
 0x1de   :  { %v2004_v12 = vadd.f32 %v4584_v48, %v2003_v56  ;;  %v2408_v54 = vadd.f32 %v2407_v21, %v2209_v16  ;;  %v2213_v56 = vmul.f32 %v4663_v11, %v4663_v11  ;;  %v4953_v21 = vpop.f32.mrf.mxu1  ;;  %v2214_v16 = vmul.f32 %v4627_v50, %v4627_v50 }
 0x1e0   :  { %v2005_v2 = vadd.f32 %v4603_v59, %v2004_v12  ;;  %v2409_v22 = vadd.f32 %v2408_v54, %v2210_v46  ;;  %v2215_v54 = vmul.f32 %v4651_v15, %v4651_v15 }
 0x1e2   :  { %v2410_v19 = vadd.f32 %v2409_v22, %v2211_v5  ;;  %v2006_v37 = vadd.f32 %v2005_v2, %v4639_v3  ;;  %v4961_v22 = vpop.f32.mrf.mxu1 }
 0x1e3   :  { %7877 = vst [vmem:[#allocation141_spill] sm:$0xff] %v4961_v22 }
 0x1e4   :  { %v2411_v24 = vadd.f32 %v2410_v19, %v2212_v10  ;;  %v2007_v33 = vadd.f32 %v2006_v37, %v4663_v11  ;;  %v2216_v37 = vmul.f32 %v4687_v1, %v4687_v1 }
 0x1e6   :  { %v2008_v46 = vadd.f32 %v4627_v50, %v2007_v33  ;;  %v2412_v12 = vadd.f32 %v2411_v24, %v2213_v56  ;;  %v2217_v33 = vmul.f32 %v4711_v57, %v4711_v57  ;;  %v4969_v24 = vpop.f32.mrf.mxu1  ;;  %v2218_v56 = vmul.f32 %v4675_v32, %v4675_v32 }
 0x1e8   :  { %v2413_v5 = vadd.f32 %v2412_v12, %v2214_v16  ;;  %v2009_v2 = vadd.f32 %v4651_v15, %v2008_v46  ;;  %v2219_v12 = vmul.f32 %v4699_v6, %v4699_v6 }
 0x1ea   :  { %v2010_v19 = vadd.f32 %v2009_v2, %v4687_v1  ;;  %v2414_v10 = vadd.f32 %v2413_v5, %v2215_v54  ;;  %v4977_v5 = vpop.f32.mrf.mxu1 }
 0x1eb   :  { %7878 = vst [vmem:[#allocation142_spill] sm:$0xff] %v4977_v5 }
 0x1ec   :  { %v2415_v11 = vadd.f32 %v2414_v10, %v2216_v37  ;;  %v2011_v3 = vadd.f32 %v2010_v19, %v4711_v57  ;;  %v2220_v37 = vmul.f32 %v4735_v47, %v4735_v47 }
 0x1ee   :  { %v2012_v16 = vadd.f32 %v4675_v32, %v2011_v3  ;;  %v2416_v46 = vadd.f32 %v2415_v11, %v2217_v33  ;;  %v2221_v3 = vmul.f32 %v4759_v39, %v4759_v39  ;;  %v4985_v11 = vpop.f32.mrf.mxu1  ;;  %v7879_v33 = vld [vmem:[#allocation115_spill] sm:$0xff] }
 0x1f0   :  { %v2417_v2 = vadd.f32 %v2416_v46, %v2218_v56  ;;  %v2013_v54 = vadd.f32 %v4699_v6, %v2012_v16  ;;  %v2222_v56 = vmul.f32 %v7879_v33, %v7879_v33  ;;  %v7880_v6 = vld [vmem:[#allocation121_spill] sm:$0xff] }
 0x1f2   :  { %v2014_v19 = vadd.f32 %v2013_v54, %v4735_v47  ;;  %v2418_v10 = vadd.f32 %v2417_v2, %v2219_v12  ;;  %v2223_v54 = vmul.f32 %v7880_v6, %v7880_v6  ;;  %v4993_v2 = vpop.f32.mrf.mxu1 }
 0x1f3   :  { %7881 = vst [vmem:[#allocation143_spill] sm:$0xff] %v4993_v2 }
 0x1f4   :  { %v2419_v57 = vadd.f32 %v2418_v10, %v2220_v37  ;;  %v2015_v1 = vadd.f32 %v2014_v19, %v4759_v39  ;;  %v2224_v37 = vmul.f32 %v4783_v29, %v4783_v29 }
 0x1f6   :  { %v2016_v16 = vadd.f32 %v7879_v33, %v2015_v1  ;;  %v2420_v46 = vadd.f32 %v2419_v57, %v2221_v3  ;;  %v2225_v1 = vmul.f32 %v4801_v9, %v4801_v9  ;;  %v5001_v57 = vpop.f32.mrf.mxu1  ;;  %v7882_v3 = vld [vmem:[#allocation126_spill] sm:$0xff] }
 0x1f8   :  { %v2421_v32 = vadd.f32 %v2420_v46, %v2222_v56  ;;  %v2017_v12 = vadd.f32 %v7880_v6, %v2016_v16  ;;  %v2226_v56 = vmul.f32 %v7882_v3, %v7882_v3  ;;  %v7883_v6 = vld [vmem:[#allocation130_spill] sm:$0xff] }
 0x1fa   :  { %v2018_v19 = vadd.f32 %v2017_v12, %v4783_v29  ;;  %v2422_v10 = vadd.f32 %v2421_v32, %v2223_v54  ;;  %v2227_v12 = vmul.f32 %v7883_v6, %v7883_v6  ;;  %v5009_v54 = vpop.f32.mrf.mxu1 }
 0x1fb   :  { %7884 = vst [vmem:[#allocation126_spill] sm:$0xff] %v5009_v54 }
 0x1fc   :  { %v2423_v39 = vadd.f32 %v2422_v10, %v2224_v37  ;;  %v2019_v47 = vadd.f32 %v2018_v19, %v4801_v9  ;;  %v2228_v37 = vmul.f32 %v4817_v44, %v4817_v44 }
 0x1fe   :  { %v2020_v16 = vadd.f32 %v7882_v3, %v2019_v47  ;;  %v2424_v46 = vadd.f32 %v2423_v39, %v2225_v1  ;;  %v2229_v47 = vmul.f32 %v4833_v30, %v4833_v30  ;;  %v5017_v39 = vpop.f32.mrf.mxu1  ;;  %v2230_v1 = vmul.f32 %v4809_v38, %v4809_v38 }
 0x200   :  { %v2425_v33 = vadd.f32 %v2424_v46, %v2226_v56  ;;  %v2021_v32 = vadd.f32 %v7883_v6, %v2020_v16  ;;  %v2231_v46 = vmul.f32 %v4825_v34, %v4825_v34 }
 0x202   :  { %v2022_v19 = vadd.f32 %v2021_v32, %v4817_v44  ;;  %v2426_v10 = vadd.f32 %v2425_v33, %v2227_v12  ;;  %v5025_v12 = vpop.f32.mrf.mxu1 }
 0x203   :  { %7885 = vst [vmem:[#allocation130_spill] sm:$0xff] %v5025_v12 }
 0x204   :  { %v2427_v9 = vadd.f32 %v2426_v10, %v2228_v37  ;;  %v2023_v29 = vadd.f32 %v2022_v19, %v4833_v30  ;;  %v2232_v37 = vmul.f32 %v4849_v27, %v4849_v27 }
 0x206   :  { %v2024_v56 = vadd.f32 %v4809_v38, %v2023_v29  ;;  %v2428_v16 = vadd.f32 %v2427_v9, %v2229_v47  ;;  %v2233_v29 = vmul.f32 %v4865_v8, %v4865_v8  ;;  %v5033_v9 = vpop.f32.mrf.mxu1  ;;  %v2234_v47 = vmul.f32 %v4841_v45, %v4841_v45 }
 0x208   :  { %v2429_v32 = vadd.f32 %v2428_v16, %v2230_v1  ;;  %v2025_v33 = vadd.f32 %v4825_v34, %v2024_v56  ;;  %v2235_v16 = vmul.f32 %v4857_v31, %v4857_v31 }
 0x20a   :  { %v2026_v19 = vadd.f32 %v2025_v33, %v4849_v27  ;;  %v2430_v10 = vadd.f32 %v2429_v32, %v2231_v46  ;;  %v5041_v32 = vpop.f32.mrf.mxu1 }
 0x20b   :  { %7886 = vst [vmem:[#allocation144_spill] sm:$0xff] %v5041_v32 }
 0x20c   :  { %v2431_v30 = vadd.f32 %v2430_v10, %v2232_v37  ;;  %v2027_v44 = vadd.f32 %v2026_v19, %v4865_v8  ;;  %v2236_v37 = vmul.f32 %v4881_v62, %v4881_v62 }
 0x20e   :  { %v2028_v1 = vadd.f32 %v4841_v45, %v2027_v44  ;;  %v2432_v56 = vadd.f32 %v2431_v30, %v2233_v29  ;;  %v2237_v44 = vmul.f32 %v4897_v61, %v4897_v61  ;;  %v5049_v30 = vpop.f32.mrf.mxu1  ;;  %v2238_v29 = vmul.f32 %v4873_v41, %v4873_v41 }
 0x20f   :  { %7887 = vst [vmem:[#allocation145_spill] sm:$0xff] %v5049_v30 }
 0x210   :  { %v2433_v33 = vadd.f32 %v2432_v56, %v2234_v47  ;;  %v2029_v46 = vadd.f32 %v4857_v31, %v2028_v1  ;;  %v2239_v56 = vmul.f32 %v4889_v60, %v4889_v60 }
 0x212   :  { %v2030_v19 = vadd.f32 %v2029_v46, %v4881_v62  ;;  %v2434_v10 = vadd.f32 %v2433_v33, %v2235_v16  ;;  %v5057_v33 = vpop.f32.mrf.mxu1 }
 0x213   :  { %7888 = vst [vmem:[#allocation146_spill] sm:$0xff] %v5057_v33 }
 0x214   :  { %v2435_v8 = vadd.f32 %v2434_v10, %v2236_v37  ;;  %v2031_v27 = vadd.f32 %v2030_v19, %v4897_v61  ;;  %v2240_v37 = vmul.f32 %v4913_v28, %v4913_v28 }
 0x216   :  { %v2032_v47 = vadd.f32 %v4873_v41, %v2031_v27  ;;  %v2436_v1 = vadd.f32 %v2435_v8, %v2237_v44  ;;  %v2241_v27 = vmul.f32 %v4929_v4, %v4929_v4  ;;  %v5065_v8 = vpop.f32.mrf.mxu1  ;;  %v2242_v44 = vmul.f32 %v4905_v7, %v4905_v7 }
 0x217   :  { %7889 = vst [vmem:[#allocation147_spill] sm:$0xff] %v5065_v8 }
 0x218   :  { %v2437_v46 = vadd.f32 %v2436_v1, %v2238_v29  ;;  %v2033_v16 = vadd.f32 %v4889_v60, %v2032_v47  ;;  %v2243_v1 = vmul.f32 %v4921_v20, %v4921_v20 }
 0x21a   :  { %v2034_v19 = vadd.f32 %v2033_v16, %v4913_v28  ;;  %v2438_v10 = vadd.f32 %v2437_v46, %v2239_v56  ;;  %v5073_v46 = vpop.f32.mrf.mxu1 }
 0x21b   :  { %7890 = vst [vmem:[#allocation148_spill] sm:$0xff] %v5073_v46 }
 0x21c   :  { %v2439_v61 = vadd.f32 %v2438_v10, %v2240_v37  ;;  %v2035_v62 = vadd.f32 %v2034_v19, %v4929_v4  ;;  %v2244_v37 = vmul.f32 %v4945_v52, %v4945_v52 }
 0x21e   :  { %v2036_v29 = vadd.f32 %v4905_v7, %v2035_v62  ;;  %v2440_v47 = vadd.f32 %v2439_v61, %v2241_v27  ;;  %v2245_v62 = vmul.f32 %v4961_v22, %v4961_v22  ;;  %v5081_v61 = vpop.f32.mrf.mxu1  ;;  %v2246_v27 = vmul.f32 %v4937_v53, %v4937_v53 }
 0x21f   :  { %7891 = vst [vmem:[#allocation149_spill] sm:$0xff] %v5081_v61 }
 0x220   :  { %v2441_v16 = vadd.f32 %v2440_v47, %v2242_v44  ;;  %v2037_v56 = vadd.f32 %v4921_v20, %v2036_v29  ;;  %v2247_v47 = vmul.f32 %v4953_v21, %v4953_v21 }
 0x222   :  { %v2038_v19 = vadd.f32 %v2037_v56, %v4945_v52  ;;  %v2442_v10 = vadd.f32 %v2441_v16, %v2243_v1  ;;  %v5089_v16 = vpop.f32.mrf.mxu1 }
 0x223   :  { %7892 = vst [vmem:[#allocation150_spill] sm:$0xff] %v5089_v16 }
 0x224   :  { %v2443_v4 = vadd.f32 %v2442_v10, %v2244_v37  ;;  %v2039_v28 = vadd.f32 %v2038_v19, %v4961_v22  ;;  %v2248_v37 = vmul.f32 %v4977_v5, %v4977_v5 }
 0x226   :  { %v2040_v44 = vadd.f32 %v4937_v53, %v2039_v28  ;;  %v2444_v29 = vadd.f32 %v2443_v4, %v2245_v62  ;;  %v2249_v28 = vmul.f32 %v4993_v2, %v4993_v2  ;;  %v5097_v4 = vpop.f32.mrf.mxu1  ;;  %v2250_v62 = vmul.f32 %v4969_v24, %v4969_v24 }
 0x227   :  { %7893 = vst [vmem:[#allocation151_spill] sm:$0xff] %v5097_v4 }
 0x228   :  { %v2445_v56 = vadd.f32 %v2444_v29, %v2246_v27  ;;  %v2041_v1 = vadd.f32 %v4953_v21, %v2040_v44  ;;  %v2251_v29 = vmul.f32 %v4985_v11, %v4985_v11 }
 0x22a   :  { %v2042_v19 = vadd.f32 %v2041_v1, %v4977_v5  ;;  %v2446_v10 = vadd.f32 %v2445_v56, %v2247_v47  ;;  %v5105_v56 = vpop.f32.mrf.mxu1 }
 0x22b   :  { %7894 = vst [vmem:[#allocation152_spill] sm:$0xff] %v5105_v56 }
 0x22c   :  { %v2447_v22 = vadd.f32 %v2446_v10, %v2248_v37  ;;  %v2043_v52 = vadd.f32 %v2042_v19, %v4993_v2  ;;  %v2252_v37 = vmul.f32 %v5009_v54, %v5009_v54 }
 0x22e   :  { %v2044_v27 = vadd.f32 %v4969_v24, %v2043_v52  ;;  %v2448_v44 = vadd.f32 %v2447_v22, %v2249_v28  ;;  %v2253_v52 = vmul.f32 %v5025_v12, %v5025_v12  ;;  %v5113_v22 = vpop.f32.mrf.mxu1  ;;  %v2254_v28 = vmul.f32 %v5001_v57, %v5001_v57 }
 0x22f   :  { %7895 = vst [vmem:[#allocation153_spill] sm:$0xff] %v5113_v22 }
 0x230   :  { %v2449_v1 = vadd.f32 %v2448_v44, %v2250_v62  ;;  %v2045_v47 = vadd.f32 %v4985_v11, %v2044_v27  ;;  %v2255_v44 = vmul.f32 %v5017_v39, %v5017_v39 }
 0x232   :  { %v2046_v19 = vadd.f32 %v2045_v47, %v5009_v54  ;;  %v2450_v10 = vadd.f32 %v2449_v1, %v2251_v29  ;;  %v5121_v1 = vpop.f32.mrf.mxu1 }
 0x233   :  { %7896 = vst [vmem:[#allocation154_spill] sm:$0xff] %v5121_v1 }
 0x234   :  { %v2451_v2 = vadd.f32 %v2450_v10, %v2252_v37  ;;  %v2047_v5 = vadd.f32 %v2046_v19, %v5025_v12  ;;  %v2256_v37 = vmul.f32 %v5041_v32, %v5041_v32 }
 0x236   :  { %v2048_v62 = vadd.f32 %v5001_v57, %v2047_v5  ;;  %v2452_v27 = vadd.f32 %v2451_v2, %v2253_v52  ;;  %v2257_v5 = vmul.f32 %v5057_v33, %v5057_v33  ;;  %v5129_v2 = vpop.f32.mrf.mxu1  ;;  %v2258_v52 = vmul.f32 %v5033_v9, %v5033_v9 }
 0x237   :  { %7897 = vst [vmem:[#allocation155_spill] sm:$0xff] %v5129_v2 }
 0x238   :  { %v2453_v47 = vadd.f32 %v2452_v27, %v2254_v28  ;;  %v2049_v29 = vadd.f32 %v5017_v39, %v2048_v62  ;;  %v2259_v27 = vmul.f32 %v5049_v30, %v5049_v30 }
 0x23a   :  { %v2050_v19 = vadd.f32 %v2049_v29, %v5041_v32  ;;  %v2454_v10 = vadd.f32 %v2453_v47, %v2255_v44  ;;  %v5137_v47 = vpop.f32.mrf.mxu1 }
 0x23b   :  { %7898 = vst [vmem:[#allocation156_spill] sm:$0xff] %v5137_v47 }
 0x23c   :  { %v2455_v12 = vadd.f32 %v2454_v10, %v2256_v37  ;;  %v2051_v54 = vadd.f32 %v2050_v19, %v5057_v33  ;;  %v2260_v37 = vmul.f32 %v5073_v46, %v5073_v46 }
 0x23e   :  { %v2052_v28 = vadd.f32 %v5033_v9, %v2051_v54  ;;  %v2456_v62 = vadd.f32 %v2455_v12, %v2257_v5  ;;  %v2261_v54 = vmul.f32 %v5089_v16, %v5089_v16  ;;  %v5145_v12 = vpop.f32.mrf.mxu1  ;;  %v2262_v5 = vmul.f32 %v5065_v8, %v5065_v8 }
 0x23f   :  { %7899 = vst [vmem:[#allocation157_spill] sm:$0xff] %v5145_v12 }
 0x240   :  { %v2457_v29 = vadd.f32 %v2456_v62, %v2258_v52  ;;  %v2053_v44 = vadd.f32 %v5049_v30, %v2052_v28  ;;  %v2263_v62 = vmul.f32 %v5081_v61, %v5081_v61 }
 0x242   :  { %v2054_v19 = vadd.f32 %v2053_v44, %v5073_v46  ;;  %v2458_v10 = vadd.f32 %v2457_v29, %v2259_v27  ;;  %v5153_v29 = vpop.f32.mrf.mxu1 }
 0x243   :  { %7900 = vst [vmem:[#allocation158_spill] sm:$0xff] %v5153_v29 }
 0x244   :  { %v2459_v33 = vadd.f32 %v2458_v10, %v2260_v37  ;;  %v2055_v32 = vadd.f32 %v2054_v19, %v5089_v16  ;;  %v2264_v37 = vmul.f32 %v5105_v56, %v5105_v56 }
 0x246   :  { %v2056_v52 = vadd.f32 %v5065_v8, %v2055_v32  ;;  %v2460_v28 = vadd.f32 %v2459_v33, %v2261_v54  ;;  %v2265_v32 = vmul.f32 %v5121_v1, %v5121_v1  ;;  %v5161_v33 = vpop.f32.mrf.mxu1  ;;  %v2266_v54 = vmul.f32 %v5097_v4, %v5097_v4 }
 0x247   :  { %7901 = vst [vmem:[#allocation159_spill] sm:$0xff] %v5161_v33 }
 0x248   :  { %v2461_v44 = vadd.f32 %v2460_v28, %v2262_v5  ;;  %v2057_v27 = vadd.f32 %v5081_v61, %v2056_v52  ;;  %v2267_v28 = vmul.f32 %v5113_v22, %v5113_v22 }
 0x24a   :  { %v2058_v19 = vadd.f32 %v2057_v27, %v5105_v56  ;;  %v2462_v10 = vadd.f32 %v2461_v44, %v2263_v62  ;;  %v5169_v44 = vpop.f32.mrf.mxu1 }
 0x24b   :  { %7902 = vst [vmem:[#allocation160_spill] sm:$0xff] %v5169_v44 }
 0x24c   :  { %v2463_v16 = vadd.f32 %v2462_v10, %v2264_v37  ;;  %v2059_v46 = vadd.f32 %v2058_v19, %v5121_v1  ;;  %v2268_v37 = vmul.f32 %v5137_v47, %v5137_v47 }
 0x24e   :  { %v2060_v5 = vadd.f32 %v5097_v4, %v2059_v46  ;;  %v2464_v52 = vadd.f32 %v2463_v16, %v2265_v32  ;;  %v2269_v46 = vmul.f32 %v5153_v29, %v5153_v29  ;;  %v5177_v16 = vpop.f32.mrf.mxu1  ;;  %v2270_v32 = vmul.f32 %v5129_v2, %v5129_v2 }
 0x250   :  { %v2465_v27 = vadd.f32 %v2464_v52, %v2266_v54  ;;  %v2061_v62 = vadd.f32 %v5113_v22, %v2060_v5  ;;  %v2271_v52 = vmul.f32 %v5145_v12, %v5145_v12 }
 0x252   :  { %v2062_v19 = vadd.f32 %v2061_v62, %v5137_v47  ;;  %v2466_v10 = vadd.f32 %v2465_v27, %v2267_v28  ;;  %v5185_v27 = vpop.f32.mrf.mxu1 }
 0x253   :  { %7903 = vst [vmem:[#allocation161_spill] sm:$0xff] %v5185_v27 }
 0x254   :  { %v2467_v1 = vadd.f32 %v2466_v10, %v2268_v37  ;;  %v2063_v56 = vadd.f32 %v2062_v19, %v5153_v29  ;;  %v2272_v37 = vmul.f32 %v5169_v44, %v5169_v44 }
 0x256   :  { %v2064_v54 = vadd.f32 %v5129_v2, %v2063_v56  ;;  %v2468_v5 = vadd.f32 %v2467_v1, %v2269_v46  ;;  %v2273_v56 = vmul.f32 %v5185_v27, %v5185_v27  ;;  %v2274_v1 = vmul.f32 %v5161_v33, %v5161_v33 }
 0x258   :  { %v2469_v62 = vadd.f32 %v2468_v5, %v2270_v32  ;;  %v2065_v28 = vadd.f32 %v5145_v12, %v2064_v54  ;;  %v2275_v54 = vmul.f32 %v5177_v16, %v5177_v16 }
 0x25a   :  { %v2066_v19 = vadd.f32 %v2065_v28, %v5169_v44  ;;  %v2470_v10 = vadd.f32 %v2469_v62, %v2271_v52 }
 0x25c   :  { %v2471_v29 = vadd.f32 %v2470_v10, %v2272_v37  ;;  %v2067_v47 = vadd.f32 %v2066_v19, %v5185_v27 }
 0x25e   :  { %v2068_v46 = vadd.f32 %v5161_v33, %v2067_v47  ;;  %v2472_v32 = vadd.f32 %v2471_v29, %v2273_v56 }
 0x260   :  { %v2069_v5 = vadd.f32 %v5177_v16, %v2068_v46  ;;  %v2473_v28 = vadd.f32 %v2472_v32, %v2274_v1  ;;  %v2493_v1 = vlaneseq }
 0x262   :  { %v2070_v44 = vrot.slane %v2069_v5, 4  ;;  %v2474_v52 = vadd.f32 %v2473_v28, %v2275_v54  ;;  %v5199_v32 = vshrl.u32 %v2493_v1, 7  ;;  %v7906_v28 = vld [vmem:[#allocation2_spill] sm:$0xff]  ;;  %v7911_v1 = vld [vmem:[#allocation8_spill] sm:$0xff] }
 0x264   :  { %v2071_v62 = vadd.f32 %v2070_v44, %v2069_v5  ;;  %v2475_v37 = vrot.slane %v2474_v52, 4  ;;  %v2481_v44 = vld [vmem:[%s7471_s2] sm:$0x1]  ;;  %v7637_v54 = vsub.s32 0, %v5199_v32 }
 0x266   :  { %v2072_v19 = vrot.slane %v2071_v62, 2  ;;  %v2476_v10 = vadd.f32 %v2475_v37, %v2474_v52 }
 0x268   :  { %v2073_v12 = vadd.f32 %v2072_v19, %v2071_v62  ;;  %v2477_v27 = vrot.slane %v2476_v10, 2  ;;  %v7907_v62 = vld [vmem:[#allocation4_spill] sm:$0xff]  ;;  %v7908_v19 = vld [vmem:[#allocation7_spill] sm:$0xff] }
 0x26a   :  { %v2074_v2 = vrot.slane %v2073_v12, 1  ;;  %v2478_v22 = vadd.f32 %v2477_v27, %v2476_v10 }
 0x26c   :  { %v2075_v4 = vadd.f32 %v2074_v2, %v2073_v12  ;;  %v2479_v61 = vrot.slane %v2478_v22, 1 }
 0x26e   :  { %v2480_v47 = vadd.f32 %v2479_v61, %v2478_v22  ;;  %v2483_v29 = vmul.f32 0.0006377551, %v2075_v4  ;;  %v5208_v61 = vld [vmem:[%s7471_s2 + $0x1] sm:$0x1]  ;;  %v7904_v22 = vld [vmem:[#allocation3_spill] sm:$0xff] }
 0x270   :  { %v2484_v56 = vmul.f32 0.0006377551, %v2480_v47  ;;  %v2485_v33 = vmul.f32 %v2483_v29, %v2483_v29  ;;  %v7909_v47 = vld [vmem:[#allocation9_spill] sm:$0xff] }
 0x272   :  { %v2486_v8 = vsub.f32 %v2484_v56, %v2485_v33  ;;  %v7905_v33 = vld [vmem:[#allocation5_spill] sm:$0xff]  ;;  %v7910_v56 = vld [vmem:[#allocation6_spill] sm:$0xff] }
 0x274   :  { %v2487_v30 = vmax.f32 %v2486_v8, 0.0  ;;  %v7921_v8 = vld [vmem:[#allocation17_spill] sm:$0xff] }
 0x276   :  { %v2488_v46 = vadd.f32 1e-05, %v2487_v30 }
 0x278   :  { %3770 = vrsqrt.f32 %v2488_v46 }
 0x285   :  { %v3771_v27 = vpop.eup %3770 }
 0x286   :  { %v2490_v2 = vmul.f32 %v3771_v27, %v2481_v44  ;;  %v7912_v27 = vld [vmem:[#allocation11_spill] sm:$0xff] }
 0x288   :  { %v5210_v4 = vmul.f32 %v2490_v2, %v2483_v29  ;;  %v5214_v30 = vrot.slane %v2490_v2, %v7637_v54  ;;  %v7923_v54 = vld [vmem:[#allocation14_spill] sm:$0xff] }
 0x28a   :  { %v5220_v12 = vmul.f32 %v5214_v30, %v7904_v22  ;;  %v5224_v5 = vmul.f32 %v5214_v30, %v7905_v33  ;;  %v5228_v52 = vmul.f32 %v7906_v28, %v5214_v30  ;;  %v5232_v37 = vmul.f32 %v7907_v62, %v5214_v30  ;;  %v7913_v22 = vld [vmem:[#allocation13_spill] sm:$0xff]  ;;  %v7915_v28 = vld [vmem:[#allocation10_spill] sm:$0xff] }
 0x28b   :  { %v5236_v10 = vmul.f32 %v5214_v30, %v7908_v19  ;;  %v5240_v29 = vmul.f32 %v5214_v30, %v7909_v47  ;;  %v5244_v46 = vmul.f32 %v7910_v56, %v5214_v30  ;;  %v5248_v44 = vmul.f32 %v7911_v1, %v5214_v30  ;;  %v7917_v19 = vld [vmem:[#allocation12_spill] sm:$0xff]  ;;  %v7919_v56 = vld [vmem:[#allocation15_spill] sm:$0xff] }
 0x28c   :  { %v5252_v2 = vmul.f32 %v5214_v30, %v7912_v27  ;;  %v5256_v33 = vmul.f32 %v5214_v30, %v7913_v22  ;;  %v5260_v62 = vmul.f32 %v7915_v28, %v5214_v30  ;;  %v5264_v47 = vmul.f32 %v7917_v19, %v5214_v30 }
 0x28d   :  { %v5268_v1 = vmul.f32 %v5214_v30, %v7919_v56  ;;  %v5272_v27 = vmul.f32 %v5214_v30, %v7921_v8  ;;  %v5276_v22 = vmul.f32 %v7923_v54, %v5214_v30 }
 0x28e   :  { %7914 = vst [vmem:[#allocation3_spill] sm:$0xff] %v5256_v33  ;;  %7916 = vst [vmem:[#allocation5_spill] sm:$0xff] %v5260_v62  ;;  %v7925_v33 = vld [vmem:[#allocation16_spill] sm:$0xff]  ;;  %v7927_v62 = vld [vmem:[#allocation19_spill] sm:$0xff] }
 0x28f   :  { %7918 = vst [vmem:[#allocation2_spill] sm:$0xff] %v5264_v47  ;;  %7920 = vst [vmem:[#allocation4_spill] sm:$0xff] %v5268_v1  ;;  %v5280_v28 = vmul.f32 %v7925_v33, %v5214_v30  ;;  %v5284_v19 = vmul.f32 %v5214_v30, %v7927_v62  ;;  %v7929_v47 = vld [vmem:[#allocation21_spill] sm:$0xff]  ;;  %v7931_v1 = vld [vmem:[#allocation18_spill] sm:$0xff] }
 0x290   :  { %7922 = vst [vmem:[#allocation7_spill] sm:$0xff] %v5272_v27  ;;  %7924 = vst [vmem:[#allocation9_spill] sm:$0xff] %v5276_v22  ;;  %v5288_v56 = vmul.f32 %v5214_v30, %v7929_v47  ;;  %v5292_v8 = vmul.f32 %v7931_v1, %v5214_v30  ;;  %v7933_v27 = vld [vmem:[#allocation20_spill] sm:$0xff]  ;;  %v7935_v22 = vld [vmem:[#allocation23_spill] sm:$0xff] }
 0x291   :  { %7926 = vst [vmem:[#allocation6_spill] sm:$0xff] %v5280_v28  ;;  %7928 = vst [vmem:[#allocation8_spill] sm:$0xff] %v5284_v19  ;;  %v5296_v54 = vmul.f32 %v7933_v27, %v5214_v30  ;;  %v5300_v33 = vmul.f32 %v5214_v30, %v7935_v22  ;;  %v7937_v28 = vld [vmem:[#allocation25_spill] sm:$0xff]  ;;  %v7939_v19 = vld [vmem:[#allocation22_spill] sm:$0xff] }
 0x292   :  { %7930 = vst [vmem:[#allocation11_spill] sm:$0xff] %v5288_v56  ;;  %7932 = vst [vmem:[#allocation13_spill] sm:$0xff] %v5292_v8  ;;  %v5304_v62 = vmul.f32 %v5214_v30, %v7937_v28  ;;  %v5308_v47 = vmul.f32 %v7939_v19, %v5214_v30  ;;  %v7941_v56 = vld [vmem:[#allocation24_spill] sm:$0xff]  ;;  %v7943_v8 = vld [vmem:[#allocation27_spill] sm:$0xff] }
 0x293   :  { %7934 = vst [vmem:[#allocation10_spill] sm:$0xff] %v5296_v54  ;;  %7936 = vst [vmem:[#allocation12_spill] sm:$0xff] %v5300_v33  ;;  %v5312_v1 = vmul.f32 %v7941_v56, %v5214_v30  ;;  %v5316_v27 = vmul.f32 %v5214_v30, %v7943_v8  ;;  %v7945_v54 = vld [vmem:[#allocation29_spill] sm:$0xff]  ;;  %v7947_v33 = vld [vmem:[#allocation26_spill] sm:$0xff] }
 0x294   :  { %7938 = vst [vmem:[#allocation15_spill] sm:$0xff] %v5304_v62  ;;  %7940 = vst [vmem:[#allocation17_spill] sm:$0xff] %v5308_v47  ;;  %v5320_v22 = vmul.f32 %v5214_v30, %v7945_v54  ;;  %v5324_v28 = vmul.f32 %v7947_v33, %v5214_v30  ;;  %v7949_v62 = vld [vmem:[#allocation28_spill] sm:$0xff]  ;;  %v7951_v47 = vld [vmem:[#allocation31_spill] sm:$0xff] }
 0x295   :  { %7942 = vst [vmem:[#allocation14_spill] sm:$0xff] %v5312_v1  ;;  %7944 = vst [vmem:[#allocation16_spill] sm:$0xff] %v5316_v27  ;;  %v5328_v19 = vmul.f32 %v7949_v62, %v5214_v30  ;;  %v5332_v56 = vmul.f32 %v5214_v30, %v7951_v47  ;;  %v7953_v1 = vld [vmem:[#allocation33_spill] sm:$0xff]  ;;  %v7955_v27 = vld [vmem:[#allocation30_spill] sm:$0xff] }
 0x296   :  { %7946 = vst [vmem:[#allocation19_spill] sm:$0xff] %v5320_v22  ;;  %7948 = vst [vmem:[#allocation21_spill] sm:$0xff] %v5324_v28  ;;  %v5336_v8 = vmul.f32 %v5214_v30, %v7953_v1  ;;  %v5340_v54 = vmul.f32 %v7955_v27, %v5214_v30  ;;  %v7957_v22 = vld [vmem:[#allocation32_spill] sm:$0xff]  ;;  %v7959_v28 = vld [vmem:[#allocation35_spill] sm:$0xff] }
 0x297   :  { %7950 = vst [vmem:[#allocation18_spill] sm:$0xff] %v5328_v19  ;;  %7952 = vst [vmem:[#allocation20_spill] sm:$0xff] %v5332_v56  ;;  %v5344_v33 = vmul.f32 %v7957_v22, %v5214_v30  ;;  %v5348_v62 = vmul.f32 %v5214_v30, %v7959_v28  ;;  %v7961_v19 = vld [vmem:[#allocation38_spill] sm:$0xff] }
 0x298   :  { %7954 = vst [vmem:[#allocation23_spill] sm:$0xff] %v5336_v8  ;;  %7956 = vst [vmem:[#allocation25_spill] sm:$0xff] %v5340_v54  ;;  %v5352_v47 = vmul.f32 %v5214_v30, %v7961_v19  ;;  %v7963_v56 = vld [vmem:[#allocation34_spill] sm:$0xff]  ;;  %v7965_v8 = vld [vmem:[#allocation36_spill] sm:$0xff] }
 0x299   :  { %7958 = vst [vmem:[#allocation22_spill] sm:$0xff] %v5344_v33  ;;  %7960 = vst [vmem:[#allocation24_spill] sm:$0xff] %v5348_v62  ;;  %v5356_v1 = vmul.f32 %v7963_v56, %v5214_v30  ;;  %v5360_v27 = vmul.f32 %v7965_v8, %v5214_v30  ;;  %v7967_v54 = vld [vmem:[#allocation41_spill] sm:$0xff]  ;;  %v7969_v33 = vld [vmem:[#allocation44_spill] sm:$0xff] }
 0x29a   :  { %7962 = vst [vmem:[#allocation27_spill] sm:$0xff] %v5352_v47  ;;  %v5364_v22 = vmul.f32 %v5214_v30, %v7967_v54  ;;  %v5368_v28 = vmul.f32 %v5214_v30, %v7969_v33  ;;  %v7971_v62 = vld [vmem:[#allocation39_spill] sm:$0xff]  ;;  %v7973_v47 = vld [vmem:[#allocation42_spill] sm:$0xff] }
 0x29b   :  { %7964 = vst [vmem:[#allocation29_spill] sm:$0xff] %v5356_v1  ;;  %7966 = vst [vmem:[#allocation26_spill] sm:$0xff] %v5360_v27  ;;  %v5372_v19 = vmul.f32 %v7971_v62, %v5214_v30  ;;  %v5376_v56 = vmul.f32 %v7973_v47, %v5214_v30  ;;  %v7975_v1 = vld [vmem:[#allocation47_spill] sm:$0xff]  ;;  %v7977_v27 = vld [vmem:[#allocation50_spill] sm:$0xff] }
 0x29c   :  { %7968 = vst [vmem:[#allocation28_spill] sm:$0xff] %v5364_v22  ;;  %7970 = vst [vmem:[#allocation31_spill] sm:$0xff] %v5368_v28  ;;  %v5380_v8 = vmul.f32 %v5214_v30, %v7975_v1  ;;  %v5384_v54 = vmul.f32 %v5214_v30, %v7977_v27  ;;  %v7979_v22 = vld [vmem:[#allocation45_spill] sm:$0xff]  ;;  %v7981_v28 = vld [vmem:[#allocation48_spill] sm:$0xff] }
 0x29d   :  { %7972 = vst [vmem:[#allocation33_spill] sm:$0xff] %v5372_v19  ;;  %7974 = vst [vmem:[#allocation30_spill] sm:$0xff] %v5376_v56  ;;  %v5388_v33 = vmul.f32 %v7979_v22, %v5214_v30  ;;  %v5392_v62 = vmul.f32 %v7981_v28, %v5214_v30  ;;  %v7983_v19 = vld [vmem:[#allocation53_spill] sm:$0xff]  ;;  %v7985_v56 = vld [vmem:[#allocation56_spill] sm:$0xff] }
 0x29e   :  { %7976 = vst [vmem:[#allocation32_spill] sm:$0xff] %v5380_v8  ;;  %7978 = vst [vmem:[#allocation35_spill] sm:$0xff] %v5384_v54  ;;  %v5396_v47 = vmul.f32 %v5214_v30, %v7983_v19  ;;  %v5400_v1 = vmul.f32 %v5214_v30, %v7985_v56  ;;  %v7987_v8 = vld [vmem:[#allocation51_spill] sm:$0xff]  ;;  %v7989_v54 = vld [vmem:[#allocation54_spill] sm:$0xff] }
 0x29f   :  { %7980 = vst [vmem:[#allocation38_spill] sm:$0xff] %v5388_v33  ;;  %7982 = vst [vmem:[#allocation34_spill] sm:$0xff] %v5392_v62  ;;  %v5404_v27 = vmul.f32 %v7987_v8, %v5214_v30  ;;  %v5408_v22 = vmul.f32 %v7989_v54, %v5214_v30  ;;  %v7991_v33 = vld [vmem:[#allocation59_spill] sm:$0xff]  ;;  %v7993_v62 = vld [vmem:[#allocation62_spill] sm:$0xff] }
 0x2a0   :  { %7984 = vst [vmem:[#allocation36_spill] sm:$0xff] %v5396_v47  ;;  %7986 = vst [vmem:[#allocation41_spill] sm:$0xff] %v5400_v1  ;;  %v5412_v28 = vmul.f32 %v5214_v30, %v7991_v33  ;;  %v5416_v19 = vmul.f32 %v5214_v30, %v7993_v62  ;;  %v7995_v47 = vld [vmem:[#allocation57_spill] sm:$0xff]  ;;  %v7997_v1 = vld [vmem:[#allocation60_spill] sm:$0xff] }
 0x2a1   :  { %7988 = vst [vmem:[#allocation44_spill] sm:$0xff] %v5404_v27  ;;  %7990 = vst [vmem:[#allocation39_spill] sm:$0xff] %v5408_v22  ;;  %v5420_v56 = vmul.f32 %v7995_v47, %v5214_v30  ;;  %v5424_v8 = vmul.f32 %v7997_v1, %v5214_v30  ;;  %v7999_v27 = vld [vmem:[#allocation65_spill] sm:$0xff]  ;;  %v8001_v22 = vld [vmem:[#allocation68_spill] sm:$0xff] }
 0x2a2   :  { %7992 = vst [vmem:[#allocation42_spill] sm:$0xff] %v5412_v28  ;;  %7994 = vst [vmem:[#allocation47_spill] sm:$0xff] %v5416_v19  ;;  %v5428_v54 = vmul.f32 %v5214_v30, %v7999_v27  ;;  %v5432_v33 = vmul.f32 %v5214_v30, %v8001_v22  ;;  %v8003_v28 = vld [vmem:[#allocation63_spill] sm:$0xff]  ;;  %v8005_v19 = vld [vmem:[#allocation66_spill] sm:$0xff] }
 0x2a3   :  { %7996 = vst [vmem:[#allocation50_spill] sm:$0xff] %v5420_v56  ;;  %7998 = vst [vmem:[#allocation45_spill] sm:$0xff] %v5424_v8  ;;  %v5436_v62 = vmul.f32 %v8003_v28, %v5214_v30  ;;  %v5440_v47 = vmul.f32 %v8005_v19, %v5214_v30  ;;  %v8007_v56 = vld [vmem:[#allocation71_spill] sm:$0xff]  ;;  %v8009_v8 = vld [vmem:[#allocation74_spill] sm:$0xff] }
 0x2a4   :  { %8000 = vst [vmem:[#allocation48_spill] sm:$0xff] %v5428_v54  ;;  %8002 = vst [vmem:[#allocation53_spill] sm:$0xff] %v5432_v33  ;;  %v5444_v1 = vmul.f32 %v5214_v30, %v8007_v56  ;;  %v5448_v27 = vmul.f32 %v5214_v30, %v8009_v8  ;;  %v8011_v54 = vld [vmem:[#allocation69_spill] sm:$0xff]  ;;  %v8013_v33 = vld [vmem:[#allocation72_spill] sm:$0xff] }
 0x2a5   :  { %8004 = vst [vmem:[#allocation56_spill] sm:$0xff] %v5436_v62  ;;  %8006 = vst [vmem:[#allocation51_spill] sm:$0xff] %v5440_v47  ;;  %v5452_v22 = vmul.f32 %v8011_v54, %v5214_v30  ;;  %v5456_v28 = vmul.f32 %v8013_v33, %v5214_v30  ;;  %v8015_v62 = vld [vmem:[#allocation77_spill] sm:$0xff]  ;;  %v8017_v47 = vld [vmem:[#allocation80_spill] sm:$0xff] }
 0x2a6   :  { %8008 = vst [vmem:[#allocation54_spill] sm:$0xff] %v5444_v1  ;;  %8010 = vst [vmem:[#allocation59_spill] sm:$0xff] %v5448_v27  ;;  %v5460_v19 = vmul.f32 %v5214_v30, %v8015_v62  ;;  %v5464_v56 = vmul.f32 %v5214_v30, %v8017_v47  ;;  %v8019_v1 = vld [vmem:[#allocation75_spill] sm:$0xff]  ;;  %v8021_v27 = vld [vmem:[#allocation78_spill] sm:$0xff] }
 0x2a7   :  { %8012 = vst [vmem:[#allocation62_spill] sm:$0xff] %v5452_v22  ;;  %8014 = vst [vmem:[#allocation57_spill] sm:$0xff] %v5456_v28  ;;  %v5468_v8 = vmul.f32 %v8019_v1, %v5214_v30  ;;  %v5472_v54 = vmul.f32 %v8021_v27, %v5214_v30  ;;  %v8023_v22 = vld [vmem:[#allocation83_spill] sm:$0xff]  ;;  %v8025_v28 = vld [vmem:[#allocation86_spill] sm:$0xff] }
 0x2a8   :  { %8016 = vst [vmem:[#allocation60_spill] sm:$0xff] %v5460_v19  ;;  %8018 = vst [vmem:[#allocation65_spill] sm:$0xff] %v5464_v56  ;;  %v5476_v33 = vmul.f32 %v5214_v30, %v8023_v22  ;;  %v5480_v62 = vmul.f32 %v5214_v30, %v8025_v28  ;;  %v8027_v19 = vld [vmem:[#allocation81_spill] sm:$0xff]  ;;  %v8029_v56 = vld [vmem:[#allocation84_spill] sm:$0xff] }
 0x2a9   :  { %8020 = vst [vmem:[#allocation68_spill] sm:$0xff] %v5468_v8  ;;  %8022 = vst [vmem:[#allocation63_spill] sm:$0xff] %v5472_v54  ;;  %v5484_v47 = vmul.f32 %v8027_v19, %v5214_v30  ;;  %v5488_v1 = vmul.f32 %v8029_v56, %v5214_v30  ;;  %v8031_v8 = vld [vmem:[#allocation88_spill] sm:$0xff]  ;;  %v8033_v54 = vld [vmem:[#allocation91_spill] sm:$0xff] }
 0x2aa   :  { %8024 = vst [vmem:[#allocation66_spill] sm:$0xff] %v5476_v33  ;;  %8026 = vst [vmem:[#allocation71_spill] sm:$0xff] %v5480_v62  ;;  %v5492_v27 = vmul.f32 %v5214_v30, %v8031_v8  ;;  %v5496_v22 = vmul.f32 %v5214_v30, %v8033_v54  ;;  %v8035_v33 = vld [vmem:[#allocation87_spill] sm:$0xff]  ;;  %v8037_v62 = vld [vmem:[#allocation89_spill] sm:$0xff] }
 0x2ab   :  { %8028 = vst [vmem:[#allocation74_spill] sm:$0xff] %v5484_v47  ;;  %8030 = vst [vmem:[#allocation69_spill] sm:$0xff] %v5488_v1  ;;  %v5500_v28 = vmul.f32 %v8035_v33, %v5214_v30  ;;  %v5504_v19 = vmul.f32 %v8037_v62, %v5214_v30  ;;  %v8039_v47 = vld [vmem:[#allocation93_spill] sm:$0xff]  ;;  %v8041_v1 = vld [vmem:[#allocation96_spill] sm:$0xff] }
 0x2ac   :  { %8032 = vst [vmem:[#allocation72_spill] sm:$0xff] %v5492_v27  ;;  %8034 = vst [vmem:[#allocation77_spill] sm:$0xff] %v5496_v22  ;;  %v5508_v56 = vmul.f32 %v5214_v30, %v8039_v47  ;;  %v5512_v8 = vmul.f32 %v5214_v30, %v8041_v1  ;;  %v8043_v27 = vld [vmem:[#allocation92_spill] sm:$0xff]  ;;  %v8045_v22 = vld [vmem:[#allocation94_spill] sm:$0xff] }
 0x2ad   :  { %8036 = vst [vmem:[#allocation80_spill] sm:$0xff] %v5500_v28  ;;  %8038 = vst [vmem:[#allocation75_spill] sm:$0xff] %v5504_v19  ;;  %v5516_v54 = vmul.f32 %v8043_v27, %v5214_v30  ;;  %v5520_v33 = vmul.f32 %v8045_v22, %v5214_v30  ;;  %v8047_v28 = vld [vmem:[#allocation98_spill] sm:$0xff]  ;;  %v8049_v19 = vld [vmem:[#allocation101_spill] sm:$0xff] }
 0x2ae   :  { %8040 = vst [vmem:[#allocation78_spill] sm:$0xff] %v5508_v56  ;;  %8042 = vst [vmem:[#allocation83_spill] sm:$0xff] %v5512_v8  ;;  %v5524_v62 = vmul.f32 %v5214_v30, %v8047_v28  ;;  %v5528_v47 = vmul.f32 %v5214_v30, %v8049_v19  ;;  %v8051_v56 = vld [vmem:[#allocation97_spill] sm:$0xff]  ;;  %v8053_v8 = vld [vmem:[#allocation99_spill] sm:$0xff] }
 0x2af   :  { %8044 = vst [vmem:[#allocation86_spill] sm:$0xff] %v5516_v54  ;;  %8046 = vst [vmem:[#allocation81_spill] sm:$0xff] %v5520_v33  ;;  %v5532_v1 = vmul.f32 %v8051_v56, %v5214_v30  ;;  %v5536_v27 = vmul.f32 %v8053_v8, %v5214_v30  ;;  %v8055_v54 = vld [vmem:[#allocation104_spill] sm:$0xff]  ;;  %v8057_v33 = vld [vmem:[#allocation107_spill] sm:$0xff] }
 0x2b0   :  { %8048 = vst [vmem:[#allocation84_spill] sm:$0xff] %v5524_v62  ;;  %8050 = vst [vmem:[#allocation88_spill] sm:$0xff] %v5528_v47  ;;  %v5540_v22 = vmul.f32 %v5214_v30, %v8055_v54  ;;  %v5544_v28 = vmul.f32 %v5214_v30, %v8057_v33  ;;  %v8059_v62 = vld [vmem:[#allocation102_spill] sm:$0xff]  ;;  %v8061_v47 = vld [vmem:[#allocation105_spill] sm:$0xff] }
 0x2b1   :  { %8052 = vst [vmem:[#allocation91_spill] sm:$0xff] %v5532_v1  ;;  %8054 = vst [vmem:[#allocation87_spill] sm:$0xff] %v5536_v27  ;;  %v5548_v19 = vmul.f32 %v8059_v62, %v5214_v30  ;;  %v5552_v56 = vmul.f32 %v8061_v47, %v5214_v30  ;;  %v8063_v1 = vld [vmem:[#allocation110_spill] sm:$0xff]  ;;  %v8065_v27 = vld [vmem:[#allocation113_spill] sm:$0xff] }
 0x2b2   :  { %8056 = vst [vmem:[#allocation89_spill] sm:$0xff] %v5540_v22  ;;  %8058 = vst [vmem:[#allocation93_spill] sm:$0xff] %v5544_v28  ;;  %v5556_v8 = vmul.f32 %v5214_v30, %v8063_v1  ;;  %v5560_v54 = vmul.f32 %v5214_v30, %v8065_v27  ;;  %v8067_v22 = vld [vmem:[#allocation108_spill] sm:$0xff]  ;;  %v8069_v28 = vld [vmem:[#allocation111_spill] sm:$0xff] }
 0x2b3   :  { %8060 = vst [vmem:[#allocation96_spill] sm:$0xff] %v5548_v19  ;;  %8062 = vst [vmem:[#allocation92_spill] sm:$0xff] %v5552_v56  ;;  %v5564_v33 = vmul.f32 %v8067_v22, %v5214_v30  ;;  %v5568_v62 = vmul.f32 %v8069_v28, %v5214_v30  ;;  %v8071_v19 = vld [vmem:[#allocation116_spill] sm:$0xff]  ;;  %v8073_v56 = vld [vmem:[#allocation119_spill] sm:$0xff] }
 0x2b4   :  { %8064 = vst [vmem:[#allocation94_spill] sm:$0xff] %v5556_v8  ;;  %8066 = vst [vmem:[#allocation98_spill] sm:$0xff] %v5560_v54  ;;  %v5572_v47 = vmul.f32 %v5214_v30, %v8071_v19  ;;  %v5576_v1 = vmul.f32 %v5214_v30, %v8073_v56  ;;  %v8075_v8 = vld [vmem:[#allocation114_spill] sm:$0xff]  ;;  %v8077_v54 = vld [vmem:[#allocation117_spill] sm:$0xff] }
 0x2b5   :  { %8068 = vst [vmem:[#allocation101_spill] sm:$0xff] %v5564_v33  ;;  %8070 = vst [vmem:[#allocation97_spill] sm:$0xff] %v5568_v62  ;;  %v5580_v27 = vmul.f32 %v8075_v8, %v5214_v30  ;;  %v5584_v22 = vmul.f32 %v8077_v54, %v5214_v30  ;;  %v8079_v33 = vld [vmem:[#allocation122_spill] sm:$0xff]  ;;  %v8080_v62 = vld [vmem:[#allocation125_spill] sm:$0xff] }
 0x2b6   :  { %8072 = vst [vmem:[#allocation99_spill] sm:$0xff] %v5572_v47  ;;  %8074 = vst [vmem:[#allocation104_spill] sm:$0xff] %v5576_v1  ;;  %v5588_v28 = vmul.f32 %v5214_v30, %v8079_v33  ;;  %v5592_v19 = vmul.f32 %v5214_v30, %v8080_v62  ;;  %v8081_v47 = vld [vmem:[#allocation120_spill] sm:$0xff]  ;;  %v8083_v1 = vld [vmem:[#allocation123_spill] sm:$0xff]  ;;  %v5612_v62 = vmul.f32 %v4769_v43, %v5214_v30 }
 0x2b7   :  { %8076 = vst [vmem:[#allocation107_spill] sm:$0xff] %v5580_v27  ;;  %8078 = vst [vmem:[#allocation102_spill] sm:$0xff] %v5584_v22  ;;  %v5596_v56 = vmul.f32 %v8081_v47, %v5214_v30  ;;  %v5600_v8 = vmul.f32 %v8083_v1, %v5214_v30  ;;  %v8085_v27 = vld [vmem:[#allocation127_spill] sm:$0xff]  ;;  %v8086_v22 = vld [vmem:[#allocation129_spill] sm:$0xff]  ;;  %v5616_v47 = vmul.f32 %v4781_v25, %v5214_v30 }
 0x2b8   :  { %v5604_v54 = vmul.f32 %v5214_v30, %v8085_v27  ;;  %v5608_v33 = vmul.f32 %v5214_v30, %v8086_v22  ;;  %8087 = vst [vmem:[#allocation113_spill] sm:$0xff] %v5612_v62  ;;  %v5628_v22 = vmul.f32 %v4359_v13, %v5214_v30  ;;  %v5632_v43 = vmul.f32 %v4374_v35, %v5214_v30  ;;  %v8093_v62 = vld [vmem:[#allocation43_spill] sm:$0xff] }
 0x2b9   :  { %8082 = vst [vmem:[#allocation105_spill] sm:$0xff] %v5596_v56  ;;  %8084 = vst [vmem:[#allocation110_spill] sm:$0xff] %v5600_v8  ;;  %v8089_v56 = vld [vmem:[#allocation37_spill] sm:$0xff]  ;;  %v8090_v8 = vld [vmem:[#allocation40_spill] sm:$0xff]  ;;  %v5636_v25 = vmul.f32 %v5214_v30, %v8093_v62  ;;  %v5648_v13 = vmul.f32 %v4402_v14, %v5214_v30 }
 0x2ba   :  { %8088 = vst [vmem:[#allocation108_spill] sm:$0xff] %v5616_v47  ;;  %v5620_v1 = vmul.f32 %v5214_v30, %v8089_v56  ;;  %v5624_v27 = vmul.f32 %v5214_v30, %v8090_v8  ;;  %8091 = vst [vmem:[#allocation111_spill] sm:$0xff] %v5628_v22  ;;  %v8094_v47 = vld [vmem:[#allocation46_spill] sm:$0xff]  ;;  %v5644_v8 = vmul.f32 %v4388_v55, %v5214_v30  ;;  %v8097_v22 = vld [vmem:[#allocation49_spill] sm:$0xff] }
 0x2bb   :  { %8092 = vst [vmem:[#allocation116_spill] sm:$0xff] %v5632_v43  ;;  %v5640_v56 = vmul.f32 %v5214_v30, %v8094_v47  ;;  %8096 = vst [vmem:[#allocation114_spill] sm:$0xff] %v5648_v13  ;;  %v5652_v35 = vmul.f32 %v5214_v30, %v8097_v22  ;;  %v8098_v43 = vld [vmem:[#allocation52_spill] sm:$0xff]  ;;  %v5660_v47 = vmul.f32 %v4416_v49, %v5214_v30  ;;  %v8102_v13 = vld [vmem:[#allocation58_spill] sm:$0xff] }
 0x2bc   :  { %8095 = vst [vmem:[#allocation119_spill] sm:$0xff] %v5644_v8  ;;  %v5656_v62 = vmul.f32 %v5214_v30, %v8098_v43  ;;  %v5664_v55 = vmul.f32 %v4430_v23, %v5214_v30  ;;  %v8101_v8 = vld [vmem:[#allocation55_spill] sm:$0xff]  ;;  %v5672_v22 = vmul.f32 %v5214_v30, %v8102_v13  ;;  %v5676_v43 = vmul.f32 %v4444_v0, %v5214_v30 }
 0x2bd   :  { %8099 = vst [vmem:[#allocation117_spill] sm:$0xff] %v5660_v47  ;;  %v5668_v14 = vmul.f32 %v5214_v30, %v8101_v8  ;;  %v5680_v49 = vmul.f32 %v4458_v26, %v5214_v30  ;;  %v8105_v47 = vld [vmem:[#allocation61_spill] sm:$0xff]  ;;  %v5692_v13 = vmul.f32 %v4472_v63, %v5214_v30  ;;  %v5696_v0 = vmul.f32 %v4486_v40, %v5214_v30 }
 0x2be   :  { %8100 = vst [vmem:[#allocation122_spill] sm:$0xff] %v5664_v55  ;;  %8103 = vst [vmem:[#allocation125_spill] sm:$0xff] %v5676_v43  ;;  %v5684_v23 = vmul.f32 %v5214_v30, %v8105_v47  ;;  %v8106_v55 = vld [vmem:[#allocation64_spill] sm:$0xff]  ;;  %v8109_v43 = vld [vmem:[#allocation67_spill] sm:$0xff]  ;;  %v5712_v63 = vmul.f32 %v4514_v58, %v5214_v30 }
 0x2bf   :  { %8104 = vst [vmem:[#allocation120_spill] sm:$0xff] %v5680_v49  ;;  %v5688_v8 = vmul.f32 %v5214_v30, %v8106_v55  ;;  %8107 = vst [vmem:[#allocation123_spill] sm:$0xff] %v5692_v13  ;;  %v5700_v26 = vmul.f32 %v5214_v30, %v8109_v43  ;;  %v8110_v49 = vld [vmem:[#allocation70_spill] sm:$0xff]  ;;  %v5708_v55 = vmul.f32 %v4500_v18, %v5214_v30  ;;  %v8113_v13 = vld [vmem:[#allocation73_spill] sm:$0xff] }
 0x2c0   :  { %8108 = vst [vmem:[#allocation127_spill] sm:$0xff] %v5696_v0  ;;  %v5704_v47 = vmul.f32 %v5214_v30, %v8110_v49  ;;  %8112 = vst [vmem:[#allocation37_spill] sm:$0xff] %v5712_v63  ;;  %v5716_v40 = vmul.f32 %v5214_v30, %v8113_v13  ;;  %v8114_v0 = vld [vmem:[#allocation76_spill] sm:$0xff]  ;;  %v5724_v49 = vmul.f32 %v4528_v36, %v5214_v30  ;;  %v8118_v63 = vld [vmem:[#allocation82_spill] sm:$0xff] }
 0x2c1   :  { %8111 = vst [vmem:[#allocation129_spill] sm:$0xff] %v5708_v55  ;;  %v5720_v43 = vmul.f32 %v5214_v30, %v8114_v0  ;;  %v5728_v18 = vmul.f32 %v4542_v17, %v5214_v30  ;;  %v8117_v55 = vld [vmem:[#allocation79_spill] sm:$0xff]  ;;  %v5736_v13 = vmul.f32 %v5214_v30, %v8118_v63  ;;  %v5740_v0 = vmul.f32 %v4556_v51, %v5214_v30 }
 0x2c2   :  { %8115 = vst [vmem:[#allocation40_spill] sm:$0xff] %v5724_v49  ;;  %v5732_v58 = vmul.f32 %v5214_v30, %v8117_v55  ;;  %v5744_v36 = vmul.f32 %v4570_v42, %v5214_v30  ;;  %v8121_v49 = vld [vmem:[#allocation85_spill] sm:$0xff]  ;;  %v5756_v63 = vmul.f32 %v4584_v48, %v5214_v30  ;;  %v5760_v51 = vmul.f32 %v4603_v59, %v5214_v30 }
 0x2c3   :  { %8116 = vst [vmem:[#allocation43_spill] sm:$0xff] %v5728_v18  ;;  %8119 = vst [vmem:[#allocation46_spill] sm:$0xff] %v5740_v0  ;;  %v5748_v17 = vmul.f32 %v5214_v30, %v8121_v49  ;;  %v8122_v18 = vld [vmem:[#allocation90_spill] sm:$0xff]  ;;  %v8125_v0 = vld [vmem:[#allocation95_spill] sm:$0xff]  ;;  %v5776_v48 = vmul.f32 %v4651_v15, %v5214_v30 }
 0x2c4   :  { %8120 = vst [vmem:[#allocation49_spill] sm:$0xff] %v5744_v36  ;;  %v5752_v55 = vmul.f32 %v5214_v30, %v8122_v18  ;;  %8123 = vst [vmem:[#allocation52_spill] sm:$0xff] %v5756_v63  ;;  %v5764_v42 = vmul.f32 %v5214_v30, %v8125_v0  ;;  %v8127_v36 = vld [vmem:[#allocation100_spill] sm:$0xff]  ;;  %v5772_v18 = vmul.f32 %v4627_v50, %v5214_v30  ;;  %v8131_v63 = vld [vmem:[#allocation106_spill] sm:$0xff] }
 0x2c5   :  { %8124 = vst [vmem:[#allocation55_spill] sm:$0xff] %v5760_v51  ;;  %v5768_v49 = vmul.f32 %v5214_v30, %v8127_v36  ;;  %8130 = vst [vmem:[#allocation67_spill] sm:$0xff] %v5776_v48  ;;  %v5780_v59 = vmul.f32 %v5214_v30, %v8131_v63  ;;  %v8133_v51 = vld [vmem:[#allocation112_spill] sm:$0xff] }
 0x2c6   :  { %8126 = vst [vmem:[#allocation58_spill] sm:$0xff] %v5764_v42  ;;  %8129 = vst [vmem:[#allocation64_spill] sm:$0xff] %v5772_v18  ;;  %v5784_v0 = vmul.f32 %v5214_v30, %v8133_v51  ;;  %v8135_v42 = vld [vmem:[#allocation103_spill] sm:$0xff]  ;;  %v8139_v18 = vld [vmem:[#allocation118_spill] sm:$0xff] }
 0x2c7   :  { %8128 = vst [vmem:[#allocation61_spill] sm:$0xff] %v5768_v49  ;;  %8132 = vst [vmem:[#allocation70_spill] sm:$0xff] %v5780_v59  ;;  %v5788_v36 = vmul.f32 %v8135_v42, %v5214_v30  ;;  %v8137_v49 = vld [vmem:[#allocation109_spill] sm:$0xff]  ;;  %v5796_v15 = vmul.f32 %v5214_v30, %v8139_v18  ;;  %v8140_v48 = vld [vmem:[#allocation124_spill] sm:$0xff] }
 0x2c8   :  { %8134 = vst [vmem:[#allocation73_spill] sm:$0xff] %v5784_v0  ;;  %v5792_v50 = vmul.f32 %v8137_v49, %v5214_v30  ;;  %v5800_v63 = vmul.f32 %v5214_v30, %v8140_v48  ;;  %v8141_v59 = vld [vmem:[#allocation115_spill] sm:$0xff]  ;;  %v8143_v0 = vld [vmem:[#allocation121_spill] sm:$0xff]  ;;  %v5820_v48 = vmul.f32 %v7882_v3, %v5214_v30  ;;  %v5840_v3 = vmul.f32 %v4825_v34, %v5214_v30 }
 0x2c9   :  { %8136 = vst [vmem:[#allocation76_spill] sm:$0xff] %v5788_v36  ;;  %v5804_v51 = vmul.f32 %v8141_v59, %v5214_v30  ;;  %v5808_v42 = vmul.f32 %v8143_v0, %v5214_v30  ;;  %v8145_v36 = vld [vmem:[#allocation128_spill] sm:$0xff]  ;;  %v5824_v59 = vmul.f32 %v7883_v6, %v5214_v30 }
 0x2ca   :  { %8138 = vst [vmem:[#allocation79_spill] sm:$0xff] %v5792_v50  ;;  %v5812_v49 = vmul.f32 %v5214_v30, %v8145_v36  ;;  %v8146_v50 = vld [vmem:[#allocation131_spill] sm:$0xff]  ;;  %8147 = vst [vmem:[#allocation90_spill] sm:$0xff] %v5820_v48  ;;  %v8153_v48 = vld [vmem:[#allocation134_spill] sm:$0xff] }
 0x2cb   :  { %8142 = vst [vmem:[#allocation82_spill] sm:$0xff] %v5804_v51  ;;  %8144 = vst [vmem:[#allocation85_spill] sm:$0xff] %v5808_v42  ;;  %v5816_v18 = vmul.f32 %v5214_v30, %v8146_v50  ;;  %v8149_v51 = vld [vmem:[#allocation132_spill] sm:$0xff]  ;;  %v8150_v42 = vld [vmem:[#allocation133_spill] sm:$0xff]  ;;  %v5836_v50 = vmul.f32 %v4809_v38, %v5214_v30  ;;  %v5844_v6 = vmul.f32 %v5214_v30, %v8153_v48 }
 0x2cc   :  { %8148 = vst [vmem:[#allocation95_spill] sm:$0xff] %v5824_v59  ;;  %v5828_v0 = vmul.f32 %v5214_v30, %v8149_v51  ;;  %v5832_v36 = vmul.f32 %v5214_v30, %v8150_v42  ;;  %8152 = vst [vmem:[#allocation106_spill] sm:$0xff] %v5840_v3  ;;  %v8154_v59 = vld [vmem:[#allocation135_spill] sm:$0xff]  ;;  %v5852_v42 = vmul.f32 %v4841_v45, %v5214_v30  ;;  %v8158_v3 = vld [vmem:[#allocation137_spill] sm:$0xff] }
 0x2cd   :  { %8151 = vst [vmem:[#allocation100_spill] sm:$0xff] %v5836_v50  ;;  %v5848_v51 = vmul.f32 %v5214_v30, %v8154_v59  ;;  %v5856_v38 = vmul.f32 %v4857_v31, %v5214_v30  ;;  %v8157_v50 = vld [vmem:[#allocation136_spill] sm:$0xff]  ;;  %v5864_v48 = vmul.f32 %v5214_v30, %v8158_v3  ;;  %v5868_v59 = vmul.f32 %v4873_v41, %v5214_v30 }
 0x2ce   :  { %8155 = vst [vmem:[#allocation112_spill] sm:$0xff] %v5852_v42  ;;  %v5860_v34 = vmul.f32 %v5214_v30, %v8157_v50  ;;  %v5872_v45 = vmul.f32 %v4889_v60, %v5214_v30  ;;  %v8161_v42 = vld [vmem:[#allocation138_spill] sm:$0xff]  ;;  %v5884_v3 = vmul.f32 %v4905_v7, %v5214_v30  ;;  %v5888_v41 = vmul.f32 %v4921_v20, %v5214_v30 }
 0x2cf   :  { %8156 = vst [vmem:[#allocation103_spill] sm:$0xff] %v5856_v38  ;;  %8159 = vst [vmem:[#allocation109_spill] sm:$0xff] %v5868_v59  ;;  %v5876_v31 = vmul.f32 %v5214_v30, %v8161_v42  ;;  %v8162_v38 = vld [vmem:[#allocation139_spill] sm:$0xff]  ;;  %v8165_v59 = vld [vmem:[#allocation140_spill] sm:$0xff]  ;;  %v5904_v7 = vmul.f32 %v4953_v21, %v5214_v30 }
 0x2d0   :  { %8160 = vst [vmem:[#allocation118_spill] sm:$0xff] %v5872_v45  ;;  %v5880_v50 = vmul.f32 %v5214_v30, %v8162_v38  ;;  %8163 = vst [vmem:[#allocation124_spill] sm:$0xff] %v5884_v3  ;;  %v5892_v60 = vmul.f32 %v5214_v30, %v8165_v59  ;;  %v8166_v45 = vld [vmem:[#allocation141_spill] sm:$0xff]  ;;  %v5900_v38 = vmul.f32 %v4937_v53, %v5214_v30  ;;  %v8169_v3 = vld [vmem:[#allocation142_spill] sm:$0xff] }
 0x2d1   :  { %8164 = vst [vmem:[#allocation115_spill] sm:$0xff] %v5888_v41  ;;  %v5896_v42 = vmul.f32 %v5214_v30, %v8166_v45  ;;  %8168 = vst [vmem:[#allocation128_spill] sm:$0xff] %v5904_v7  ;;  %v5908_v20 = vmul.f32 %v5214_v30, %v8169_v3  ;;  %v8170_v41 = vld [vmem:[#allocation143_spill] sm:$0xff]  ;;  %v5916_v45 = vmul.f32 %v4969_v24, %v5214_v30  ;;  %v8174_v7 = vld [vmem:[#allocation130_spill] sm:$0xff] }
 0x2d2   :  { %8167 = vst [vmem:[#allocation121_spill] sm:$0xff] %v5900_v38  ;;  %v5912_v59 = vmul.f32 %v5214_v30, %v8170_v41  ;;  %v5920_v53 = vmul.f32 %v4985_v11, %v5214_v30  ;;  %v8173_v38 = vld [vmem:[#allocation126_spill] sm:$0xff]  ;;  %v5928_v3 = vmul.f32 %v5214_v30, %v8174_v7  ;;  %v5932_v41 = vmul.f32 %v5001_v57, %v5214_v30 }
 0x2d3   :  { %8171 = vst [vmem:[#allocation131_spill] sm:$0xff] %v5916_v45  ;;  %v5924_v21 = vmul.f32 %v5214_v30, %v8173_v38  ;;  %v5936_v24 = vmul.f32 %v5017_v39, %v5214_v30  ;;  %v8178_v45 = vld [vmem:[#allocation144_spill] sm:$0xff]  ;;  %v5948_v7 = vmul.f32 %v5033_v9, %v5214_v30 }
 0x2d4   :  { %8172 = vst [vmem:[#allocation132_spill] sm:$0xff] %v5920_v53  ;;  %8175 = vst [vmem:[#allocation133_spill] sm:$0xff] %v5928_v3  ;;  %v5940_v11 = vmul.f32 %v5214_v30, %v8178_v45  ;;  %v8180_v53 = vld [vmem:[#allocation146_spill] sm:$0xff]  ;;  %v8183_v3 = vld [vmem:[#allocation145_spill] sm:$0xff] }
 0x2d5   :  { %8176 = vst [vmem:[#allocation134_spill] sm:$0xff] %v5932_v41  ;;  %8177 = vst [vmem:[#allocation135_spill] sm:$0xff] %v5936_v24  ;;  %v5944_v38 = vmul.f32 %v5214_v30, %v8180_v53  ;;  %v5952_v57 = vmul.f32 %v8183_v3, %v5214_v30  ;;  %v8185_v41 = vld [vmem:[#allocation148_spill] sm:$0xff]  ;;  %v8187_v24 = vld [vmem:[#allocation150_spill] sm:$0xff] }
 0x2d6   :  { %8179 = vst [vmem:[#allocation136_spill] sm:$0xff] %v5940_v11  ;;  %8182 = vst [vmem:[#allocation138_spill] sm:$0xff] %v5948_v7  ;;  %v5956_v39 = vmul.f32 %v5214_v30, %v8185_v41  ;;  %v5960_v45 = vmul.f32 %v5214_v30, %v8187_v24  ;;  %v8189_v11 = vld [vmem:[#allocation147_spill] sm:$0xff]  ;;  %v8193_v7 = vld [vmem:[#allocation152_spill] sm:$0xff] }
 0x2d7   :  { %8181 = vst [vmem:[#allocation137_spill] sm:$0xff] %v5944_v38  ;;  %8184 = vst [vmem:[#allocation139_spill] sm:$0xff] %v5952_v57  ;;  %v5964_v53 = vmul.f32 %v8189_v11, %v5214_v30  ;;  %v8191_v38 = vld [vmem:[#allocation149_spill] sm:$0xff]  ;;  %v5972_v3 = vmul.f32 %v5214_v30, %v8193_v7  ;;  %v8195_v57 = vld [vmem:[#allocation154_spill] sm:$0xff] }
 0x2d8   :  { %8186 = vst [vmem:[#allocation140_spill] sm:$0xff] %v5956_v39  ;;  %8188 = vst [vmem:[#allocation141_spill] sm:$0xff] %v5960_v45  ;;  %v5968_v9 = vmul.f32 %v8191_v38, %v5214_v30  ;;  %v5976_v41 = vmul.f32 %v5214_v30, %v8195_v57  ;;  %v8197_v39 = vld [vmem:[#allocation151_spill] sm:$0xff]  ;;  %v8199_v45 = vld [vmem:[#allocation153_spill] sm:$0xff] }
 0x2d9   :  { %8190 = vst [vmem:[#allocation142_spill] sm:$0xff] %v5964_v53  ;;  %8194 = vst [vmem:[#allocation126_spill] sm:$0xff] %v5972_v3  ;;  %v5980_v24 = vmul.f32 %v8197_v39, %v5214_v30  ;;  %v5984_v11 = vmul.f32 %v8199_v45, %v5214_v30  ;;  %v8201_v53 = vld [vmem:[#allocation156_spill] sm:$0xff]  ;;  %v8205_v3 = vld [vmem:[#allocation155_spill] sm:$0xff]  ;;  %v8209_v45 = vsub.f32 %v5208_v61, %v5210_v4 }
 0x2da   :  { %8192 = vst [vmem:[#allocation143_spill] sm:$0xff] %v5968_v9  ;;  %8196 = vst [vmem:[#allocation130_spill] sm:$0xff] %v5976_v41  ;;  %v5988_v38 = vmul.f32 %v5214_v30, %v8201_v53  ;;  %v8203_v9 = vld [vmem:[#allocation158_spill] sm:$0xff]  ;;  %v5996_v57 = vmul.f32 %v8205_v3, %v5214_v30  ;;  %v8207_v41 = vld [vmem:[#allocation157_spill] sm:$0xff] }
 0x2db   :  { %8198 = vst [vmem:[#allocation144_spill] sm:$0xff] %v5980_v24  ;;  %8200 = vst [vmem:[#allocation146_spill] sm:$0xff] %v5984_v11  ;;  %v5992_v7 = vmul.f32 %v5214_v30, %v8203_v9  ;;  %v6000_v39 = vmul.f32 %v8207_v41, %v5214_v30  ;;  %v8208_v24 = vsub.s32 0, %v5199_v32  ;;  %v8210_v53 = vld [vmem:[#allocation160_spill] sm:$0xff]  ;;  %v8211_v9 = vld [vmem:[#allocation161_spill] sm:$0xff]  ;;  %v6023_v32 = vmul.f32 %v5177_v16, %v5214_v30 }
 0x2dc   :  { %8202 = vst [vmem:[#allocation145_spill] sm:$0xff] %v5988_v38  ;;  %8206 = vst [vmem:[#allocation150_spill] sm:$0xff] %v5996_v57  ;;  %v6011_v38 = vmul.f32 %v5214_v30, %v8210_v53  ;;  %v8212_v3 = vld [vmem:[#allocation159_spill] sm:$0xff]  ;;  %v8226_v53 = vld [vmem:[#allocation2_spill] sm:$0xff] }
 0x2dd   :  { %8204 = vst [vmem:[#allocation148_spill] sm:$0xff] %v5992_v7  ;;  %v6007_v11 = vrot.slane %v8209_v45, %v8208_v24  ;;  %v6015_v7 = vmul.f32 %v5214_v30, %v8211_v9  ;;  %v6019_v57 = vmul.f32 %v8212_v3, %v5214_v30  ;;  %v8224_v45 = vld [vmem:[#allocation5_spill] sm:$0xff]  ;;  %v8228_v9 = vld [vmem:[#allocation4_spill] sm:$0xff]  ;;  %v8230_v3 = vld [vmem:[#allocation7_spill] sm:$0xff] }
 0x2df   :  { %v6027_v61 = vadd.f32 %v6007_v11, %v5220_v12  ;;  %v6031_v4 = vadd.f32 %v6007_v11, %v5224_v5  ;;  %v6035_v41 = vadd.f32 %v6007_v11, %v5228_v52  ;;  %v6039_v24 = vadd.f32 %v6007_v11, %v5232_v37  ;;  %v8222_v37 = vld [vmem:[#allocation3_spill] sm:$0xff] }
 0x2e0   :  { %v6043_v16 = vadd.f32 %v6007_v11, %v5236_v10  ;;  %v6047_v30 = vadd.f32 %v6007_v11, %v5240_v29  ;;  %v6051_v12 = vadd.f32 %v6007_v11, %v5244_v46  ;;  %v6055_v5 = vadd.f32 %v6007_v11, %v5248_v44 }
 0x2e1   :  { %8213 = vst [vmem:[#allocation147_spill] sm:$0xff] %v6027_v61  ;;  %8214 = vst [vmem:[#allocation149_spill] sm:$0xff] %v6031_v4  ;;  %v6059_v52 = vadd.f32 %v6007_v11, %v5252_v2  ;;  %v6063_v10 = vadd.f32 %v6007_v11, %v8222_v37  ;;  %v6067_v29 = vadd.f32 %v6007_v11, %v8224_v45 }
 0x2e2   :  { %8215 = vst [vmem:[#allocation152_spill] sm:$0xff] %v6035_v41  ;;  %8216 = vst [vmem:[#allocation154_spill] sm:$0xff] %v6039_v24  ;;  %v6071_v46 = vadd.f32 %v6007_v11, %v8226_v53  ;;  %v6075_v44 = vadd.f32 %v6007_v11, %v8228_v9  ;;  %v6079_v2 = vadd.f32 %v6007_v11, %v8230_v3 }
 0x2e3   :  { %8217 = vst [vmem:[#allocation151_spill] sm:$0xff] %v6043_v16  ;;  %8218 = vst [vmem:[#allocation153_spill] sm:$0xff] %v6047_v30  ;;  %v8320_v30 = vld [vmem:[#allocation62_spill] sm:$0xff]  ;;  %v8322_v16 = vld [vmem:[#allocation57_spill] sm:$0xff] }
 0x2e4   :  { %8219 = vst [vmem:[#allocation156_spill] sm:$0xff] %v6051_v12  ;;  %8220 = vst [vmem:[#allocation158_spill] sm:$0xff] %v6055_v5  ;;  %v8316_v5 = vld [vmem:[#allocation54_spill] sm:$0xff]  ;;  %v8318_v12 = vld [vmem:[#allocation59_spill] sm:$0xff] }
 0x2e5   :  { %8221 = vst [vmem:[#allocation155_spill] sm:$0xff] %v6059_v52  ;;  %8223 = vst [vmem:[#allocation157_spill] sm:$0xff] %v6063_v10  ;;  %v8232_v52 = vld [vmem:[#allocation9_spill] sm:$0xff]  ;;  %v8234_v10 = vld [vmem:[#allocation6_spill] sm:$0xff] }
 0x2e6   :  { %8225 = vst [vmem:[#allocation160_spill] sm:$0xff] %v6067_v29  ;;  %8227 = vst [vmem:[#allocation161_spill] sm:$0xff] %v6071_v46  ;;  %v6083_v37 = vadd.f32 %v6007_v11, %v8232_v52  ;;  %v6087_v45 = vadd.f32 %v6007_v11, %v8234_v10  ;;  %v8236_v29 = vld [vmem:[#allocation8_spill] sm:$0xff]  ;;  %v8238_v46 = vld [vmem:[#allocation11_spill] sm:$0xff] }
 0x2e7   :  { %8229 = vst [vmem:[#allocation159_spill] sm:$0xff] %v6075_v44  ;;  %8231 = vst [vmem:[#allocation3_spill] sm:$0xff] %v6079_v2  ;;  %v6091_v53 = vadd.f32 %v6007_v11, %v8236_v29  ;;  %v6095_v9 = vadd.f32 %v6007_v11, %v8238_v46  ;;  %v8240_v44 = vld [vmem:[#allocation13_spill] sm:$0xff]  ;;  %v8242_v2 = vld [vmem:[#allocation10_spill] sm:$0xff] }
 0x2e8   :  { %8233 = vst [vmem:[#allocation5_spill] sm:$0xff] %v6083_v37  ;;  %8235 = vst [vmem:[#allocation2_spill] sm:$0xff] %v6087_v45  ;;  %v6099_v3 = vadd.f32 %v6007_v11, %v8240_v44  ;;  %v6103_v52 = vadd.f32 %v6007_v11, %v8242_v2  ;;  %v8244_v37 = vld [vmem:[#allocation12_spill] sm:$0xff]  ;;  %v8246_v45 = vld [vmem:[#allocation15_spill] sm:$0xff] }
 0x2e9   :  { %8237 = vst [vmem:[#allocation4_spill] sm:$0xff] %v6091_v53  ;;  %8239 = vst [vmem:[#allocation7_spill] sm:$0xff] %v6095_v9  ;;  %v6107_v10 = vadd.f32 %v6007_v11, %v8244_v37  ;;  %v6111_v29 = vadd.f32 %v6007_v11, %v8246_v45  ;;  %v8248_v53 = vld [vmem:[#allocation17_spill] sm:$0xff]  ;;  %v8250_v9 = vld [vmem:[#allocation14_spill] sm:$0xff] }
 0x2ea   :  { %8241 = vst [vmem:[#allocation9_spill] sm:$0xff] %v6099_v3  ;;  %8243 = vst [vmem:[#allocation6_spill] sm:$0xff] %v6103_v52  ;;  %v6115_v46 = vadd.f32 %v6007_v11, %v8248_v53  ;;  %v6119_v44 = vadd.f32 %v6007_v11, %v8250_v9  ;;  %v8252_v3 = vld [vmem:[#allocation16_spill] sm:$0xff]  ;;  %v8254_v52 = vld [vmem:[#allocation19_spill] sm:$0xff] }
 0x2eb   :  { %8245 = vst [vmem:[#allocation8_spill] sm:$0xff] %v6107_v10  ;;  %8247 = vst [vmem:[#allocation11_spill] sm:$0xff] %v6111_v29  ;;  %v6123_v2 = vadd.f32 %v6007_v11, %v8252_v3  ;;  %v6127_v37 = vadd.f32 %v6007_v11, %v8254_v52  ;;  %v8256_v10 = vld [vmem:[#allocation21_spill] sm:$0xff]  ;;  %v8258_v29 = vld [vmem:[#allocation18_spill] sm:$0xff] }
 0x2ec   :  { %8249 = vst [vmem:[#allocation13_spill] sm:$0xff] %v6115_v46  ;;  %8251 = vst [vmem:[#allocation10_spill] sm:$0xff] %v6119_v44  ;;  %v6131_v45 = vadd.f32 %v6007_v11, %v8256_v10  ;;  %v6135_v53 = vadd.f32 %v6007_v11, %v8258_v29  ;;  %v8260_v46 = vld [vmem:[#allocation20_spill] sm:$0xff]  ;;  %v8262_v44 = vld [vmem:[#allocation23_spill] sm:$0xff] }
 0x2ed   :  { %8253 = vst [vmem:[#allocation12_spill] sm:$0xff] %v6123_v2  ;;  %8255 = vst [vmem:[#allocation15_spill] sm:$0xff] %v6127_v37  ;;  %v6139_v9 = vadd.f32 %v6007_v11, %v8260_v46  ;;  %v6143_v3 = vadd.f32 %v6007_v11, %v8262_v44  ;;  %v8264_v2 = vld [vmem:[#allocation25_spill] sm:$0xff]  ;;  %v8266_v37 = vld [vmem:[#allocation22_spill] sm:$0xff] }
 0x2ee   :  { %8257 = vst [vmem:[#allocation17_spill] sm:$0xff] %v6131_v45  ;;  %8259 = vst [vmem:[#allocation14_spill] sm:$0xff] %v6135_v53  ;;  %v6147_v52 = vadd.f32 %v6007_v11, %v8264_v2  ;;  %v6151_v10 = vadd.f32 %v6007_v11, %v8266_v37  ;;  %v8268_v45 = vld [vmem:[#allocation24_spill] sm:$0xff]  ;;  %v8270_v53 = vld [vmem:[#allocation27_spill] sm:$0xff] }
 0x2ef   :  { %8261 = vst [vmem:[#allocation16_spill] sm:$0xff] %v6139_v9  ;;  %8263 = vst [vmem:[#allocation19_spill] sm:$0xff] %v6143_v3  ;;  %v6155_v29 = vadd.f32 %v6007_v11, %v8268_v45  ;;  %v6159_v46 = vadd.f32 %v6007_v11, %v8270_v53  ;;  %v8272_v9 = vld [vmem:[#allocation29_spill] sm:$0xff]  ;;  %v8274_v3 = vld [vmem:[#allocation26_spill] sm:$0xff] }
 0x2f0   :  { %8265 = vst [vmem:[#allocation21_spill] sm:$0xff] %v6147_v52  ;;  %8267 = vst [vmem:[#allocation18_spill] sm:$0xff] %v6151_v10  ;;  %v6163_v44 = vadd.f32 %v6007_v11, %v8272_v9  ;;  %v6167_v2 = vadd.f32 %v6007_v11, %v8274_v3  ;;  %v8276_v52 = vld [vmem:[#allocation28_spill] sm:$0xff]  ;;  %v8278_v10 = vld [vmem:[#allocation31_spill] sm:$0xff] }
 0x2f1   :  { %8269 = vst [vmem:[#allocation20_spill] sm:$0xff] %v6155_v29  ;;  %8271 = vst [vmem:[#allocation23_spill] sm:$0xff] %v6159_v46  ;;  %v6171_v37 = vadd.f32 %v6007_v11, %v8276_v52  ;;  %v6175_v45 = vadd.f32 %v6007_v11, %v8278_v10  ;;  %v8280_v29 = vld [vmem:[#allocation33_spill] sm:$0xff]  ;;  %v8282_v46 = vld [vmem:[#allocation30_spill] sm:$0xff] }
 0x2f2   :  { %8273 = vst [vmem:[#allocation25_spill] sm:$0xff] %v6163_v44  ;;  %8275 = vst [vmem:[#allocation22_spill] sm:$0xff] %v6167_v2  ;;  %v6179_v53 = vadd.f32 %v6007_v11, %v8280_v29  ;;  %v6183_v9 = vadd.f32 %v6007_v11, %v8282_v46  ;;  %v8284_v44 = vld [vmem:[#allocation32_spill] sm:$0xff]  ;;  %v8286_v2 = vld [vmem:[#allocation35_spill] sm:$0xff] }
 0x2f3   :  { %8277 = vst [vmem:[#allocation24_spill] sm:$0xff] %v6171_v37  ;;  %8279 = vst [vmem:[#allocation27_spill] sm:$0xff] %v6175_v45  ;;  %v6187_v3 = vadd.f32 %v6007_v11, %v8284_v44  ;;  %v6191_v52 = vadd.f32 %v6007_v11, %v8286_v2  ;;  %v8288_v37 = vld [vmem:[#allocation38_spill] sm:$0xff] }
 0x2f4   :  { %8281 = vst [vmem:[#allocation29_spill] sm:$0xff] %v6179_v53  ;;  %8283 = vst [vmem:[#allocation26_spill] sm:$0xff] %v6183_v9  ;;  %v6195_v10 = vadd.f32 %v6007_v11, %v8288_v37  ;;  %v8290_v45 = vld [vmem:[#allocation34_spill] sm:$0xff]  ;;  %v8292_v53 = vld [vmem:[#allocation36_spill] sm:$0xff] }
 0x2f5   :  { %8285 = vst [vmem:[#allocation28_spill] sm:$0xff] %v6187_v3  ;;  %8287 = vst [vmem:[#allocation31_spill] sm:$0xff] %v6191_v52  ;;  %v6199_v29 = vadd.f32 %v6007_v11, %v8290_v45  ;;  %v6203_v46 = vadd.f32 %v6007_v11, %v8292_v53  ;;  %v8294_v9 = vld [vmem:[#allocation41_spill] sm:$0xff]  ;;  %v8296_v3 = vld [vmem:[#allocation44_spill] sm:$0xff] }
 0x2f6   :  { %8289 = vst [vmem:[#allocation33_spill] sm:$0xff] %v6195_v10  ;;  %v6207_v44 = vadd.f32 %v6007_v11, %v8294_v9  ;;  %v6211_v2 = vadd.f32 %v6007_v11, %v8296_v3  ;;  %v8298_v52 = vld [vmem:[#allocation39_spill] sm:$0xff]  ;;  %v8300_v10 = vld [vmem:[#allocation42_spill] sm:$0xff] }
 0x2f7   :  { %8291 = vst [vmem:[#allocation30_spill] sm:$0xff] %v6199_v29  ;;  %8293 = vst [vmem:[#allocation32_spill] sm:$0xff] %v6203_v46  ;;  %v6215_v37 = vadd.f32 %v6007_v11, %v8298_v52  ;;  %v6219_v45 = vadd.f32 %v6007_v11, %v8300_v10  ;;  %v8302_v29 = vld [vmem:[#allocation47_spill] sm:$0xff]  ;;  %v8304_v46 = vld [vmem:[#allocation50_spill] sm:$0xff] }
 0x2f8   :  { %8295 = vst [vmem:[#allocation35_spill] sm:$0xff] %v6207_v44  ;;  %8297 = vst [vmem:[#allocation38_spill] sm:$0xff] %v6211_v2  ;;  %v6223_v53 = vadd.f32 %v6007_v11, %v8302_v29  ;;  %v6227_v9 = vadd.f32 %v6007_v11, %v8304_v46  ;;  %v8306_v44 = vld [vmem:[#allocation45_spill] sm:$0xff]  ;;  %v8308_v2 = vld [vmem:[#allocation48_spill] sm:$0xff] }
 0x2f9   :  { %8299 = vst [vmem:[#allocation34_spill] sm:$0xff] %v6215_v37  ;;  %8301 = vst [vmem:[#allocation36_spill] sm:$0xff] %v6219_v45  ;;  %v6231_v3 = vadd.f32 %v6007_v11, %v8306_v44  ;;  %v6235_v52 = vadd.f32 %v6007_v11, %v8308_v2  ;;  %v8310_v37 = vld [vmem:[#allocation53_spill] sm:$0xff]  ;;  %v8312_v45 = vld [vmem:[#allocation56_spill] sm:$0xff]  ;;  %v6251_v44 = vadd.f32 %v6007_v11, %v8316_v5 }
 0x2fa   :  { %8303 = vst [vmem:[#allocation41_spill] sm:$0xff] %v6223_v53  ;;  %8305 = vst [vmem:[#allocation44_spill] sm:$0xff] %v6227_v9  ;;  %v6239_v10 = vadd.f32 %v6007_v11, %v8310_v37  ;;  %v6243_v29 = vadd.f32 %v6007_v11, %v8312_v45  ;;  %v8314_v53 = vld [vmem:[#allocation51_spill] sm:$0xff]  ;;  %v6255_v2 = vadd.f32 %v6007_v11, %v8318_v12 }
 0x2fb   :  { %8307 = vst [vmem:[#allocation39_spill] sm:$0xff] %v6231_v3  ;;  %8309 = vst [vmem:[#allocation42_spill] sm:$0xff] %v6235_v52  ;;  %v6247_v46 = vadd.f32 %v6007_v11, %v8314_v53  ;;  %v6259_v37 = vadd.f32 %v6007_v11, %v8320_v30  ;;  %v6263_v45 = vadd.f32 %v6007_v11, %v8322_v16 }
 0x2fc   :  { %8311 = vst [vmem:[#allocation47_spill] sm:$0xff] %v6239_v10  ;;  %8313 = vst [vmem:[#allocation50_spill] sm:$0xff] %v6243_v29  ;;  %v8324_v29 = vld [vmem:[#allocation60_spill] sm:$0xff] }
 0x2fd   :  { %8315 = vst [vmem:[#allocation45_spill] sm:$0xff] %v6247_v46  ;;  %8317 = vst [vmem:[#allocation48_spill] sm:$0xff] %v6251_v44  ;;  %v6267_v53 = vadd.f32 %v6007_v11, %v8324_v29  ;;  %v8326_v46 = vld [vmem:[#allocation65_spill] sm:$0xff]  ;;  %v8328_v44 = vld [vmem:[#allocation68_spill] sm:$0xff] }
 0x2fe   :  { %8319 = vst [vmem:[#allocation53_spill] sm:$0xff] %v6255_v2  ;;  %8321 = vst [vmem:[#allocation56_spill] sm:$0xff] %v6259_v37  ;;  %v6271_v5 = vadd.f32 %v6007_v11, %v8326_v46  ;;  %v6275_v12 = vadd.f32 %v6007_v11, %v8328_v44  ;;  %v8330_v2 = vld [vmem:[#allocation63_spill] sm:$0xff]  ;;  %v8332_v37 = vld [vmem:[#allocation66_spill] sm:$0xff] }
 0x2ff   :  { %8323 = vst [vmem:[#allocation51_spill] sm:$0xff] %v6263_v45  ;;  %8325 = vst [vmem:[#allocation54_spill] sm:$0xff] %v6267_v53  ;;  %v6279_v30 = vadd.f32 %v6007_v11, %v8330_v2  ;;  %v6283_v16 = vadd.f32 %v6007_v11, %v8332_v37  ;;  %v8334_v45 = vld [vmem:[#allocation71_spill] sm:$0xff]  ;;  %v8336_v53 = vld [vmem:[#allocation74_spill] sm:$0xff] }
 0x300   :  { %8327 = vst [vmem:[#allocation59_spill] sm:$0xff] %v6271_v5  ;;  %8329 = vst [vmem:[#allocation62_spill] sm:$0xff] %v6275_v12  ;;  %v6287_v29 = vadd.f32 %v6007_v11, %v8334_v45  ;;  %v6291_v46 = vadd.f32 %v6007_v11, %v8336_v53  ;;  %v8338_v5 = vld [vmem:[#allocation69_spill] sm:$0xff]  ;;  %v8340_v12 = vld [vmem:[#allocation72_spill] sm:$0xff] }
 0x301   :  { %8331 = vst [vmem:[#allocation57_spill] sm:$0xff] %v6279_v30  ;;  %8333 = vst [vmem:[#allocation60_spill] sm:$0xff] %v6283_v16  ;;  %v6295_v44 = vadd.f32 %v6007_v11, %v8338_v5  ;;  %v6299_v2 = vadd.f32 %v6007_v11, %v8340_v12  ;;  %v8342_v30 = vld [vmem:[#allocation77_spill] sm:$0xff]  ;;  %v8344_v16 = vld [vmem:[#allocation80_spill] sm:$0xff] }
 0x302   :  { %8335 = vst [vmem:[#allocation65_spill] sm:$0xff] %v6287_v29  ;;  %8337 = vst [vmem:[#allocation68_spill] sm:$0xff] %v6291_v46  ;;  %v6303_v37 = vadd.f32 %v6007_v11, %v8342_v30  ;;  %v6307_v45 = vadd.f32 %v6007_v11, %v8344_v16  ;;  %v8346_v29 = vld [vmem:[#allocation75_spill] sm:$0xff]  ;;  %v8348_v46 = vld [vmem:[#allocation78_spill] sm:$0xff] }
 0x303   :  { %8339 = vst [vmem:[#allocation63_spill] sm:$0xff] %v6295_v44  ;;  %8341 = vst [vmem:[#allocation66_spill] sm:$0xff] %v6299_v2  ;;  %v6311_v53 = vadd.f32 %v6007_v11, %v8346_v29  ;;  %v6315_v5 = vadd.f32 %v6007_v11, %v8348_v46  ;;  %v8350_v44 = vld [vmem:[#allocation83_spill] sm:$0xff]  ;;  %v8352_v2 = vld [vmem:[#allocation86_spill] sm:$0xff] }
 0x304   :  { %8343 = vst [vmem:[#allocation71_spill] sm:$0xff] %v6303_v37  ;;  %8345 = vst [vmem:[#allocation74_spill] sm:$0xff] %v6307_v45  ;;  %v6319_v12 = vadd.f32 %v6007_v11, %v8350_v44  ;;  %v6323_v30 = vadd.f32 %v6007_v11, %v8352_v2  ;;  %v8354_v37 = vld [vmem:[#allocation81_spill] sm:$0xff]  ;;  %v8356_v45 = vld [vmem:[#allocation84_spill] sm:$0xff] }
 0x305   :  { %8347 = vst [vmem:[#allocation69_spill] sm:$0xff] %v6311_v53  ;;  %8349 = vst [vmem:[#allocation72_spill] sm:$0xff] %v6315_v5  ;;  %v6327_v16 = vadd.f32 %v6007_v11, %v8354_v37  ;;  %v6331_v29 = vadd.f32 %v6007_v11, %v8356_v45  ;;  %v8358_v53 = vld [vmem:[#allocation88_spill] sm:$0xff]  ;;  %v8360_v5 = vld [vmem:[#allocation91_spill] sm:$0xff] }
 0x306   :  { %8351 = vst [vmem:[#allocation77_spill] sm:$0xff] %v6319_v12  ;;  %8353 = vst [vmem:[#allocation80_spill] sm:$0xff] %v6323_v30  ;;  %v6335_v46 = vadd.f32 %v6007_v11, %v8358_v53  ;;  %v6339_v44 = vadd.f32 %v6007_v11, %v8360_v5  ;;  %v8362_v12 = vld [vmem:[#allocation87_spill] sm:$0xff]  ;;  %v8364_v30 = vld [vmem:[#allocation89_spill] sm:$0xff] }
 0x307   :  { %8355 = vst [vmem:[#allocation75_spill] sm:$0xff] %v6327_v16  ;;  %8357 = vst [vmem:[#allocation78_spill] sm:$0xff] %v6331_v29  ;;  %v6343_v2 = vadd.f32 %v6007_v11, %v8362_v12  ;;  %v6347_v37 = vadd.f32 %v6007_v11, %v8364_v30  ;;  %v8366_v16 = vld [vmem:[#allocation93_spill] sm:$0xff]  ;;  %v8368_v29 = vld [vmem:[#allocation96_spill] sm:$0xff] }
 0x308   :  { %8359 = vst [vmem:[#allocation83_spill] sm:$0xff] %v6335_v46  ;;  %8361 = vst [vmem:[#allocation86_spill] sm:$0xff] %v6339_v44  ;;  %v6351_v45 = vadd.f32 %v6007_v11, %v8366_v16  ;;  %v6355_v53 = vadd.f32 %v6007_v11, %v8368_v29  ;;  %v8370_v46 = vld [vmem:[#allocation92_spill] sm:$0xff]  ;;  %v8372_v44 = vld [vmem:[#allocation94_spill] sm:$0xff] }
 0x309   :  { %8363 = vst [vmem:[#allocation81_spill] sm:$0xff] %v6343_v2  ;;  %8365 = vst [vmem:[#allocation84_spill] sm:$0xff] %v6347_v37  ;;  %v6359_v5 = vadd.f32 %v6007_v11, %v8370_v46  ;;  %v6363_v12 = vadd.f32 %v6007_v11, %v8372_v44  ;;  %v8374_v2 = vld [vmem:[#allocation98_spill] sm:$0xff]  ;;  %v8376_v37 = vld [vmem:[#allocation101_spill] sm:$0xff] }
 0x30a   :  { %8367 = vst [vmem:[#allocation88_spill] sm:$0xff] %v6351_v45  ;;  %8369 = vst [vmem:[#allocation91_spill] sm:$0xff] %v6355_v53  ;;  %v6367_v30 = vadd.f32 %v6007_v11, %v8374_v2  ;;  %v6371_v16 = vadd.f32 %v6007_v11, %v8376_v37  ;;  %v8378_v45 = vld [vmem:[#allocation97_spill] sm:$0xff]  ;;  %v8380_v53 = vld [vmem:[#allocation99_spill] sm:$0xff] }
 0x30b   :  { %8371 = vst [vmem:[#allocation87_spill] sm:$0xff] %v6359_v5  ;;  %8373 = vst [vmem:[#allocation89_spill] sm:$0xff] %v6363_v12  ;;  %v6375_v29 = vadd.f32 %v6007_v11, %v8378_v45  ;;  %v6379_v46 = vadd.f32 %v6007_v11, %v8380_v53  ;;  %v8382_v5 = vld [vmem:[#allocation104_spill] sm:$0xff]  ;;  %v8384_v12 = vld [vmem:[#allocation107_spill] sm:$0xff]  ;;  %v6395_v45 = vadd.f32 %v6007_v11, %v5588_v28 }
 0x30c   :  { %8375 = vst [vmem:[#allocation93_spill] sm:$0xff] %v6367_v30  ;;  %8377 = vst [vmem:[#allocation96_spill] sm:$0xff] %v6371_v16  ;;  %v6383_v44 = vadd.f32 %v6007_v11, %v8382_v5  ;;  %v6387_v2 = vadd.f32 %v6007_v11, %v8384_v12  ;;  %v8386_v30 = vld [vmem:[#allocation102_spill] sm:$0xff]  ;;  %v6399_v53 = vadd.f32 %v6007_v11, %v5592_v19 }
 0x30d   :  { %8379 = vst [vmem:[#allocation92_spill] sm:$0xff] %v6375_v29  ;;  %8381 = vst [vmem:[#allocation94_spill] sm:$0xff] %v6379_v46  ;;  %v6391_v37 = vadd.f32 %v6007_v11, %v8386_v30  ;;  %v8390_v46 = vld [vmem:[#allocation105_spill] sm:$0xff]  ;;  %v6411_v30 = vadd.f32 %v6007_v11, %v5604_v54  ;;  %v6415_v28 = vadd.f32 %v6007_v11, %v5608_v33 }
 0x30e   :  { %8383 = vst [vmem:[#allocation98_spill] sm:$0xff] %v6383_v44  ;;  %8385 = vst [vmem:[#allocation101_spill] sm:$0xff] %v6387_v2  ;;  %v6403_v5 = vadd.f32 %v6007_v11, %v8390_v46  ;;  %v8392_v44 = vld [vmem:[#allocation110_spill] sm:$0xff]  ;;  %v6431_v54 = vadd.f32 %v6007_v11, %v5624_v27 }
 0x30f   :  { %8387 = vst [vmem:[#allocation97_spill] sm:$0xff] %v6391_v37  ;;  %8388 = vst [vmem:[#allocation99_spill] sm:$0xff] %v6395_v45  ;;  %v6407_v12 = vadd.f32 %v6007_v11, %v8392_v44  ;;  %v8396_v45 = vld [vmem:[#allocation113_spill] sm:$0xff]  ;;  %v6427_v44 = vadd.f32 %v6007_v11, %v5620_v1  ;;  %v6447_v1 = vadd.f32 %v6007_v11, %v5640_v56 }
 0x310   :  { %8389 = vst [vmem:[#allocation104_spill] sm:$0xff] %v6399_v53  ;;  %8391 = vst [vmem:[#allocation107_spill] sm:$0xff] %v6403_v5  ;;  %v6419_v19 = vadd.f32 %v6007_v11, %v8396_v45  ;;  %v8398_v53 = vld [vmem:[#allocation108_spill] sm:$0xff] }
 0x311   :  { %8393 = vst [vmem:[#allocation102_spill] sm:$0xff] %v6407_v12  ;;  %8394 = vst [vmem:[#allocation105_spill] sm:$0xff] %v6411_v30  ;;  %v6423_v46 = vadd.f32 %v6007_v11, %v8398_v53  ;;  %v8402_v30 = vld [vmem:[#allocation111_spill] sm:$0xff]  ;;  %v6443_v53 = vadd.f32 %v6007_v11, %v5636_v25  ;;  %v6463_v25 = vadd.f32 %v6007_v11, %v5656_v62 }
 0x312   :  { %8395 = vst [vmem:[#allocation110_spill] sm:$0xff] %v6415_v28  ;;  %8397 = vst [vmem:[#allocation113_spill] sm:$0xff] %v6419_v19  ;;  %v6435_v33 = vadd.f32 %v6007_v11, %v8402_v30  ;;  %v8403_v28 = vld [vmem:[#allocation116_spill] sm:$0xff] }
 0x313   :  { %8399 = vst [vmem:[#allocation108_spill] sm:$0xff] %v6423_v46  ;;  %8400 = vst [vmem:[#allocation162_spill] sm:$0xff] %v6427_v44  ;;  %v6439_v45 = vadd.f32 %v6007_v11, %v8403_v28  ;;  %v8406_v44 = vld [vmem:[#allocation119_spill] sm:$0xff]  ;;  %v6459_v28 = vadd.f32 %v6007_v11, %v5652_v35  ;;  %v6479_v35 = vadd.f32 %v6007_v11, %v5672_v22 }
 0x314   :  { %8401 = vst [vmem:[#allocation163_spill] sm:$0xff] %v6431_v54  ;;  %8404 = vst [vmem:[#allocation111_spill] sm:$0xff] %v6443_v53  ;;  %v6451_v27 = vadd.f32 %v6007_v11, %v8406_v44  ;;  %v8407_v54 = vld [vmem:[#allocation114_spill] sm:$0xff]  ;;  %v8410_v53 = vld [vmem:[#allocation117_spill] sm:$0xff] }
 0x315   :  { %8405 = vst [vmem:[#allocation116_spill] sm:$0xff] %v6447_v1  ;;  %v6455_v30 = vadd.f32 %v6007_v11, %v8407_v54  ;;  %8408 = vst [vmem:[#allocation119_spill] sm:$0xff] %v6459_v28  ;;  %v6467_v56 = vadd.f32 %v6007_v11, %v8410_v53  ;;  %v8411_v1 = vld [vmem:[#allocation122_spill] sm:$0xff]  ;;  %v6475_v54 = vadd.f32 %v6007_v11, %v5668_v14  ;;  %v8414_v28 = vld [vmem:[#allocation125_spill] sm:$0xff] }
 0x316   :  { %8409 = vst [vmem:[#allocation114_spill] sm:$0xff] %v6463_v25  ;;  %v6471_v44 = vadd.f32 %v6007_v11, %v8411_v1  ;;  %8413 = vst [vmem:[#allocation122_spill] sm:$0xff] %v6479_v35  ;;  %v6483_v62 = vadd.f32 %v6007_v11, %v8414_v28  ;;  %v8415_v25 = vld [vmem:[#allocation120_spill] sm:$0xff]  ;;  %v6491_v1 = vadd.f32 %v6007_v11, %v5684_v23  ;;  %v8419_v35 = vld [vmem:[#allocation127_spill] sm:$0xff] }
 0x317   :  { %8412 = vst [vmem:[#allocation117_spill] sm:$0xff] %v6475_v54  ;;  %v6487_v53 = vadd.f32 %v6007_v11, %v8415_v25  ;;  %v6495_v14 = vadd.f32 %v6007_v11, %v5688_v8  ;;  %v8418_v54 = vld [vmem:[#allocation123_spill] sm:$0xff]  ;;  %v6503_v28 = vadd.f32 %v6007_v11, %v8419_v35  ;;  %v6507_v25 = vadd.f32 %v6007_v11, %v5700_v26 }
 0x318   :  { %8416 = vst [vmem:[#allocation125_spill] sm:$0xff] %v6491_v1  ;;  %v6499_v22 = vadd.f32 %v6007_v11, %v8418_v54  ;;  %v6511_v23 = vadd.f32 %v6007_v11, %v5704_v47  ;;  %v8422_v1 = vld [vmem:[#allocation129_spill] sm:$0xff]  ;;  %v6523_v35 = vadd.f32 %v6007_v11, %v5716_v40  ;;  %v6527_v26 = vadd.f32 %v6007_v11, %v5720_v43 }
 0x319   :  { %8417 = vst [vmem:[#allocation120_spill] sm:$0xff] %v6495_v14  ;;  %8420 = vst [vmem:[#allocation123_spill] sm:$0xff] %v6507_v25  ;;  %v6515_v8 = vadd.f32 %v6007_v11, %v8422_v1  ;;  %v8424_v14 = vld [vmem:[#allocation37_spill] sm:$0xff]  ;;  %v8428_v25 = vld [vmem:[#allocation40_spill] sm:$0xff]  ;;  %v6543_v40 = vadd.f32 %v6007_v11, %v5736_v13 }
 0x31a   :  { %8421 = vst [vmem:[#allocation127_spill] sm:$0xff] %v6511_v23  ;;  %v6519_v54 = vadd.f32 %v6007_v11, %v8424_v14  ;;  %8426 = vst [vmem:[#allocation164_spill] sm:$0xff] %v6523_v35  ;;  %v6531_v47 = vadd.f32 %v6007_v11, %v8428_v25  ;;  %v8430_v23 = vld [vmem:[#allocation43_spill] sm:$0xff]  ;;  %v6539_v14 = vadd.f32 %v6007_v11, %v5732_v58  ;;  %v8434_v35 = vld [vmem:[#allocation46_spill] sm:$0xff] }
 0x31b   :  { %8423 = vst [vmem:[#allocation129_spill] sm:$0xff] %v6515_v8  ;;  %8427 = vst [vmem:[#allocation165_spill] sm:$0xff] %v6527_v26  ;;  %v6535_v1 = vadd.f32 %v6007_v11, %v8430_v23  ;;  %v6547_v43 = vadd.f32 %v6007_v11, %v8434_v35  ;;  %v8436_v26 = vld [vmem:[#allocation49_spill] sm:$0xff]  ;;  %v6555_v23 = vadd.f32 %v6007_v11, %v5748_v17  ;;  %v8485_v8 = vld [vmem:[#allocation132_spill] sm:$0xff] }
 0x31c   :  { %8425 = vst [vmem:[#allocation37_spill] sm:$0xff] %v6519_v54  ;;  %8429 = vst [vmem:[#allocation40_spill] sm:$0xff] %v6531_v47  ;;  %v6551_v25 = vadd.f32 %v6007_v11, %v8436_v26  ;;  %v6559_v58 = vadd.f32 %v6007_v11, %v5752_v55  ;;  %v8479_v47 = vld [vmem:[#allocation128_spill] sm:$0xff]  ;;  %v8483_v54 = vld [vmem:[#allocation131_spill] sm:$0xff] }
 0x31d   :  { %8431 = vst [vmem:[#allocation43_spill] sm:$0xff] %v6535_v1  ;;  %8432 = vst [vmem:[#allocation166_spill] sm:$0xff] %v6539_v14  ;;  %v8440_v14 = vld [vmem:[#allocation52_spill] sm:$0xff]  ;;  %v8478_v1 = vld [vmem:[#allocation121_spill] sm:$0xff] }
 0x31e   :  { %8433 = vst [vmem:[#allocation167_spill] sm:$0xff] %v6543_v40  ;;  %8435 = vst [vmem:[#allocation46_spill] sm:$0xff] %v6547_v43  ;;  %v6563_v13 = vadd.f32 %v6007_v11, %v8440_v14  ;;  %v8442_v40 = vld [vmem:[#allocation55_spill] sm:$0xff]  ;;  %v8444_v43 = vld [vmem:[#allocation58_spill] sm:$0xff] }
 0x31f   :  { %8437 = vst [vmem:[#allocation49_spill] sm:$0xff] %v6551_v25  ;;  %8438 = vst [vmem:[#allocation168_spill] sm:$0xff] %v6555_v23  ;;  %v6567_v35 = vadd.f32 %v6007_v11, %v8442_v40  ;;  %v6571_v26 = vadd.f32 %v6007_v11, %v8444_v43  ;;  %v8446_v25 = vld [vmem:[#allocation61_spill] sm:$0xff]  ;;  %v8448_v23 = vld [vmem:[#allocation64_spill] sm:$0xff] }
 0x320   :  { %8439 = vst [vmem:[#allocation169_spill] sm:$0xff] %v6559_v58  ;;  %8441 = vst [vmem:[#allocation52_spill] sm:$0xff] %v6563_v13  ;;  %v6575_v17 = vadd.f32 %v6007_v11, %v8446_v25  ;;  %v6579_v55 = vadd.f32 %v6007_v11, %v8448_v23  ;;  %v8450_v58 = vld [vmem:[#allocation67_spill] sm:$0xff]  ;;  %v8452_v13 = vld [vmem:[#allocation70_spill] sm:$0xff] }
 0x321   :  { %8443 = vst [vmem:[#allocation55_spill] sm:$0xff] %v6567_v35  ;;  %8445 = vst [vmem:[#allocation58_spill] sm:$0xff] %v6571_v26  ;;  %v6583_v14 = vadd.f32 %v6007_v11, %v8450_v58  ;;  %v6587_v40 = vadd.f32 %v6007_v11, %v8452_v13  ;;  %v8454_v35 = vld [vmem:[#allocation73_spill] sm:$0xff]  ;;  %v8456_v26 = vld [vmem:[#allocation76_spill] sm:$0xff]  ;;  %v6603_v58 = vadd.f32 %v6007_v11, %v5796_v15 }
 0x322   :  { %8447 = vst [vmem:[#allocation61_spill] sm:$0xff] %v6575_v17  ;;  %8449 = vst [vmem:[#allocation64_spill] sm:$0xff] %v6579_v55  ;;  %v6591_v43 = vadd.f32 %v6007_v11, %v8454_v35  ;;  %v6595_v25 = vadd.f32 %v6007_v11, %v8456_v26  ;;  %v8458_v17 = vld [vmem:[#allocation79_spill] sm:$0xff]  ;;  %v6607_v13 = vadd.f32 %v6007_v11, %v5800_v63  ;;  %v8610_v16 = vld [vmem:[#allocation162_spill] sm:$0xff] }
 0x323   :  { %8451 = vst [vmem:[#allocation67_spill] sm:$0xff] %v6583_v14  ;;  %8453 = vst [vmem:[#allocation70_spill] sm:$0xff] %v6587_v40  ;;  %v6599_v23 = vadd.f32 %v6007_v11, %v8458_v17  ;;  %v8462_v40 = vld [vmem:[#allocation82_spill] sm:$0xff]  ;;  %v6619_v17 = vadd.f32 %v6007_v11, %v5812_v49  ;;  %v6623_v15 = vadd.f32 %v6007_v11, %v5816_v18  ;;  %v8476_v14 = vld [vmem:[#allocation124_spill] sm:$0xff] }
 0x324   :  { %8455 = vst [vmem:[#allocation73_spill] sm:$0xff] %v6591_v43  ;;  %8457 = vst [vmem:[#allocation76_spill] sm:$0xff] %v6595_v25  ;;  %v6611_v35 = vadd.f32 %v6007_v11, %v8462_v40  ;;  %v8464_v43 = vld [vmem:[#allocation85_spill] sm:$0xff]  ;;  %v6639_v49 = vadd.f32 %v6007_v11, %v5832_v36  ;;  %v8475_v25 = vld [vmem:[#allocation118_spill] sm:$0xff] }
 0x325   :  { %8459 = vst [vmem:[#allocation79_spill] sm:$0xff] %v6599_v23  ;;  %8460 = vst [vmem:[#allocation170_spill] sm:$0xff] %v6603_v58  ;;  %v6615_v26 = vadd.f32 %v6007_v11, %v8464_v43  ;;  %v8468_v58 = vld [vmem:[#allocation90_spill] sm:$0xff]  ;;  %v6635_v43 = vadd.f32 %v6007_v11, %v5828_v0  ;;  %v6655_v0 = vadd.f32 %v6007_v11, %v5848_v51  ;;  %v8474_v23 = vld [vmem:[#allocation109_spill] sm:$0xff] }
 0x326   :  { %8461 = vst [vmem:[#allocation171_spill] sm:$0xff] %v6607_v13  ;;  %8463 = vst [vmem:[#allocation82_spill] sm:$0xff] %v6611_v35  ;;  %v6627_v63 = vadd.f32 %v6007_v11, %v8468_v58  ;;  %v8469_v13 = vld [vmem:[#allocation95_spill] sm:$0xff]  ;;  %v6675_v51 = vadd.f32 %v6007_v11, %v8474_v23  ;;  %v8613_v37 = vld [vmem:[#allocation116_spill] sm:$0xff] }
 0x327   :  { %8465 = vst [vmem:[#allocation85_spill] sm:$0xff] %v6615_v26  ;;  %8466 = vst [vmem:[#allocation172_spill] sm:$0xff] %v6619_v17  ;;  %v6631_v40 = vadd.f32 %v6007_v11, %v8469_v13  ;;  %v8470_v17 = vld [vmem:[#allocation100_spill] sm:$0xff]  ;;  %v6651_v13 = vadd.f32 %v6007_v11, %v5844_v6  ;;  %v8473_v35 = vld [vmem:[#allocation103_spill] sm:$0xff]  ;;  %v6671_v6 = vadd.f32 %v6007_v11, %v5864_v48 }
 0x328   :  { %8467 = vst [vmem:[#allocation173_spill] sm:$0xff] %v6623_v15  ;;  %v6643_v18 = vadd.f32 %v6007_v11, %v8470_v17  ;;  %v8471_v15 = vld [vmem:[#allocation106_spill] sm:$0xff]  ;;  %v8472_v26 = vld [vmem:[#allocation112_spill] sm:$0xff]  ;;  %v6663_v17 = vadd.f32 %v6007_v11, %v8473_v35  ;;  %v6683_v35 = vadd.f32 %v6007_v11, %v5876_v31  ;;  %v6691_v48 = vadd.f32 %v6007_v11, %v8476_v14  ;;  %v8477_v55 = vld [vmem:[#allocation115_spill] sm:$0xff] }
 0x329   :  { %v6647_v58 = vadd.f32 %v6007_v11, %v8471_v15  ;;  %v6659_v36 = vadd.f32 %v6007_v11, %v8472_v26  ;;  %v6667_v15 = vadd.f32 %v6007_v11, %v5860_v34  ;;  %v6679_v26 = vadd.f32 %v6007_v11, %v8475_v25  ;;  %v8611_v29 = vld [vmem:[#allocation163_spill] sm:$0xff] }
 0x32a   :  { %v6687_v34 = vadd.f32 %v6007_v11, %v5880_v50  ;;  %v6695_v23 = vadd.f32 %v6007_v11, %v8477_v55  ;;  %v6699_v25 = vadd.f32 %v6007_v11, %v5892_v60  ;;  %v6703_v31 = vadd.f32 %v6007_v11, %v5896_v42  ;;  %v8612_v2 = vld [vmem:[#allocation111_spill] sm:$0xff] }
 0x32b   :  { %v6707_v50 = vadd.f32 %v6007_v11, %v8478_v1  ;;  %v6711_v14 = vadd.f32 %v6007_v11, %v8479_v47  ;;  %v6715_v55 = vadd.f32 %v6007_v11, %v5908_v20  ;;  %v6719_v60 = vadd.f32 %v6007_v11, %v5912_v59 }
 0x32c   :  { %v6723_v42 = vadd.f32 %v6007_v11, %v8483_v54  ;;  %v6727_v1 = vadd.f32 %v6007_v11, %v8485_v8  ;;  %v6731_v47 = vadd.f32 %v6007_v11, %v5924_v21  ;;  %v2952_v5 = vmax.f32 %v8611_v29, %v6631_v40  ;;  %v8614_v29 = vld [vmem:[#allocation119_spill] sm:$0xff] }
 0x32d   :  { %8480 = vst [vmem:[#allocation90_spill] sm:$0xff] %v6711_v14  ;;  %8481 = vst [vmem:[#allocation95_spill] sm:$0xff] %v6715_v55  ;;  %v8488_v14 = vld [vmem:[#allocation133_spill] sm:$0xff]  ;;  %v8490_v55 = vld [vmem:[#allocation134_spill] sm:$0xff]  ;;  %v2955_v10 = vmax.f32 %v8612_v2, %v6643_v18  ;;  %v2956_v19 = vmax.f32 %v8613_v37, %v6647_v58  ;;  %v2962_v2 = vmax.f32 %v6471_v44, %v6671_v6 }
 0x32e   :  { %8482 = vst [vmem:[#allocation100_spill] sm:$0xff] %v6719_v60  ;;  %8484 = vst [vmem:[#allocation106_spill] sm:$0xff] %v6723_v42  ;;  %v6735_v20 = vadd.f32 %v6007_v11, %v8488_v14  ;;  %v6739_v59 = vadd.f32 %v6007_v11, %v8490_v55  ;;  %v8492_v60 = vld [vmem:[#allocation135_spill] sm:$0xff]  ;;  %v8494_v42 = vld [vmem:[#allocation136_spill] sm:$0xff]  ;;  %v2966_v18 = vmax.f32 %v6487_v53, %v6687_v34 }
 0x32f   :  { %8486 = vst [vmem:[#allocation112_spill] sm:$0xff] %v6727_v1  ;;  %8487 = vst [vmem:[#allocation103_spill] sm:$0xff] %v6731_v47  ;;  %v6743_v54 = vadd.f32 %v6007_v11, %v8492_v60  ;;  %v6747_v8 = vadd.f32 %v6007_v11, %v8494_v42  ;;  %v8496_v1 = vld [vmem:[#allocation137_spill] sm:$0xff]  ;;  %v8498_v47 = vld [vmem:[#allocation138_spill] sm:$0xff]  ;;  %v2969_v44 = vmax.f32 %v6499_v22, %v6699_v25 }
 0x330   :  { %8489 = vst [vmem:[#allocation109_spill] sm:$0xff] %v6735_v20  ;;  %8491 = vst [vmem:[#allocation118_spill] sm:$0xff] %v6739_v59  ;;  %v6751_v21 = vadd.f32 %v6007_v11, %v8496_v1  ;;  %v6755_v14 = vadd.f32 %v6007_v11, %v8498_v47  ;;  %v8500_v20 = vld [vmem:[#allocation139_spill] sm:$0xff]  ;;  %v8502_v59 = vld [vmem:[#allocation140_spill] sm:$0xff] }
 0x331   :  { %8493 = vst [vmem:[#allocation124_spill] sm:$0xff] %v6743_v54  ;;  %8495 = vst [vmem:[#allocation115_spill] sm:$0xff] %v6747_v8  ;;  %v6759_v55 = vadd.f32 %v6007_v11, %v8500_v20  ;;  %v6763_v60 = vadd.f32 %v6007_v11, %v8502_v59  ;;  %v8504_v54 = vld [vmem:[#allocation141_spill] sm:$0xff]  ;;  %v8506_v8 = vld [vmem:[#allocation142_spill] sm:$0xff] }
 0x332   :  { %8497 = vst [vmem:[#allocation121_spill] sm:$0xff] %v6751_v21  ;;  %8499 = vst [vmem:[#allocation128_spill] sm:$0xff] %v6755_v14  ;;  %v6767_v42 = vadd.f32 %v6007_v11, %v8504_v54  ;;  %v6771_v1 = vadd.f32 %v6007_v11, %v8506_v8  ;;  %v8508_v21 = vld [vmem:[#allocation143_spill] sm:$0xff]  ;;  %v8510_v14 = vld [vmem:[#allocation126_spill] sm:$0xff] }
 0x333   :  { %8501 = vst [vmem:[#allocation131_spill] sm:$0xff] %v6759_v55  ;;  %8503 = vst [vmem:[#allocation132_spill] sm:$0xff] %v6763_v60  ;;  %v6775_v47 = vadd.f32 %v6007_v11, %v8508_v21  ;;  %v6779_v20 = vadd.f32 %v6007_v11, %v8510_v14  ;;  %v8512_v55 = vld [vmem:[#allocation130_spill] sm:$0xff]  ;;  %v8513_v60 = vld [vmem:[#allocation144_spill] sm:$0xff] }
 0x334   :  { %8505 = vst [vmem:[#allocation133_spill] sm:$0xff] %v6767_v42  ;;  %8507 = vst [vmem:[#allocation134_spill] sm:$0xff] %v6771_v1  ;;  %v6783_v59 = vadd.f32 %v6007_v11, %v8512_v55  ;;  %v6787_v54 = vadd.f32 %v6007_v11, %v8513_v60  ;;  %v8514_v42 = vld [vmem:[#allocation146_spill] sm:$0xff]  ;;  %v8515_v1 = vld [vmem:[#allocation145_spill] sm:$0xff]  ;;  %v6807_v60 = vadd.f32 %v6007_v11, %v6000_v39 }
 0x335   :  { %8509 = vst [vmem:[#allocation135_spill] sm:$0xff] %v6775_v47  ;;  %8511 = vst [vmem:[#allocation136_spill] sm:$0xff] %v6779_v20  ;;  %v6791_v8 = vadd.f32 %v6007_v11, %v8514_v42  ;;  %v6795_v21 = vadd.f32 %v6007_v11, %v8515_v1  ;;  %v8517_v47 = vld [vmem:[#allocation148_spill] sm:$0xff]  ;;  %v8519_v20 = vld [vmem:[#allocation150_spill] sm:$0xff]  ;;  %v6811_v42 = vadd.f32 %v6007_v11, %v6011_v38 }
 0x336   :  { %v6799_v14 = vadd.f32 %v6007_v11, %v8517_v47  ;;  %v6803_v55 = vadd.f32 %v6007_v11, %v8519_v20  ;;  %8521 = vst [vmem:[#allocation140_spill] sm:$0xff] %v6807_v60  ;;  %v6815_v1 = vadd.f32 %v6007_v11, %v6015_v7  ;;  %v6819_v47 = vadd.f32 %v6007_v11, %v6019_v57  ;;  %v8616_v37 = vld [vmem:[#allocation117_spill] sm:$0xff]  ;;  %v8621_v6 = vld [vmem:[#allocation90_spill] sm:$0xff]  ;;  %v8625_v34 = vld [vmem:[#allocation100_spill] sm:$0xff] }
 0x337   :  { %8516 = vst [vmem:[#allocation137_spill] sm:$0xff] %v6795_v21  ;;  %8522 = vst [vmem:[#allocation141_spill] sm:$0xff] %v6811_v42  ;;  %v6823_v20 = vadd.f32 %v6007_v11, %v6023_v32  ;;  %v2953_v60 = vmax.f32 %v6435_v33, %v6635_v43  ;;  %v2954_v38 = vmax.f32 %v6439_v45, %v6639_v49  ;;  %v8615_v33 = vld [vmem:[#allocation114_spill] sm:$0xff]  ;;  %v8618_v58 = vld [vmem:[#allocation125_spill] sm:$0xff] }
 0x338   :  { %8518 = vst [vmem:[#allocation138_spill] sm:$0xff] %v6799_v14  ;;  %8520 = vst [vmem:[#allocation139_spill] sm:$0xff] %v6803_v55  ;;  %v2957_v14 = vmax.f32 %v6451_v27, %v6651_v13  ;;  %v2960_v40 = vmax.f32 %v8615_v33, %v6663_v17  ;;  %v2961_v45 = vmax.f32 %v6467_v56, %v6667_v15  ;;  %v8617_v27 = vld [vmem:[#allocation122_spill] sm:$0xff]  ;;  %v8619_v56 = vld [vmem:[#allocation120_spill] sm:$0xff] }
 0x339   :  { %8523 = vst [vmem:[#allocation142_spill] sm:$0xff] %v6815_v1  ;;  %8524 = vst [vmem:[#allocation143_spill] sm:$0xff] %v6819_v47  ;;  %v2963_v43 = vmax.f32 %v8616_v37, %v6675_v51  ;;  %v2964_v49 = vmax.f32 %v8617_v27, %v6679_v26  ;;  %v2967_v13 = vmax.f32 %v8618_v58, %v6691_v48  ;;  %v8620_v17 = vld [vmem:[#allocation123_spill] sm:$0xff]  ;;  %v8624_v53 = vld [vmem:[#allocation129_spill] sm:$0xff] }
 0x33a   :  { %8525 = vst [vmem:[#allocation126_spill] sm:$0xff] %v6823_v20  ;;  %v2951_v20 = vmax.f32 %v8610_v16, %v6627_v63  ;;  %v2958_v16 = vmax.f32 %v6455_v30, %v6655_v0  ;;  %v2959_v63 = vmax.f32 %v8614_v29, %v6659_v36  ;;  %v2965_v30 = vmax.f32 %v6483_v62, %v6683_v35  ;;  %v8622_v62 = vld [vmem:[#allocation127_spill] sm:$0xff]  ;;  %v8626_v48 = vld [vmem:[#allocation37_spill] sm:$0xff]  ;;  %v8627_v33 = vld [vmem:[#allocation106_spill] sm:$0xff] }
 0x33b   :  { %v2968_v0 = vmax.f32 %v8619_v56, %v6695_v23  ;;  %v2970_v36 = vmax.f32 %v6503_v28, %v6703_v31  ;;  %v2971_v15 = vmax.f32 %v8620_v17, %v6707_v50  ;;  %v2972_v51 = vmax.f32 %v8622_v62, %v8621_v6  ;;  %v8623_v26 = vld [vmem:[#allocation95_spill] sm:$0xff]  ;;  %v8628_v23 = vld [vmem:[#allocation164_spill] sm:$0xff]  ;;  %v8630_v22 = vld [vmem:[#allocation165_spill] sm:$0xff] }
 0x33c   :  { %v2973_v35 = vmax.f32 %v8624_v53, %v8623_v26  ;;  %v2974_v29 = vmax.f32 %v8626_v48, %v8625_v34  ;;  %v2975_v37 = vmax.f32 %v8628_v23, %v8627_v33  ;;  %v8629_v27 = vld [vmem:[#allocation112_spill] sm:$0xff]  ;;  %v8631_v58 = vld [vmem:[#allocation103_spill] sm:$0xff]  ;;  %v8633_v56 = vld [vmem:[#allocation109_spill] sm:$0xff] }
 0x33d   :  { %v2976_v25 = vmax.f32 %v8630_v22, %v8629_v27  ;;  %v8632_v28 = vld [vmem:[#allocation40_spill] sm:$0xff]  ;;  %v8634_v50 = vld [vmem:[#allocation43_spill] sm:$0xff]  ;;  %v8635_v46 = vld [vmem:[#allocation118_spill] sm:$0xff] }
 0x33e   :  { %v2977_v31 = vmax.f32 %v8632_v28, %v8631_v58  ;;  %v2978_v17 = vmax.f32 %v8634_v50, %v8633_v56  ;;  %v8636_v6 = vld [vmem:[#allocation166_spill] sm:$0xff]  ;;  %v8637_v55 = vld [vmem:[#allocation124_spill] sm:$0xff]  ;;  %v8638_v26 = vld [vmem:[#allocation167_spill] sm:$0xff] }
 0x33f   :  { %v2979_v62 = vmax.f32 %v8636_v6, %v8635_v46  ;;  %v2980_v53 = vmax.f32 %v8638_v26, %v8637_v55  ;;  %v8639_v42 = vld [vmem:[#allocation115_spill] sm:$0xff]  ;;  %v8640_v34 = vld [vmem:[#allocation46_spill] sm:$0xff]  ;;  %v8641_v24 = vld [vmem:[#allocation121_spill] sm:$0xff] }
 0x340   :  { %v2981_v48 = vmax.f32 %v8640_v34, %v8639_v42  ;;  %v8642_v33 = vld [vmem:[#allocation49_spill] sm:$0xff]  ;;  %v8643_v52 = vld [vmem:[#allocation128_spill] sm:$0xff]  ;;  %v8645_v41 = vld [vmem:[#allocation131_spill] sm:$0xff] }
 0x341   :  { %v2982_v23 = vmax.f32 %v8642_v33, %v8641_v24  ;;  %v8644_v27 = vld [vmem:[#allocation168_spill] sm:$0xff]  ;;  %v8646_v58 = vld [vmem:[#allocation169_spill] sm:$0xff]  ;;  %v8650_v46 = vld [vmem:[#allocation55_spill] sm:$0xff] }
 0x342   :  { %v2983_v22 = vmax.f32 %v8644_v27, %v8643_v52  ;;  %v2984_v28 = vmax.f32 %v8646_v58, %v8645_v41  ;;  %v8647_v12 = vld [vmem:[#allocation132_spill] sm:$0xff]  ;;  %v8649_v4 = vld [vmem:[#allocation133_spill] sm:$0xff]  ;;  %v8651_v61 = vld [vmem:[#allocation134_spill] sm:$0xff] }
 0x343   :  { %v8648_v56 = vld [vmem:[#allocation52_spill] sm:$0xff]  ;;  %v2986_v6 = vmax.f32 %v8650_v46, %v8649_v4  ;;  %v8652_v55 = vld [vmem:[#allocation58_spill] sm:$0xff]  ;;  %v8653_v21 = vld [vmem:[#allocation135_spill] sm:$0xff] }
 0x344   :  { %v2985_v50 = vmax.f32 %v8648_v56, %v8647_v12  ;;  %v2987_v26 = vmax.f32 %v8652_v55, %v8651_v61  ;;  %v8654_v42 = vld [vmem:[#allocation61_spill] sm:$0xff]  ;;  %v8655_v11 = vld [vmem:[#allocation136_spill] sm:$0xff]  ;;  %v8657_v52 = vld [vmem:[#allocation67_spill] sm:$0xff] }
 0x345   :  { %v2988_v34 = vmax.f32 %v8654_v42, %v8653_v21  ;;  %v8656_v24 = vld [vmem:[#allocation64_spill] sm:$0xff]  ;;  %v2990_v27 = vmax.f32 %v8657_v52, %v6783_v59  ;;  %v8658_v41 = vld [vmem:[#allocation70_spill] sm:$0xff]  ;;  %v8659_v12 = vld [vmem:[#allocation73_spill] sm:$0xff] }
 0x346   :  { %v2989_v33 = vmax.f32 %v8656_v24, %v8655_v11  ;;  %v2991_v58 = vmax.f32 %v8658_v41, %v6787_v54  ;;  %v2992_v56 = vmax.f32 %v8659_v12, %v6791_v8  ;;  %v8660_v47 = vld [vmem:[#allocation137_spill] sm:$0xff]  ;;  %v8661_v4 = vld [vmem:[#allocation76_spill] sm:$0xff]  ;;  %v8662_v1 = vld [vmem:[#allocation138_spill] sm:$0xff] }
 0x347   :  { %v2993_v46 = vmax.f32 %v8661_v4, %v8660_v47  ;;  %v8663_v61 = vld [vmem:[#allocation79_spill] sm:$0xff]  ;;  %v8665_v21 = vld [vmem:[#allocation170_spill] sm:$0xff]  ;;  %v8666_v9 = vld [vmem:[#allocation140_spill] sm:$0xff] }
 0x348   :  { %v2994_v55 = vmax.f32 %v8663_v61, %v8662_v1  ;;  %v8664_v3 = vld [vmem:[#allocation139_spill] sm:$0xff]  ;;  %v8668_v57 = vld [vmem:[#allocation141_spill] sm:$0xff]  ;;  %v8669_v59 = vld [vmem:[#allocation82_spill] sm:$0xff] }
 0x349   :  { %v2995_v42 = vmax.f32 %v8665_v21, %v8664_v3  ;;  %v8667_v11 = vld [vmem:[#allocation171_spill] sm:$0xff]  ;;  %v2997_v52 = vmax.f32 %v8669_v59, %v8668_v57  ;;  %v8670_v7 = vld [vmem:[#allocation142_spill] sm:$0xff]  ;;  %v8671_v54 = vld [vmem:[#allocation85_spill] sm:$0xff] }
 0x34a   :  { %v2996_v24 = vmax.f32 %v8667_v11, %v8666_v9  ;;  %v2998_v41 = vmax.f32 %v8671_v54, %v8670_v7  ;;  %v8672_v39 = vld [vmem:[#allocation143_spill] sm:$0xff]  ;;  %v8673_v8 = vld [vmem:[#allocation172_spill] sm:$0xff]  ;;  %v8674_v32 = vld [vmem:[#allocation126_spill] sm:$0xff] }
 0x34b   :  { %v2999_v12 = vmax.f32 %v8673_v8, %v8672_v39  ;;  %v8675_v47 = vld [vmem:[#allocation173_spill] sm:$0xff]  ;;  %v8676_v1 = vld [vmem:[#allocation147_spill] sm:$0xff]  ;;  %v8677_v61 = vld [vmem:[#allocation44_spill] sm:$0xff] }
 0x34c   :  { %v3000_v4 = vmax.f32 %v8675_v47, %v8674_v32  ;;  %v8678_v3 = vmax.f32 %v8676_v1, %v8677_v61  ;;  %v8679_v9 = vld [vmem:[#allocation149_spill] sm:$0xff]  ;;  %v8680_v11 = vld [vmem:[#allocation39_spill] sm:$0xff]  ;;  %v8682_v7 = vld [vmem:[#allocation152_spill] sm:$0xff] }
 0x34d   :  { %v8681_v57 = vmax.f32 %v8679_v9, %v8680_v11  ;;  %v8683_v54 = vld [vmem:[#allocation42_spill] sm:$0xff]  ;;  %v8687_v47 = vld [vmem:[#allocation47_spill] sm:$0xff] }
 0x34e   :  { %v3001_v21 = vmax.f32 %v8678_v3, %v2951_v20  ;;  %v8684_v8 = vmax.f32 %v8682_v7, %v8683_v54  ;;  %v8686_v32 = vld [vmem:[#allocation154_spill] sm:$0xff]  ;;  %v8690_v3 = vld [vmem:[#allocation151_spill] sm:$0xff] }
 0x34f   :  { %v3002_v59 = vmax.f32 %v8681_v57, %v2952_v5  ;;  %v8688_v1 = vmax.f32 %v8686_v32, %v8687_v47  ;;  %v8691_v20 = vld [vmem:[#allocation50_spill] sm:$0xff]  ;;  %v8694_v5 = vld [vmem:[#allocation153_spill] sm:$0xff] }
 0x350   :  { %v7034_v39 = vmax.f32 %v8684_v8, %v2953_v60  ;;  %v8692_v9 = vmax.f32 %v8690_v3, %v8691_v20  ;;  %v8695_v57 = vld [vmem:[#allocation45_spill] sm:$0xff]  ;;  %v8698_v8 = vld [vmem:[#allocation156_spill] sm:$0xff]  ;;  %v8701_v47 = vld [vmem:[#allocation158_spill] sm:$0xff] }
 0x351   :  { %v7039_v61 = vmax.f32 %v8688_v1, %v2954_v38  ;;  %v8696_v7 = vmax.f32 %v8694_v5, %v8695_v57  ;;  %v8699_v60 = vld [vmem:[#allocation48_spill] sm:$0xff]  ;;  %v8702_v1 = vld [vmem:[#allocation53_spill] sm:$0xff]  ;;  %v8704_v3 = vld [vmem:[#allocation155_spill] sm:$0xff] }
 0x352   :  { %8685 = vst [vmem:[#allocation130_spill] sm:$0xff] %v7034_v39  ;;  %v7044_v11 = vmax.f32 %v8692_v9, %v2955_v10  ;;  %v8700_v39 = vmax.f32 %v8698_v8, %v8699_v60  ;;  %v8703_v38 = vmax.f32 %v8701_v47, %v8702_v1  ;;  %v8705_v20 = vld [vmem:[#allocation56_spill] sm:$0xff]  ;;  %v8708_v5 = vld [vmem:[#allocation51_spill] sm:$0xff] }
 0x353   :  { %8689 = vst [vmem:[#allocation144_spill] sm:$0xff] %v7039_v61  ;;  %v7049_v54 = vmax.f32 %v8696_v7, %v2956_v19  ;;  %v8706_v9 = vmax.f32 %v8704_v3, %v8705_v20  ;;  %v8710_v7 = vld [vmem:[#allocation160_spill] sm:$0xff]  ;;  %v8714_v60 = vld [vmem:[#allocation59_spill] sm:$0xff] }
 0x354   :  { %8693 = vst [vmem:[#allocation146_spill] sm:$0xff] %v7044_v11  ;;  %v7054_v32 = vmax.f32 %v8700_v39, %v2957_v14  ;;  %v7059_v61 = vmax.f32 %v8703_v38, %v2958_v16  ;;  %v8707_v11 = vld [vmem:[#allocation157_spill] sm:$0xff]  ;;  %v8716_v1 = vld [vmem:[#allocation159_spill] sm:$0xff]  ;;  %v8717_v38 = vld [vmem:[#allocation62_spill] sm:$0xff] }
 0x355   :  { %8697 = vst [vmem:[#allocation145_spill] sm:$0xff] %v7049_v54  ;;  %v7064_v10 = vmax.f32 %v8706_v9, %v2959_v63  ;;  %v8709_v57 = vmax.f32 %v8707_v11, %v8708_v5  ;;  %v8711_v54 = vld [vmem:[#allocation54_spill] sm:$0xff]  ;;  %v8713_v39 = vld [vmem:[#allocation161_spill] sm:$0xff]  ;;  %v8718_v3 = vmax.f32 %v8716_v1, %v8717_v38  ;;  %v8719_v20 = vld [vmem:[#allocation3_spill] sm:$0xff] }
 0x356   :  { %v8712_v8 = vmax.f32 %v8710_v7, %v8711_v54  ;;  %v8715_v47 = vmax.f32 %v8713_v39, %v8714_v60  ;;  %v8720_v9 = vld [vmem:[#allocation57_spill] sm:$0xff]  ;;  %v8725_v7 = vld [vmem:[#allocation2_spill] sm:$0xff]  ;;  %v8728_v60 = vld [vmem:[#allocation4_spill] sm:$0xff] }
 0x357   :  { %v7069_v19 = vmax.f32 %v8709_v57, %v2960_v40  ;;  %v7084_v63 = vmax.f32 %v8718_v3, %v2963_v43  ;;  %v8721_v11 = vmax.f32 %v8719_v20, %v8720_v9  ;;  %v8722_v5 = vld [vmem:[#allocation5_spill] sm:$0xff]  ;;  %v8723_v57 = vld [vmem:[#allocation60_spill] sm:$0xff]  ;;  %v8731_v38 = vld [vmem:[#allocation7_spill] sm:$0xff] }
 0x358   :  { %v7074_v14 = vmax.f32 %v8712_v8, %v2961_v45  ;;  %v7079_v16 = vmax.f32 %v8715_v47, %v2962_v2  ;;  %v8724_v54 = vmax.f32 %v8722_v5, %v8723_v57  ;;  %v8726_v8 = vld [vmem:[#allocation65_spill] sm:$0xff]  ;;  %v8729_v47 = vld [vmem:[#allocation68_spill] sm:$0xff]  ;;  %v8732_v3 = vld [vmem:[#allocation63_spill] sm:$0xff] }
 0x359   :  { %v7089_v40 = vmax.f32 %v8721_v11, %v2964_v49  ;;  %v8727_v39 = vmax.f32 %v8725_v7, %v8726_v8  ;;  %v8730_v1 = vmax.f32 %v8728_v60, %v8729_v47  ;;  %v8733_v20 = vmax.f32 %v8731_v38, %v8732_v3  ;;  %v8734_v9 = vld [vmem:[#allocation9_spill] sm:$0xff]  ;;  %v8735_v11 = vld [vmem:[#allocation66_spill] sm:$0xff]  ;;  %v8740_v8 = vld [vmem:[#allocation8_spill] sm:$0xff] }
 0x35a   :  { %v7094_v45 = vmax.f32 %v8724_v54, %v2965_v30  ;;  %v8736_v5 = vmax.f32 %v8734_v9, %v8735_v11  ;;  %v8737_v57 = vld [vmem:[#allocation6_spill] sm:$0xff]  ;;  %v8738_v54 = vld [vmem:[#allocation71_spill] sm:$0xff]  ;;  %v8746_v3 = vld [vmem:[#allocation13_spill] sm:$0xff] }
 0x35b   :  { %v7099_v2 = vmax.f32 %v8727_v39, %v2966_v18  ;;  %v7104_v43 = vmax.f32 %v8730_v1, %v2967_v13  ;;  %v7109_v49 = vmax.f32 %v8733_v20, %v2968_v0  ;;  %v8739_v7 = vmax.f32 %v8737_v57, %v8738_v54  ;;  %v8741_v39 = vld [vmem:[#allocation74_spill] sm:$0xff]  ;;  %v8743_v47 = vld [vmem:[#allocation11_spill] sm:$0xff]  ;;  %v8744_v1 = vld [vmem:[#allocation69_spill] sm:$0xff] }
 0x35c   :  { %v7114_v30 = vmax.f32 %v8736_v5, %v2969_v44  ;;  %v8742_v60 = vmax.f32 %v8740_v8, %v8741_v39  ;;  %v8745_v38 = vmax.f32 %v8743_v47, %v8744_v1  ;;  %v8747_v20 = vld [vmem:[#allocation72_spill] sm:$0xff]  ;;  %v8749_v11 = vld [vmem:[#allocation10_spill] sm:$0xff]  ;;  %v8750_v5 = vld [vmem:[#allocation77_spill] sm:$0xff] }
 0x35d   :  { %v7119_v18 = vmax.f32 %v8739_v7, %v2970_v36  ;;  %v8748_v9 = vmax.f32 %v8746_v3, %v8747_v20  ;;  %v8751_v57 = vmax.f32 %v8749_v11, %v8750_v5  ;;  %v8752_v54 = vld [vmem:[#allocation12_spill] sm:$0xff]  ;;  %v8755_v39 = vld [vmem:[#allocation15_spill] sm:$0xff]  ;;  %v8758_v1 = vld [vmem:[#allocation17_spill] sm:$0xff] }
 0x35e   :  { %v7124_v13 = vmax.f32 %v8742_v60, %v2971_v15  ;;  %v7129_v0 = vmax.f32 %v8745_v38, %v2972_v51  ;;  %v8753_v7 = vld [vmem:[#allocation80_spill] sm:$0xff]  ;;  %v8756_v60 = vld [vmem:[#allocation75_spill] sm:$0xff]  ;;  %v8759_v38 = vld [vmem:[#allocation78_spill] sm:$0xff] }
 0x35f   :  { %v7134_v44 = vmax.f32 %v8748_v9, %v2973_v35  ;;  %v7139_v36 = vmax.f32 %v8751_v57, %v2974_v29  ;;  %v8754_v8 = vmax.f32 %v8752_v54, %v8753_v7  ;;  %v8757_v47 = vmax.f32 %v8755_v39, %v8756_v60  ;;  %v8761_v20 = vld [vmem:[#allocation14_spill] sm:$0xff]  ;;  %v8762_v9 = vld [vmem:[#allocation83_spill] sm:$0xff]  ;;  %v8764_v5 = vld [vmem:[#allocation16_spill] sm:$0xff] }
 0x360   :  { %v8760_v3 = vmax.f32 %v8758_v1, %v8759_v38  ;;  %v8763_v11 = vmax.f32 %v8761_v20, %v8762_v9  ;;  %v8765_v57 = vld [vmem:[#allocation86_spill] sm:$0xff]  ;;  %v8767_v7 = vld [vmem:[#allocation19_spill] sm:$0xff]  ;;  %v8770_v60 = vld [vmem:[#allocation21_spill] sm:$0xff] }
 0x361   :  { %v7144_v15 = vmax.f32 %v8754_v8, %v2975_v37  ;;  %v7149_v51 = vmax.f32 %v8757_v47, %v2976_v25  ;;  %v8766_v54 = vmax.f32 %v8764_v5, %v8765_v57  ;;  %v8768_v8 = vld [vmem:[#allocation81_spill] sm:$0xff]  ;;  %v8771_v47 = vld [vmem:[#allocation84_spill] sm:$0xff]  ;;  %v8773_v38 = vld [vmem:[#allocation18_spill] sm:$0xff] }
 0x362   :  { %v7154_v35 = vmax.f32 %v8760_v3, %v2977_v31  ;;  %v7159_v29 = vmax.f32 %v8763_v11, %v2978_v17  ;;  %v8769_v39 = vmax.f32 %v8767_v7, %v8768_v8  ;;  %v8772_v1 = vmax.f32 %v8770_v60, %v8771_v47  ;;  %v8774_v3 = vld [vmem:[#allocation88_spill] sm:$0xff]  ;;  %v8777_v11 = vld [vmem:[#allocation91_spill] sm:$0xff]  ;;  %v8782_v8 = vld [vmem:[#allocation25_spill] sm:$0xff] }
 0x363   :  { %v7164_v37 = vmax.f32 %v8766_v54, %v2979_v62  ;;  %v8775_v20 = vmax.f32 %v8773_v38, %v8774_v3  ;;  %v8776_v9 = vld [vmem:[#allocation20_spill] sm:$0xff]  ;;  %v8779_v57 = vld [vmem:[#allocation23_spill] sm:$0xff]  ;;  %v8785_v47 = vld [vmem:[#allocation22_spill] sm:$0xff] }
 0x364   :  { %v7169_v25 = vmax.f32 %v8769_v39, %v2980_v53  ;;  %v7174_v31 = vmax.f32 %v8772_v1, %v2981_v48  ;;  %v8778_v5 = vmax.f32 %v8776_v9, %v8777_v11  ;;  %v8780_v54 = vld [vmem:[#allocation87_spill] sm:$0xff]  ;;  %v8783_v39 = vld [vmem:[#allocation89_spill] sm:$0xff]  ;;  %v8788_v3 = vld [vmem:[#allocation24_spill] sm:$0xff] }
 0x365   :  { %v7179_v17 = vmax.f32 %v8775_v20, %v2982_v23  ;;  %v8781_v7 = vmax.f32 %v8779_v57, %v8780_v54  ;;  %v8784_v60 = vmax.f32 %v8782_v8, %v8783_v39  ;;  %v8786_v1 = vld [vmem:[#allocation93_spill] sm:$0xff]  ;;  %v8789_v20 = vld [vmem:[#allocation96_spill] sm:$0xff]  ;;  %v8791_v11 = vld [vmem:[#allocation27_spill] sm:$0xff] }
 0x366   :  { %v7184_v62 = vmax.f32 %v8778_v5, %v2983_v22  ;;  %v8787_v38 = vmax.f32 %v8785_v47, %v8786_v1  ;;  %v8790_v9 = vmax.f32 %v8788_v3, %v8789_v20  ;;  %v8792_v5 = vld [vmem:[#allocation92_spill] sm:$0xff]  ;;  %v8794_v54 = vld [vmem:[#allocation29_spill] sm:$0xff]  ;;  %v8797_v39 = vld [vmem:[#allocation26_spill] sm:$0xff] }
 0x367   :  { %v7189_v53 = vmax.f32 %v8781_v7, %v2984_v28  ;;  %v7194_v48 = vmax.f32 %v8784_v60, %v2985_v50  ;;  %v8793_v57 = vmax.f32 %v8791_v11, %v8792_v5  ;;  %v8795_v7 = vld [vmem:[#allocation94_spill] sm:$0xff]  ;;  %v8800_v1 = vld [vmem:[#allocation28_spill] sm:$0xff]  ;;  %v8803_v20 = vld [vmem:[#allocation31_spill] sm:$0xff] }
 0x368   :  { %v7199_v23 = vmax.f32 %v8787_v38, %v2986_v6  ;;  %v7204_v22 = vmax.f32 %v8790_v9, %v2987_v26  ;;  %v8796_v8 = vmax.f32 %v8794_v54, %v8795_v7  ;;  %v8798_v60 = vld [vmem:[#allocation98_spill] sm:$0xff]  ;;  %v8801_v38 = vld [vmem:[#allocation101_spill] sm:$0xff] }
 0x369   :  { %v7209_v28 = vmax.f32 %v8793_v57, %v2988_v34  ;;  %v8799_v47 = vmax.f32 %v8797_v39, %v8798_v60  ;;  %v8802_v3 = vmax.f32 %v8800_v1, %v8801_v38  ;;  %v8804_v9 = vld [vmem:[#allocation97_spill] sm:$0xff]  ;;  %v8807_v57 = vld [vmem:[#allocation99_spill] sm:$0xff]  ;;  %v8809_v7 = vld [vmem:[#allocation30_spill] sm:$0xff] }
 0x36a   :  { %v7214_v50 = vmax.f32 %v8796_v8, %v2989_v33  ;;  %v8805_v11 = vmax.f32 %v8803_v20, %v8804_v9  ;;  %v8806_v5 = vld [vmem:[#allocation33_spill] sm:$0xff]  ;;  %v8810_v8 = vld [vmem:[#allocation104_spill] sm:$0xff]  ;;  %v8815_v38 = vld [vmem:[#allocation35_spill] sm:$0xff] }
 0x36b   :  { %v7219_v6 = vmax.f32 %v8799_v47, %v2990_v27  ;;  %v7224_v26 = vmax.f32 %v8802_v3, %v2991_v58  ;;  %v8808_v54 = vmax.f32 %v8806_v5, %v8807_v57  ;;  %v8811_v39 = vmax.f32 %v8809_v7, %v8810_v8  ;;  %v8812_v60 = vld [vmem:[#allocation32_spill] sm:$0xff]  ;;  %v8813_v47 = vld [vmem:[#allocation107_spill] sm:$0xff]  ;;  %v8816_v3 = vld [vmem:[#allocation102_spill] sm:$0xff] }
 0x36c   :  { %v7229_v34 = vmax.f32 %v8805_v11, %v2992_v56  ;;  %v8814_v1 = vmax.f32 %v8812_v60, %v8813_v47  ;;  %v8817_v20 = vmax.f32 %v8815_v38, %v8816_v3  ;;  %v8818_v9 = vld [vmem:[#allocation38_spill] sm:$0xff]  ;;  %v8819_v11 = vld [vmem:[#allocation105_spill] sm:$0xff]  ;;  %v8825_v8 = vld [vmem:[#allocation36_spill] sm:$0xff]  ;;  %v3051_v3 = vmax.f32 %v3001_v21, 0.0 }
 0x36d   :  { %v7234_v33 = vmax.f32 %v8808_v54, %v2993_v46  ;;  %v7239_v27 = vmax.f32 %v8811_v39, %v2994_v55  ;;  %v8820_v5 = vmax.f32 %v8818_v9, %v8819_v11  ;;  %v8822_v57 = vld [vmem:[#allocation34_spill] sm:$0xff]  ;;  %v8826_v39 = vld [vmem:[#allocation113_spill] sm:$0xff]  ;;  %v8832_v11 = vld [vmem:[#allocation144_spill] sm:$0xff]  ;;  %v3062_v21 = vmax.f32 %v7079_v16, 0.0 }
 0x36e   :  { %v7244_v58 = vmax.f32 %v8814_v1, %v2995_v42  ;;  %v7249_v56 = vmax.f32 %v8817_v20, %v2996_v24  ;;  %v8823_v54 = vld [vmem:[#allocation110_spill] sm:$0xff]  ;;  %v8827_v60 = vmax.f32 %v8825_v8, %v8826_v39  ;;  %v8828_v47 = vld [vmem:[#allocation41_spill] sm:$0xff]  ;;  %v8829_v1 = vld [vmem:[#allocation108_spill] sm:$0xff]  ;;  %v3052_v20 = vmax.f32 %v3002_v59, 0.0  ;;  %3101 = vst [vmem:[%s7472_s3] sm:$0xff] %v3051_v3 }
 0x36f   :  { %v7254_v46 = vmax.f32 %v8820_v5, %v2997_v52  ;;  %v8824_v7 = vmax.f32 %v8822_v57, %v8823_v54  ;;  %v8830_v38 = vmax.f32 %v8828_v47, %v8829_v1  ;;  %v8831_v9 = vld [vmem:[#allocation130_spill] sm:$0xff]  ;;  %v3054_v5 = vmax.f32 %v8832_v11, 0.0  ;;  %3112 = vst [vmem:[%s7472_s3 + $0x58] sm:$0xff] %v3062_v21 }
 0x370   :  { %v7264_v42 = vmax.f32 %v8827_v60, %v2999_v12  ;;  %v3053_v52 = vmax.f32 %v8831_v9, 0.0  ;;  %v3058_v12 = vmax.f32 %v7059_v61, 0.0  ;;  %v3059_v8 = vmax.f32 %v7064_v10, 0.0  ;;  %3102 = vst [vmem:[%s7472_s3 + $0x8] sm:$0xff] %v3052_v20 }
 0x371   :  { %8821 = vst [vmem:[#allocation148_spill] sm:$0xff] %v7254_v46  ;;  %v7259_v55 = vmax.f32 %v8824_v7, %v2998_v41  ;;  %v7269_v24 = vmax.f32 %v8830_v38, %v3000_v4  ;;  %v8833_v46 = vld [vmem:[#allocation146_spill] sm:$0xff]  ;;  %v8834_v41 = vld [vmem:[#allocation145_spill] sm:$0xff]  ;;  %v3057_v7 = vmax.f32 %v7054_v32, 0.0  ;;  %v3060_v39 = vmax.f32 %v7069_v19, 0.0  ;;  %3104 = vst [vmem:[%s7472_s3 + $0x18] sm:$0xff] %v3054_v5 }
 0x372   :  { %v3055_v57 = vmax.f32 %v8833_v46, 0.0  ;;  %v3056_v54 = vmax.f32 %v8834_v41, 0.0  ;;  %v3061_v4 = vmax.f32 %v7074_v14, 0.0  ;;  %v3063_v59 = vmax.f32 %v7084_v63, 0.0  ;;  %3103 = vst [vmem:[%s7472_s3 + $0x10] sm:$0xff] %v3053_v52  ;;  %3108 = vst [vmem:[%s7472_s3 + $0x38] sm:$0xff] %v3058_v12 }
 0x373   :  { %v3064_v61 = vmax.f32 %v7089_v40, 0.0  ;;  %v3065_v32 = vmax.f32 %v7094_v45, 0.0  ;;  %v3066_v10 = vmax.f32 %v7099_v2, 0.0  ;;  %v3067_v19 = vmax.f32 %v7104_v43, 0.0  ;;  %3107 = vst [vmem:[%s7472_s3 + $0x30] sm:$0xff] %v3057_v7  ;;  %3109 = vst [vmem:[%s7472_s3 + $0x40] sm:$0xff] %v3059_v8 }
 0x374   :  { %3105 = vst [vmem:[%s7472_s3 + $0x20] sm:$0xff] %v3055_v57  ;;  %3106 = vst [vmem:[%s7472_s3 + $0x28] sm:$0xff] %v3056_v54  ;;  %v3068_v14 = vmax.f32 %v7109_v49, 0.0  ;;  %v3069_v16 = vmax.f32 %v7114_v30, 0.0  ;;  %v3070_v63 = vmax.f32 %v7119_v18, 0.0  ;;  %v3071_v40 = vmax.f32 %v7124_v13, 0.0 }
 0x375   :  { %3110 = vst [vmem:[%s7472_s3 + $0x48] sm:$0xff] %v3060_v39  ;;  %v3072_v45 = vmax.f32 %v7129_v0, 0.0  ;;  %3111 = vst [vmem:[%s7472_s3 + $0x50] sm:$0xff] %v3061_v4  ;;  %v3073_v2 = vmax.f32 %v7134_v44, 0.0  ;;  %v3074_v43 = vmax.f32 %v7139_v36, 0.0  ;;  %v3075_v49 = vmax.f32 %v7144_v15, 0.0 }
 0x376   :  { %3113 = vst [vmem:[%s7472_s3 + $0x60] sm:$0xff] %v3063_v59  ;;  %3114 = vst [vmem:[%s7472_s3 + $0x68] sm:$0xff] %v3064_v61  ;;  %v3076_v30 = vmax.f32 %v7149_v51, 0.0  ;;  %v3077_v18 = vmax.f32 %v7154_v35, 0.0  ;;  %v3078_v13 = vmax.f32 %v7159_v29, 0.0  ;;  %v3079_v0 = vmax.f32 %v7164_v37, 0.0 }
 0x377   :  { %3115 = vst [vmem:[%s7472_s3 + $0x70] sm:$0xff] %v3065_v32  ;;  %3116 = vst [vmem:[%s7472_s3 + $0x78] sm:$0xff] %v3066_v10  ;;  %v3080_v44 = vmax.f32 %v7169_v25, 0.0  ;;  %v3081_v36 = vmax.f32 %v7174_v31, 0.0  ;;  %v3082_v15 = vmax.f32 %v7179_v17, 0.0  ;;  %v3083_v51 = vmax.f32 %v7184_v62, 0.0 }
 0x378   :  { %3117 = vst [vmem:[%s7472_s3 + $0x80] sm:$0xff] %v3067_v19  ;;  %3118 = vst [vmem:[%s7472_s3 + $0x88] sm:$0xff] %v3068_v14  ;;  %v3084_v35 = vmax.f32 %v7189_v53, 0.0  ;;  %v3085_v29 = vmax.f32 %v7194_v48, 0.0  ;;  %v3086_v37 = vmax.f32 %v7199_v23, 0.0  ;;  %v3087_v25 = vmax.f32 %v7204_v22, 0.0 }
 0x379   :  { %3119 = vst [vmem:[%s7472_s3 + $0x90] sm:$0xff] %v3069_v16  ;;  %3120 = vst [vmem:[%s7472_s3 + $0x98] sm:$0xff] %v3070_v63  ;;  %v3088_v31 = vmax.f32 %v7209_v28, 0.0  ;;  %v3089_v17 = vmax.f32 %v7214_v50, 0.0  ;;  %v3090_v62 = vmax.f32 %v7219_v6, 0.0  ;;  %v3091_v53 = vmax.f32 %v7224_v26, 0.0 }
 0x37a   :  { %3121 = vst [vmem:[%s7472_s3 + $0xa0] sm:$0xff] %v3071_v40  ;;  %3122 = vst [vmem:[%s7472_s3 + $0xa8] sm:$0xff] %v3072_v45  ;;  %v3092_v48 = vmax.f32 %v7229_v34, 0.0  ;;  %v3093_v23 = vmax.f32 %v7234_v33, 0.0  ;;  %v3094_v22 = vmax.f32 %v7239_v27, 0.0  ;;  %v3095_v28 = vmax.f32 %v7244_v58, 0.0 }
 0x37b   :  { %3123 = vst [vmem:[%s7472_s3 + $0xb0] sm:$0xff] %v3073_v2  ;;  %3124 = vst [vmem:[%s7472_s3 + $0xb8] sm:$0xff] %v3074_v43  ;;  %v3096_v50 = vmax.f32 %v7249_v56, 0.0  ;;  %v8835_v6 = vld [vmem:[#allocation148_spill] sm:$0xff]  ;;  %v3098_v34 = vmax.f32 %v7259_v55, 0.0  ;;  %v3099_v33 = vmax.f32 %v7264_v42, 0.0 }
 0x37c   :  { %3125 = vst [vmem:[%s7472_s3 + $0xc0] sm:$0xff] %v3075_v49  ;;  %3126 = vst [vmem:[%s7472_s3 + $0xc8] sm:$0xff] %v3076_v30  ;;  %v3097_v26 = vmax.f32 %v8835_v6, 0.0  ;;  %v3100_v27 = vmax.f32 %v7269_v24, 0.0 }
 0x37d   :  { %3127 = vst [vmem:[%s7472_s3 + $0xd0] sm:$0xff] %v3077_v18  ;;  %3128 = vst [vmem:[%s7472_s3 + $0xd8] sm:$0xff] %v3078_v13 }
 0x37e   :  { %3129 = vst [vmem:[%s7472_s3 + $0xe0] sm:$0xff] %v3079_v0  ;;  %3130 = vst [vmem:[%s7472_s3 + $0xe8] sm:$0xff] %v3080_v44 }
 0x37f   :  { %3131 = vst [vmem:[%s7472_s3 + $0xf0] sm:$0xff] %v3081_v36  ;;  %3132 = vst [vmem:[%s7472_s3 + $0xf8] sm:$0xff] %v3082_v15 }
 0x380   :  { %3133 = vst [vmem:[%s7472_s3 + $0x100] sm:$0xff] %v3083_v51  ;;  %3134 = vst [vmem:[%s7472_s3 + $0x108] sm:$0xff] %v3084_v35 }
 0x381   :  { %3135 = vst [vmem:[%s7472_s3 + $0x110] sm:$0xff] %v3085_v29  ;;  %3136 = vst [vmem:[%s7472_s3 + $0x118] sm:$0xff] %v3086_v37 }
 0x382   :  { %3137 = vst [vmem:[%s7472_s3 + $0x120] sm:$0xff] %v3087_v25  ;;  %3138 = vst [vmem:[%s7472_s3 + $0x128] sm:$0xff] %v3088_v31 }
 0x383   :  { %3139 = vst [vmem:[%s7472_s3 + $0x130] sm:$0xff] %v3089_v17  ;;  %3140 = vst [vmem:[%s7472_s3 + $0x138] sm:$0xff] %v3090_v62 }
 0x384   :  { %3141 = vst [vmem:[%s7472_s3 + $0x140] sm:$0xff] %v3091_v53  ;;  %3142 = vst [vmem:[%s7472_s3 + $0x148] sm:$0xff] %v3092_v48 }
 0x385   :  { %3143 = vst [vmem:[%s7472_s3 + $0x150] sm:$0xff] %v3093_v23  ;;  %3144 = vst [vmem:[%s7472_s3 + $0x158] sm:$0xff] %v3094_v22 }
 0x386   :  { %3145 = vst [vmem:[%s7472_s3 + $0x160] sm:$0xff] %v3095_v28  ;;  %3146 = vst [vmem:[%s7472_s3 + $0x168] sm:$0xff] %v3096_v50 }
 0x387   :  { %3147 = vst [vmem:[%s7472_s3 + $0x170] sm:$0xff] %v3097_v26  ;;  %3148 = vst [vmem:[%s7472_s3 + $0x178] sm:$0xff] %v3098_v34 }
 0x388   :  { %3149 = vst [vmem:[%s7472_s3 + $0x180] sm:$0xff] %v3099_v33  ;;  %3150 = vst [vmem:[%s7472_s3 + $0x188] sm:$0xff] %v3100_v27 }

// kernel: netbn_forward.4
= control target key start
LH: loop header
LB: loop body
LE: loop exit
PB: predicated region body
PF: predicated region fallthrough
CT: control target
= control target key end

     0   :  { %v854_v0 = vmov 0   ;;  %vm267_vm0 = vcmask 179200   ;;  %vm316_vm1 = vcmask 1042432   ;;  %s1239_s1 = inlined_call_operand.vmem [shape: bf16[150,128], index: 1, kind: input, shape index: {}]   ;;  %s1240_s0 = inlined_call_operand.vmem [shape: bf16[4,64,150], index: 0, kind: input, shape index: {}]   ;;  %s1241_s2 = inlined_call_operand.vmem [shape: f32[8,128], index: 2, kind: input, shape index: {}]   ;;  %s1242_s3 = inlined_call_operand.vmem [shape: f32[64,128], index: 3, kind: output, shape index: {}]  }
   0x1   :  { %320 = vmatprep.subr.bf16.mxu0 %v854_v0  ;;  %v794_v1 = vld [vmem:[%s1239_s1 + $0x38] sm:$0xff]   ;;  %773 = vmatprep.subr.bf16.mxu1 %v854_v0  ;;  %v795_v2 = vld [vmem:[%s1239_s1 + $0x30] sm:$0xff]   ;;  %v796_v3 = vld [vmem:[%s1239_s1 + $0x28] sm:$0xff]  }
   0x2   :  { %321 = vmatpush1.bf16.msra.mxu0 %v794_v1  ;;  %783 = vmatpush1.bf16.msra.mxu1 %v794_v1  ;;  %v797_v4 = vld [vmem:[%s1239_s1 + $0x20] sm:$0xff]   ;;  %v798_v6 = vld [vmem:[%s1239_s1 + $0x18] sm:$0xff]   ;;  %v799_v8 = vld [vmem:[%s1239_s1 + $0x10] sm:$0xff]  }
   0x3   :  { %322 = vmatprep.subr.bf16.mxu0 %v854_v0  ;;  %774 = vmatprep.subr.bf16.mxu1 %v854_v0  ;;  %v806_v5 = vld [vmem:[%s1240_s0 + $0x4] ss:$8 sps:$4 sm:$0xff]   ;;  %v802_v11 = vld [vmem:[%s1239_s1 + $0x48] ss:$0 sps:$4 sm:$0x77]  }
   0x4   :  { %757 = vmatprep.mubr.msk.bf16.mxu0 %vm267_vm0, %v806_v5  ;;  %v818_v7 = vld [vmem:[%s1240_s0 + $0x84] ss:$8 sps:$4 sm:$0xff]   ;;  %v318_v12 = vsel %vm316_vm1, %v802_v11, 0  ;;  %v804_v14 = vld [vmem:[%s1240_s0] ss:$8 sps:$4 sm:$0xff]  }
   0x5   :  { %765 = vmatprep.mubr.msk.bf16.mxu1 %vm267_vm0, %v818_v7  ;;  %v800_v9 = vld [vmem:[%s1239_s1 + $0x8] sm:$0xff]   ;;  %v801_v10 = vld [vmem:[%s1239_s1] sm:$0xff]   ;;  %v807_v16 = vld [vmem:[%s1240_s0 + $0x14] ss:$8 sps:$4 sm:$0xff]  }
   0x6   :  { %323 = vmatpush1.bf16.msra.mxu0 %v795_v2  ;;  %784 = vmatpush1.bf16.msra.mxu1 %v795_v2  ;;  %v803_v13 = vld [vmem:[%s1239_s1 + $0x40] sm:$0xff]   ;;  %v822_v17 = vld [vmem:[%s1240_s0 + $0x94] ss:$8 sps:$4 sm:$0xff]   ;;  %v809_v18 = vld [vmem:[%s1240_s0 + $0x10] ss:$8 sps:$4 sm:$0xff]  }
   0x7   :  { %324 = vmatprep.subr.bf16.mxu0 %v854_v0  ;;  %775 = vmatprep.subr.bf16.mxu1 %v854_v0  ;;  %v816_v15 = vld [vmem:[%s1240_s0 + $0x80] ss:$8 sps:$4 sm:$0xff]   ;;  %v824_v19 = vld [vmem:[%s1240_s0 + $0x90] ss:$8 sps:$4 sm:$0xff]   ;;  %v810_v20 = vld [vmem:[%s1240_s0 + $0x24] ss:$8 sps:$4 sm:$0xff]  }
   0x8   :  { %v828_v21 = vld [vmem:[%s1240_s0 + $0xa4] ss:$8 sps:$4 sm:$0xff]   ;;  %v812_v22 = vld [vmem:[%s1240_s0 + $0x20] ss:$8 sps:$4 sm:$0xff]   ;;  %v813_v24 = vld [vmem:[%s1240_s0 + $0x34] ss:$8 sps:$4 sm:$0xff]  }
   0x9   :  { %v830_v23 = vld [vmem:[%s1240_s0 + $0xa0] ss:$8 sps:$4 sm:$0xff]   ;;  %v834_v25 = vld [vmem:[%s1240_s0 + $0xb4] ss:$8 sps:$4 sm:$0xff]   ;;  %v815_v26 = vld [vmem:[%s1240_s0 + $0x30] ss:$8 sps:$4 sm:$0xff]  }
   0xa   :  { %325 = vmatpush1.bf16.msra.mxu0 %v796_v3  ;;  %785 = vmatpush1.bf16.msra.mxu1 %v796_v3  ;;  %v836_v27 = vld [vmem:[%s1240_s0 + $0xb0] ss:$8 sps:$4 sm:$0xff]   ;;  %v819_v28 = vld [vmem:[%s1240_s0 + $0x44] ss:$8 sps:$4 sm:$0xff]   ;;  %v821_v30 = vld [vmem:[%s1240_s0 + $0x40] ss:$8 sps:$4 sm:$0xff]  }
   0xb   :  { %326 = vmatprep.subr.bf16.mxu0 %v854_v0  ;;  %776 = vmatprep.subr.bf16.mxu1 %v854_v0  ;;  %v840_v29 = vld [vmem:[%s1240_s0 + $0xc4] ss:$8 sps:$4 sm:$0xff]   ;;  %v842_v31 = vld [vmem:[%s1240_s0 + $0xc0] ss:$8 sps:$4 sm:$0xff]   ;;  %v825_v32 = vld [vmem:[%s1240_s0 + $0x54] ss:$8 sps:$4 sm:$0xff]  }
   0xc   :  { %v843_v33 = vld [vmem:[%s1240_s0 + $0xd4] ss:$8 sps:$4 sm:$0xff]   ;;  %v827_v34 = vld [vmem:[%s1240_s0 + $0x50] ss:$8 sps:$4 sm:$0xff]   ;;  %v831_v36 = vld [vmem:[%s1240_s0 + $0x64] ss:$8 sps:$4 sm:$0xff]  }
   0xd   :  { %v845_v35 = vld [vmem:[%s1240_s0 + $0xd0] ss:$8 sps:$4 sm:$0xff]   ;;  %v846_v37 = vld [vmem:[%s1240_s0 + $0xe4] ss:$8 sps:$4 sm:$0xff]   ;;  %v833_v38 = vld [vmem:[%s1240_s0 + $0x60] ss:$8 sps:$4 sm:$0xff]  }
   0xe   :  { %327 = vmatpush1.bf16.msra.mxu0 %v797_v4  ;;  %786 = vmatpush1.bf16.msra.mxu1 %v797_v4  ;;  %v848_v39 = vld [vmem:[%s1240_s0 + $0xe0] ss:$8 sps:$4 sm:$0xff]   ;;  %v837_v40 = vld [vmem:[%s1240_s0 + $0x74] ss:$8 sps:$4 sm:$0xff]   ;;  %v839_v42 = vld [vmem:[%s1240_s0 + $0x70] ss:$8 sps:$4 sm:$0xff]  }
   0xf   :  { %328 = vmatprep.subr.bf16.mxu0 %v854_v0  ;;  %777 = vmatprep.subr.bf16.mxu1 %v854_v0  ;;  %v849_v41 = vld [vmem:[%s1240_s0 + $0xf4] ss:$8 sps:$4 sm:$0xff]   ;;  %v851_v43 = vld [vmem:[%s1240_s0 + $0xf0] ss:$8 sps:$4 sm:$0xff]  }
  0x12   :  { %329 = vmatpush1.bf16.msra.mxu0 %v798_v6  ;;  %787 = vmatpush1.bf16.msra.mxu1 %v798_v6 }
  0x13   :  { %330 = vmatprep.subr.bf16.mxu0 %v854_v0  ;;  %778 = vmatprep.subr.bf16.mxu1 %v854_v0 }
  0x16   :  { %331 = vmatpush1.bf16.msra.mxu0 %v799_v8  ;;  %788 = vmatpush1.bf16.msra.mxu1 %v799_v8 }
  0x17   :  { %332 = vmatprep.subr.bf16.mxu0 %v854_v0  ;;  %779 = vmatprep.subr.bf16.mxu1 %v854_v0 }
  0x1a   :  { %333 = vmatpush1.bf16.msra.mxu0 %v800_v9  ;;  %789 = vmatpush1.bf16.msra.mxu1 %v800_v9 }
  0x1b   :  { %334 = vmatprep.subr.bf16.mxu0 %v854_v0  ;;  %780 = vmatprep.subr.bf16.mxu1 %v854_v0 }
  0x1e   :  { %335 = vmatpush1.bf16.msra.mxu0 %v801_v10  ;;  %790 = vmatpush1.bf16.msra.mxu1 %v801_v10 }
  0x1f   :  { %348 = vmatprep.subr.bf16.mxu0 %v854_v0  ;;  %781 = vmatprep.subr.bf16.mxu1 %v854_v0 }
  0x22   :  { %349 = vmatpush2.bf16.msra.mxu0 %v318_v12  ;;  %791 = vmatpush2.bf16.msra.mxu1 %v318_v12 }
  0x23   :  { %350 = vmatprep.subr.bf16.mxu0 %v854_v0  ;;  %782 = vmatprep.subr.bf16.mxu1 %v854_v0 }
  0x26   :  { %351 = vmatpush2.bf16.msra.mxu0 %v803_v13  ;;  %792 = vmatpush2.bf16.msra.mxu1 %v803_v13 }
  0x29   :  { %353 = vmatmul.mubr.bf16.vlgmr.msra.gmra.mxu0 %v804_v14  ;;  %417 = vmatmul.mubr.bf16.vlgmr.msra.gmra.mxu1 %v816_v15 }
  0x2a   :  { %758 = vmatprep.mubr.msk.bf16.mxu0 %vm267_vm0, %v807_v16  ;;  %766 = vmatprep.mubr.msk.bf16.mxu1 %vm267_vm0, %v822_v17 }
  0x31   :  { %361 = vmatmul.mubr.bf16.gmra.mxu0 %v809_v18  ;;  %425 = vmatmul.mubr.bf16.gmra.mxu1 %v824_v19 }
  0x32   :  { %759 = vmatprep.mubr.msk.bf16.mxu0 %vm267_vm0, %v810_v20  ;;  %767 = vmatprep.mubr.msk.bf16.mxu1 %vm267_vm0, %v828_v21 }
  0x39   :  { %369 = vmatmul.mubr.bf16.gmra.mxu0 %v812_v22  ;;  %433 = vmatmul.mubr.bf16.gmra.mxu1 %v830_v23 }
  0x3a   :  { %760 = vmatprep.mubr.msk.bf16.mxu0 %vm267_vm0, %v813_v24  ;;  %768 = vmatprep.mubr.msk.bf16.mxu1 %vm267_vm0, %v834_v25 }
  0x41   :  { %377 = vmatmul.mubr.bf16.gmra.mxu0 %v815_v26  ;;  %441 = vmatmul.mubr.bf16.gmra.mxu1 %v836_v27 }
  0x42   :  { %761 = vmatprep.mubr.msk.bf16.mxu0 %vm267_vm0, %v819_v28  ;;  %769 = vmatprep.mubr.msk.bf16.mxu1 %vm267_vm0, %v840_v29 }
  0x49   :  { %385 = vmatmul.mubr.bf16.gmra.mxu0 %v821_v30  ;;  %449 = vmatmul.mubr.bf16.gmra.mxu1 %v842_v31 }
  0x4a   :  { %762 = vmatprep.mubr.msk.bf16.mxu0 %vm267_vm0, %v825_v32  ;;  %770 = vmatprep.mubr.msk.bf16.mxu1 %vm267_vm0, %v843_v33 }
  0x51   :  { %393 = vmatmul.mubr.bf16.gmra.mxu0 %v827_v34  ;;  %457 = vmatmul.mubr.bf16.gmra.mxu1 %v845_v35 }
  0x52   :  { %763 = vmatprep.mubr.msk.bf16.mxu0 %vm267_vm0, %v831_v36  ;;  %771 = vmatprep.mubr.msk.bf16.mxu1 %vm267_vm0, %v846_v37 }
  0x59   :  { %401 = vmatmul.mubr.bf16.gmra.mxu0 %v833_v38  ;;  %465 = vmatmul.mubr.bf16.gmra.mxu1 %v848_v39 }
  0x5a   :  { %764 = vmatprep.mubr.msk.bf16.mxu0 %vm267_vm0, %v837_v40  ;;  %772 = vmatprep.mubr.msk.bf16.mxu1 %vm267_vm0, %v849_v41 }
  0x61   :  { %409 = vmatmul.mubr.bf16.gmra.mxu0 %v839_v42  ;;  %473 = vmatmul.mubr.bf16.gmra.mxu1 %v851_v43 }
  0xe9   :  { %v1017_v44 = vpop.f32.mrf.mxu0  ;;  %v1019_v45 = vpop.f32.mrf.mxu1 }
  0xea   :  { %v518_v15 = vmul.f32 %v1017_v44, %v1017_v44 }
  0xeb   :  { %v356_v46 = vpop.f32.mrf.mxu0  ;;  %v420_v47 = vpop.f32.mrf.mxu1 }
  0xed   :  { %v1021_v48 = vpop.f32.mrf.mxu0  ;;  %v1023_v49 = vpop.f32.mrf.mxu1 }
  0xee   :  { %v519_v12 = vmul.f32 %v1021_v48, %v1021_v48  ;;  %v481_v16 = vadd.f32 %v1021_v48, %v1017_v44 }
  0xef   :  { %v359_v50 = vpop.f32.mrf.mxu0  ;;  %v423_v51 = vpop.f32.mrf.mxu1 }
  0xf0   :  { %v550_v20 = vadd.f32 %v519_v12, %v518_v15 }
  0xf1   :  { %v1025_v52 = vpop.f32.mrf.mxu0  ;;  %v1027_v53 = vpop.f32.mrf.mxu1 }
  0xf2   :  { %v520_v17 = vmul.f32 %v1025_v52, %v1025_v52  ;;  %v482_v21 = vadd.f32 %v481_v16, %v1025_v52 }
  0xf3   :  { %v364_v54 = vpop.f32.mrf.mxu0  ;;  %v428_v55 = vpop.f32.mrf.mxu1 }
  0xf4   :  { %v551_v25 = vadd.f32 %v550_v20, %v520_v17 }
  0xf5   :  { %v1029_v56 = vpop.f32.mrf.mxu0  ;;  %v1031_v57 = vpop.f32.mrf.mxu1 }
  0xf6   :  { %v521_v22 = vmul.f32 %v1029_v56, %v1029_v56  ;;  %v483_v26 = vadd.f32 %v482_v21, %v1029_v56 }
  0xf7   :  { %v367_v58 = vpop.f32.mrf.mxu0  ;;  %v431_v59 = vpop.f32.mrf.mxu1 }
  0xf8   :  { %v552_v30 = vadd.f32 %v551_v25, %v521_v22 }
  0xf9   :  { %v1033_v60 = vpop.f32.mrf.mxu0  ;;  %v1035_v61 = vpop.f32.mrf.mxu1 }
  0xfa   :  { %v522_v27 = vmul.f32 %v1033_v60, %v1033_v60  ;;  %v484_v31 = vadd.f32 %v483_v26, %v1033_v60 }
  0xfb   :  { %v372_v62 = vpop.f32.mrf.mxu0  ;;  %v436_v63 = vpop.f32.mrf.mxu1 }
  0xfc   :  { %v553_v35 = vadd.f32 %v552_v30, %v522_v27 }
  0xfd   :  { %v1037_v0 = vpop.f32.mrf.mxu0  ;;  %v1039_v1 = vpop.f32.mrf.mxu1 }
  0xfe   :  { %v523_v32 = vmul.f32 %v1037_v0, %v1037_v0  ;;  %v485_v36 = vadd.f32 %v484_v31, %v1037_v0 }
  0xff   :  { %v375_v2 = vpop.f32.mrf.mxu0  ;;  %v439_v3 = vpop.f32.mrf.mxu1 }
 0x100   :  { %v554_v40 = vadd.f32 %v553_v35, %v523_v32 }
 0x101   :  { %v1041_v4 = vpop.f32.mrf.mxu0  ;;  %v1043_v5 = vpop.f32.mrf.mxu1 }
 0x102   :  { %v524_v37 = vmul.f32 %v1041_v4, %v1041_v4  ;;  %v486_v41 = vadd.f32 %v485_v36, %v1041_v4 }
 0x103   :  { %v380_v6 = vpop.f32.mrf.mxu0  ;;  %v444_v7 = vpop.f32.mrf.mxu1 }
 0x104   :  { %v555_v47 = vadd.f32 %v554_v40, %v524_v37 }
 0x105   :  { %v1045_v8 = vpop.f32.mrf.mxu0  ;;  %v1047_v9 = vpop.f32.mrf.mxu1 }
 0x106   :  { %v525_v42 = vmul.f32 %v1045_v8, %v1045_v8  ;;  %v487_v50 = vadd.f32 %v486_v41, %v1045_v8 }
 0x107   :  { %v383_v10 = vpop.f32.mrf.mxu0  ;;  %v447_v11 = vpop.f32.mrf.mxu1 }
 0x108   :  { %v556_v58 = vadd.f32 %v555_v47, %v525_v42 }
 0x109   :  { %v1051_v13 = vpop.f32.mrf.mxu0  ;;  %v1053_v14 = vpop.f32.mrf.mxu1 }
 0x10a   :  { %v526_v51 = vmul.f32 %v1051_v13, %v1051_v13  ;;  %v488_v59 = vadd.f32 %v487_v50, %v1051_v13 }
 0x10b   :  { %v388_v18 = vpop.f32.mrf.mxu0  ;;  %v452_v19 = vpop.f32.mrf.mxu1 }
 0x10c   :  { %v557_v3 = vadd.f32 %v556_v58, %v526_v51 }
 0x10d   :  { %v1064_v23 = vpop.f32.mrf.mxu0  ;;  %v1066_v24 = vpop.f32.mrf.mxu1 }
 0x10e   :  { %v527_v62 = vmul.f32 %v1064_v23, %v1064_v23  ;;  %v489_v6 = vadd.f32 %v488_v59, %v1064_v23 }
 0x10f   :  { %v391_v28 = vpop.f32.mrf.mxu0  ;;  %v455_v29 = vpop.f32.mrf.mxu1 }
 0x110   :  { %v558_v12 = vadd.f32 %v557_v3, %v527_v62  ;;  %v535_v62 = vmul.f32 %v1023_v49, %v1023_v49 }
 0x111   :  { %v1074_v33 = vpop.f32.mrf.mxu0  ;;  %v1076_v34 = vpop.f32.mrf.mxu1 }
 0x112   :  { %v528_v7 = vmul.f32 %v1074_v33, %v1074_v33  ;;  %v490_v15 = vadd.f32 %v489_v6, %v1074_v33 }
 0x113   :  { %v396_v38 = vpop.f32.mrf.mxu0  ;;  %v460_v39 = vpop.f32.mrf.mxu1 }
 0x114   :  { %v559_v19 = vadd.f32 %v558_v12, %v528_v7  ;;  %v536_v7 = vmul.f32 %v1027_v53, %v1027_v53  ;;  %v537_v12 = vmul.f32 %v1031_v57, %v1031_v57 }
 0x115   :  { %v1084_v43 = vpop.f32.mrf.mxu0  ;;  %v1086_v46 = vpop.f32.mrf.mxu1 }
 0x116   :  { %v529_v16 = vmul.f32 %v1084_v43, %v1084_v43  ;;  %v491_v20 = vadd.f32 %v490_v15, %v1084_v43 }
 0x117   :  { %v399_v54 = vpop.f32.mrf.mxu0  ;;  %v463_v55 = vpop.f32.mrf.mxu1 }
 0x118   :  { %v560_v26 = vadd.f32 %v559_v19, %v529_v16  ;;  %v534_v55 = vmul.f32 %v1019_v45, %v1019_v45  ;;  %v538_v19 = vmul.f32 %v1035_v61, %v1035_v61 }
 0x119   :  { %v1094_v63 = vpop.f32.mrf.mxu0  ;;  %v1096_v2 = vpop.f32.mrf.mxu1 }
 0x11a   :  { %v530_v21 = vmul.f32 %v1094_v63, %v1094_v63  ;;  %v492_v27 = vadd.f32 %v491_v20, %v1094_v63 }
 0x11b   :  { %v404_v10 = vpop.f32.mrf.mxu0  ;;  %v468_v11 = vpop.f32.mrf.mxu1 }
 0x11c   :  { %v561_v31 = vadd.f32 %v560_v26, %v530_v21 }
 0x11d   :  { %v1104_v17 = vpop.f32.mrf.mxu0  ;;  %v1106_v18 = vpop.f32.mrf.mxu1 }
 0x11e   :  { %v531_v28 = vmul.f32 %v1104_v17, %v1104_v17  ;;  %v493_v32 = vadd.f32 %v492_v27, %v1104_v17  ;;  %v540_v27 = vmul.f32 %v1043_v5, %v1043_v5 }
 0x11f   :  { %v407_v22 = vpop.f32.mrf.mxu0  ;;  %v471_v25 = vpop.f32.mrf.mxu1 }
 0x120   :  { %v562_v38 = vadd.f32 %v561_v31, %v531_v28  ;;  %v539_v22 = vmul.f32 %v1039_v1, %v1039_v1 }
 0x121   :  { %v1114_v29 = vpop.f32.mrf.mxu0  ;;  %v1116_v30 = vpop.f32.mrf.mxu1 }
 0x122   :  { %v532_v35 = vmul.f32 %v1114_v29, %v1114_v29  ;;  %v494_v39 = vadd.f32 %v493_v32, %v1114_v29  ;;  %v541_v32 = vmul.f32 %v1047_v9, %v1047_v9 }
 0x123   :  { %v412_v36 = vpop.f32.mrf.mxu0  ;;  %v476_v37 = vpop.f32.mrf.mxu1 }
 0x124   :  { %v563_v42 = vadd.f32 %v562_v38, %v532_v35  ;;  %v542_v37 = vmul.f32 %v1053_v14, %v1053_v14 }
 0x125   :  { %v1122_v40 = vpop.f32.mrf.mxu0  ;;  %v1124_v41 = vpop.f32.mrf.mxu1 }
 0x126   :  { %v495_v47 = vadd.f32 %v494_v39, %v1122_v40  ;;  %v533_v50 = vmul.f32 %v1122_v40, %v1122_v40 }
 0x127   :  { %v415_v51 = vpop.f32.mrf.mxu0  ;;  %v479_v54 = vpop.f32.mrf.mxu1 }
 0x128   :  { %v496_v58 = vadd.f32 %v495_v47, %v1019_v45  ;;  %v564_v59 = vadd.f32 %v563_v42, %v533_v50  ;;  %v543_v47 = vmul.f32 %v1066_v24, %v1066_v24 }
 0x12a   :  { %v497_v3 = vadd.f32 %v496_v58, %v1023_v49  ;;  %v565_v6 = vadd.f32 %v564_v59, %v534_v55  ;;  %v544_v55 = vmul.f32 %v1076_v34, %v1076_v34 }
 0x12c   :  { %v498_v10 = vadd.f32 %v497_v3, %v1027_v53  ;;  %v566_v11 = vadd.f32 %v565_v6, %v535_v62  ;;  %v545_v62 = vmul.f32 %v1086_v46, %v1086_v46 }
 0x12e   :  { %v499_v15 = vadd.f32 %v498_v10, %v1031_v57  ;;  %v567_v16 = vadd.f32 %v566_v11, %v536_v7  ;;  %v546_v7 = vmul.f32 %v1096_v2, %v1096_v2 }
 0x130   :  { %v568_v20 = vadd.f32 %v567_v16, %v537_v12  ;;  %v500_v21 = vadd.f32 %v499_v15, %v1035_v61  ;;  %v547_v12 = vmul.f32 %v1106_v18, %v1106_v18 }
 0x132   :  { %v501_v25 = vadd.f32 %v500_v21, %v1039_v1  ;;  %v569_v26 = vadd.f32 %v568_v20, %v538_v19  ;;  %v548_v19 = vmul.f32 %v1116_v30, %v1116_v30 }
 0x134   :  { %v502_v28 = vadd.f32 %v501_v25, %v1043_v5  ;;  %v570_v31 = vadd.f32 %v569_v26, %v539_v22  ;;  %v549_v22 = vmul.f32 %v1124_v41, %v1124_v41 }
 0x136   :  { %v503_v35 = vadd.f32 %v502_v28, %v1047_v9  ;;  %v571_v36 = vadd.f32 %v570_v31, %v540_v27 }
 0x138   :  { %v504_v38 = vadd.f32 %v503_v35, %v1053_v14  ;;  %v572_v39 = vadd.f32 %v571_v36, %v541_v32 }
 0x13a   :  { %v505_v42 = vadd.f32 %v504_v38, %v1066_v24  ;;  %v573_v50 = vadd.f32 %v572_v39, %v542_v37 }
 0x13c   :  { %v574_v51 = vadd.f32 %v573_v50, %v543_v47  ;;  %v506_v54 = vadd.f32 %v505_v42, %v1076_v34 }
 0x13e   :  { %v575_v58 = vadd.f32 %v574_v51, %v544_v55  ;;  %v507_v59 = vadd.f32 %v506_v54, %v1086_v46 }
 0x140   :  { %v576_v3 = vadd.f32 %v575_v58, %v545_v62  ;;  %v508_v6 = vadd.f32 %v507_v59, %v1096_v2  ;;  %v599_v62 = vlaneseq }
 0x142   :  { %v577_v10 = vadd.f32 %v576_v3, %v546_v7  ;;  %v509_v11 = vadd.f32 %v508_v6, %v1106_v18  ;;  %v600_v3 = vshrl.u32 %v599_v62, 7  ;;  %v587_v6 = vld [vmem:[%s1241_s2] sm:$0x1] }
 0x144   :  { %v578_v15 = vadd.f32 %v577_v10, %v547_v12  ;;  %v510_v16 = vadd.f32 %v509_v11, %v1116_v30  ;;  %v601_v7 = vsub.s32 0, %v600_v3  ;;  %v588_v12 = vld [vmem:[%s1241_s2 + $0x1] sm:$0x1] }
 0x146   :  { %v579_v20 = vadd.f32 %v578_v15, %v548_v19  ;;  %v511_v21 = vadd.f32 %v510_v16, %v1124_v41 }
 0x148   :  { %v512_v25 = vrot.slane %v511_v21, 4  ;;  %v580_v26 = vadd.f32 %v579_v20, %v549_v22 }
 0x14a   :  { %v513_v27 = vadd.f32 %v512_v25, %v511_v21  ;;  %v581_v28 = vrot.slane %v580_v26, 4 }
 0x14c   :  { %v514_v31 = vrot.slane %v513_v27, 2  ;;  %v582_v32 = vadd.f32 %v581_v28, %v580_v26 }
 0x14e   :  { %v515_v35 = vadd.f32 %v514_v31, %v513_v27  ;;  %v583_v36 = vrot.slane %v582_v32, 2 }
 0x150   :  { %v516_v37 = vrot.slane %v515_v35, 1  ;;  %v584_v38 = vadd.f32 %v583_v36, %v582_v32 }
 0x152   :  { %v517_v39 = vadd.f32 %v516_v37, %v515_v35  ;;  %v585_v42 = vrot.slane %v584_v38, 1 }
 0x154   :  { %v586_v47 = vadd.f32 %v585_v42, %v584_v38  ;;  %v589_v50 = vmul.f32 0.005, %v517_v39 }
 0x156   :  { %v590_v51 = vmul.f32 0.005, %v586_v47  ;;  %v591_v54 = vmul.f32 %v589_v50, %v589_v50 }
 0x158   :  { %v592_v55 = vsub.f32 %v590_v51, %v591_v54 }
 0x15a   :  { %v593_v58 = vmax.f32 %v592_v55, 0.0 }
 0x15c   :  { %v594_v59 = vadd.f32 1e-05, %v593_v58 }
 0x15e   :  { %852 = vrsqrt.f32 %v594_v59 }
 0x16b   :  { %v853_v10 = vpop.eup %852 }
 0x16c   :  { %v596_v11 = vmul.f32 %v853_v10, %v587_v6 }
 0x16e   :  { %v597_v15 = vmul.f32 %v596_v11, %v589_v50  ;;  %v602_v16 = vrot.slane %v596_v11, %v601_v7 }
 0x170   :  { %v598_v19 = vsub.f32 %v588_v12, %v597_v15  ;;  %v603_v20 = vmul.f32 %v602_v16, %v1017_v44  ;;  %v604_v21 = vmul.f32 %v602_v16, %v1021_v48  ;;  %v605_v22 = vmul.f32 %v602_v16, %v1025_v52 }
 0x171   :  { %v606_v25 = vmul.f32 %v602_v16, %v1029_v56  ;;  %v607_v26 = vmul.f32 %v602_v16, %v1033_v60  ;;  %v608_v27 = vmul.f32 %v602_v16, %v1037_v0  ;;  %v609_v28 = vmul.f32 %v602_v16, %v1041_v4 }
 0x172   :  { %v610_v31 = vmul.f32 %v602_v16, %v1045_v8  ;;  %v611_v32 = vmul.f32 %v602_v16, %v1051_v13  ;;  %v612_v35 = vmul.f32 %v602_v16, %v1064_v23  ;;  %v613_v44 = vmul.f32 %v602_v16, %v1074_v33 }
 0x173   :  { %v614_v48 = vmul.f32 %v602_v16, %v1084_v43  ;;  %v615_v52 = vmul.f32 %v602_v16, %v1094_v63  ;;  %v616_v56 = vmul.f32 %v602_v16, %v1104_v17  ;;  %v617_v60 = vmul.f32 %v602_v16, %v1114_v29 }
 0x174   :  { %v618_v0 = vmul.f32 %v602_v16, %v1122_v40  ;;  %v619_v4 = vmul.f32 %v602_v16, %v1019_v45  ;;  %v620_v8 = vmul.f32 %v602_v16, %v1023_v49  ;;  %v621_v13 = vmul.f32 %v602_v16, %v1027_v53 }
 0x175   :  { %v622_v23 = vmul.f32 %v602_v16, %v1031_v57  ;;  %v623_v33 = vmul.f32 %v602_v16, %v1035_v61  ;;  %v624_v43 = vmul.f32 %v602_v16, %v1039_v1  ;;  %v625_v63 = vmul.f32 %v602_v16, %v1043_v5 }
 0x176   :  { %v626_v17 = vmul.f32 %v602_v16, %v1047_v9  ;;  %v627_v29 = vmul.f32 %v602_v16, %v1053_v14  ;;  %v628_v40 = vmul.f32 %v602_v16, %v1066_v24  ;;  %v629_v45 = vmul.f32 %v602_v16, %v1076_v34 }
 0x177   :  { %v630_v49 = vmul.f32 %v602_v16, %v1086_v46  ;;  %v638_v36 = vrot.slane %v598_v19, %v601_v7  ;;  %v631_v53 = vmul.f32 %v602_v16, %v1096_v2  ;;  %v632_v57 = vmul.f32 %v602_v16, %v1106_v18 }
 0x178   :  { %v633_v61 = vmul.f32 %v602_v16, %v1116_v30  ;;  %v634_v1 = vmul.f32 %v602_v16, %v1124_v41 }
 0x179   :  { %v639_v5 = vadd.f32 %v638_v36, %v603_v20  ;;  %v640_v37 = vadd.f32 %v638_v36, %v604_v21  ;;  %v641_v9 = vadd.f32 %v638_v36, %v605_v22  ;;  %v642_v38 = vadd.f32 %v638_v36, %v606_v25 }
 0x17a   :  { %v643_v14 = vadd.f32 %v638_v36, %v607_v26  ;;  %v644_v39 = vadd.f32 %v638_v36, %v608_v27  ;;  %v645_v24 = vadd.f32 %v638_v36, %v609_v28  ;;  %v646_v42 = vadd.f32 %v638_v36, %v610_v31 }
 0x17b   :  { %v647_v34 = vadd.f32 %v638_v36, %v611_v32  ;;  %v648_v47 = vadd.f32 %v638_v36, %v612_v35  ;;  %v649_v46 = vadd.f32 %v638_v36, %v613_v44  ;;  %v650_v50 = vadd.f32 %v638_v36, %v614_v48 }
 0x17c   :  { %v651_v51 = vadd.f32 %v638_v36, %v615_v52  ;;  %v652_v2 = vadd.f32 %v638_v36, %v616_v56  ;;  %v653_v54 = vadd.f32 %v638_v36, %v617_v60  ;;  %v654_v18 = vadd.f32 %v638_v36, %v618_v0 }
 0x17d   :  { %v655_v55 = vadd.f32 %v638_v36, %v619_v4  ;;  %v656_v30 = vadd.f32 %v638_v36, %v620_v8  ;;  %v657_v58 = vadd.f32 %v638_v36, %v621_v13  ;;  %v658_v41 = vadd.f32 %v638_v36, %v622_v23 }
 0x17e   :  { %v659_v59 = vadd.f32 %v638_v36, %v623_v33  ;;  %v660_v62 = vadd.f32 %v638_v36, %v624_v43  ;;  %v661_v3 = vadd.f32 %v638_v36, %v625_v63  ;;  %v662_v6 = vadd.f32 %v638_v36, %v626_v17 }
 0x17f   :  { %v663_v7 = vadd.f32 %v638_v36, %v627_v29  ;;  %v664_v10 = vadd.f32 %v638_v36, %v628_v40  ;;  %v665_v11 = vadd.f32 %v638_v36, %v629_v45  ;;  %v666_v12 = vadd.f32 %v638_v36, %v630_v49 }
 0x180   :  { %v667_v15 = vadd.f32 %v638_v36, %v631_v53  ;;  %v668_v16 = vadd.f32 %v638_v36, %v632_v57  ;;  %v669_v19 = vadd.f32 %v638_v36, %v633_v61  ;;  %v670_v20 = vadd.f32 %v638_v36, %v634_v1 }
 0x181   :  { %v671_v21 = vmax.f32 %v639_v5, %v647_v34  ;;  %v672_v22 = vmax.f32 %v640_v37, %v648_v47  ;;  %v673_v25 = vmax.f32 %v641_v9, %v649_v46  ;;  %v674_v26 = vmax.f32 %v642_v38, %v650_v50 }
 0x182   :  { %v675_v27 = vmax.f32 %v643_v14, %v651_v51  ;;  %v676_v28 = vmax.f32 %v644_v39, %v652_v2  ;;  %v677_v31 = vmax.f32 %v645_v24, %v653_v54  ;;  %v678_v32 = vmax.f32 %v646_v42, %v654_v18 }
 0x183   :  { %v679_v35 = vmax.f32 %v655_v55, %v663_v7  ;;  %v680_v44 = vmax.f32 %v656_v30, %v664_v10  ;;  %v681_v48 = vmax.f32 %v657_v58, %v665_v11  ;;  %v682_v52 = vmax.f32 %v658_v41, %v666_v12 }
 0x184   :  { %v683_v56 = vmax.f32 %v659_v59, %v667_v15  ;;  %v684_v60 = vmax.f32 %v660_v62, %v668_v16  ;;  %v685_v0 = vmax.f32 %v661_v3, %v669_v19  ;;  %v686_v4 = vmax.f32 %v662_v6, %v670_v20 }
 0x185   :  { %v687_v8 = vmax.f32 %v671_v21, %v679_v35  ;;  %v688_v13 = vmax.f32 %v672_v22, %v680_v44  ;;  %v689_v23 = vmax.f32 %v673_v25, %v681_v48  ;;  %v690_v33 = vmax.f32 %v674_v26, %v682_v52 }
 0x186   :  { %v691_v43 = vmax.f32 %v675_v27, %v683_v56  ;;  %v692_v63 = vmax.f32 %v676_v28, %v684_v60  ;;  %v693_v17 = vmax.f32 %v677_v31, %v685_v0  ;;  %v694_v29 = vmax.f32 %v678_v32, %v686_v4 }
 0x187   :  { %v695_v40 = vmax.f32 %v687_v8, 0.0  ;;  %v696_v45 = vmax.f32 %v688_v13, 0.0  ;;  %v697_v49 = vmax.f32 %v689_v23, 0.0  ;;  %v698_v36 = vmax.f32 %v690_v33, 0.0 }
 0x188   :  { %v699_v53 = vmax.f32 %v691_v43, 0.0  ;;  %v700_v57 = vmax.f32 %v692_v63, 0.0  ;;  %v701_v61 = vmax.f32 %v693_v17, 0.0  ;;  %v702_v1 = vmax.f32 %v694_v29, 0.0 }
 0x189   :  { %703 = vst [vmem:[%s1242_s3] sm:$0xff] %v695_v40  ;;  %704 = vst [vmem:[%s1242_s3 + $0x8] sm:$0xff] %v696_v45 }
 0x18a   :  { %705 = vst [vmem:[%s1242_s3 + $0x10] sm:$0xff] %v697_v49  ;;  %706 = vst [vmem:[%s1242_s3 + $0x18] sm:$0xff] %v698_v36 }
 0x18b   :  { %707 = vst [vmem:[%s1242_s3 + $0x20] sm:$0xff] %v699_v53  ;;  %708 = vst [vmem:[%s1242_s3 + $0x28] sm:$0xff] %v700_v57 }
 0x18c   :  { %709 = vst [vmem:[%s1242_s3 + $0x30] sm:$0xff] %v701_v61  ;;  %710 = vst [vmem:[%s1242_s3 + $0x38] sm:$0xff] %v702_v1 }

// kernel: netbn_forward.5
= control target key start
LH: loop header
LB: loop body
LE: loop exit
PB: predicated region body
PF: predicated region fallthrough
CT: control target
= control target key end

     0   :  { %v805_v1 = vmov 0   ;;  %v85_v21 = vlaneseq  ;;  %v806_v26 = vmov 1966171168   ;;  %vm251_vm0 = vcmask 130048   ;;  %s1013_s0 = inlined_call_operand.vmem [shape: bf16[2,400], index: 0, kind: input, shape index: {}]   ;;  %s1014_s1 = inlined_call_operand.vmem [shape: bf16[400,128], index: 1, kind: input, shape index: {}]   ;;  %s1015_s2 = inlined_call_operand.vmem [shape: bf16[128,128], index: 2, kind: input, shape index: {}]   ;;  %s1016_s3 = inlined_call_operand.vmem [shape: bf16[128,128], index: 3, kind: input, shape index: {}]   ;;  %s1017_s4 = inlined_call_operand.vmem [shape: f32[8,128], index: 4, kind: input, shape index: {}]   ;;  %s1018_s5 = inlined_call_operand.hbm [shape: f32[2,128], index: 5, kind: output, shape index: {}]  }
   0x1   :  { %v740_v0 = vld [vmem:[%s1014_s1 + $0x78] sm:$0xff]   ;;  %295 = vmatprep.subr.bf16.mxu1 %v805_v1  ;;  %v743_v4 = vld [vmem:[%s1014_s1 + $0x70] sm:$0xff]   ;;  %v746_v7 = vld [vmem:[%s1014_s1 + $0x68] sm:$0xff]   ;;  %v83_v27 = vunpack.c.l.s4 %v806_v26 }
   0x2   :  { %v741_v2 = vld [vmem:[%s1014_s1 + $0xb8] sm:$0xff]   ;;  %655 = vmatprep.subr.bf16.mxu0 %v740_v0  ;;  %v744_v5 = vld [vmem:[%s1014_s1 + $0xb0] sm:$0xff]   ;;  %v747_v8 = vld [vmem:[%s1014_s1 + $0xa8] sm:$0xff]   ;;  %v919_v28 = vshrl.u32 %v85_v21, 7 }
   0x3   :  { %v742_v3 = vld [vmem:[%s1014_s1 + $0x38] sm:$0xff]   ;;  %296 = vmatpush1.bf16.msra.mxu1 %v741_v2  ;;  %v745_v6 = vld [vmem:[%s1014_s1 + $0x30] sm:$0xff]   ;;  %v748_v9 = vld [vmem:[%s1014_s1 + $0x28] sm:$0xff]   ;;  %v84_v31 = vunpack.c.0.s8 %v83_v27 }
   0x4   :  { %656 = vmatpush3.bf16.msra.mxu0 %v742_v3  ;;  %297 = vmatprep.subr.bf16.mxu1 %v805_v1  ;;  %v749_v10 = vld [vmem:[%s1014_s1 + $0x60] sm:$0xff]   ;;  %v752_v13 = vld [vmem:[%s1014_s1 + $0x58] sm:$0xff]   ;;  %v755_v16 = vld [vmem:[%s1014_s1 + $0x50] sm:$0xff]  }
   0x5   :  { %657 = vmatprep.subr.bf16.mxu0 %v743_v4  ;;  %v750_v11 = vld [vmem:[%s1014_s1 + $0xa0] sm:$0xff]   ;;  %v753_v14 = vld [vmem:[%s1014_s1 + $0x98] sm:$0xff]   ;;  %v756_v17 = vld [vmem:[%s1014_s1 + $0x90] sm:$0xff]   ;;  %v87_v32 = vsub.s32 %v84_v31, %v919_v28 }
   0x6   :  { %v751_v12 = vld [vmem:[%s1014_s1 + $0x20] sm:$0xff]   ;;  %v754_v15 = vld [vmem:[%s1014_s1 + $0x18] sm:$0xff]   ;;  %v757_v18 = vld [vmem:[%s1014_s1 + $0x10] sm:$0xff]  }
   0x7   :  { %298 = vmatpush1.bf16.msra.mxu1 %v744_v5  ;;  %v758_v19 = vld [vmem:[%s1014_s1 + $0x48] sm:$0xff]   ;;  %v761_v23 = vld [vmem:[%s1014_s1 + $0x40] sm:$0xff]  }
   0x8   :  { %658 = vmatpush3.bf16.msra.mxu0 %v745_v6  ;;  %299 = vmatprep.subr.bf16.mxu1 %v805_v1  ;;  %v759_v20 = vld [vmem:[%s1014_s1 + $0x88] sm:$0xff]   ;;  %v610_v24 = vld.sshfl [vmem:[%s1013_s0] sm:$0x33 pattern:$0x75316420] }
   0x9   :  { %659 = vmatprep.subr.bf16.mxu0 %v746_v7  ;;  %v760_v22 = vld [vmem:[%s1014_s1 + $0x8] sm:$0xff]   ;;  %v762_v25 = vld [vmem:[%s1014_s1 + $0x80] sm:$0xff]   ;;  %v81_v30 = vcombine.high %v610_v24, %v610_v24  ;;  %v88_v35 = vrot.slane %v610_v24, %v87_v32 }
   0xa   :  { %v763_v29 = vld [vmem:[%s1014_s1] sm:$0xff]  }
   0xb   :  { %300 = vmatpush1.bf16.msra.mxu1 %v747_v8  ;;  %v764_v33 = vld [vmem:[%s1014_s1 + $0xc0] sm:$0xff]   ;;  %v95_v34 = vrot.slane %v81_v30, %v87_v32  ;;  %v96_v37 = vcombine.high %v88_v35, %v88_v35 }
   0xc   :  { %660 = vmatpush3.bf16.msra.mxu0 %v748_v9  ;;  %301 = vmatprep.subr.bf16.mxu1 %v805_v1 }
   0xd   :  { %661 = vmatprep.subr.bf16.mxu0 %v749_v10  ;;  %287 = vmatprep.mubr.bf16.mxu0 %v95_v34  ;;  %v97_v36 = vcombine.high %v95_v34, %v95_v34 }
   0xf   :  { %302 = vmatpush1.bf16.msra.mxu1 %v750_v11  ;;  %636 = vmatprep.mubr.msk.bf16.mxu1 %vm251_vm0, %v97_v36 }
  0x10   :  { %662 = vmatpush3.bf16.msra.mxu0 %v751_v12  ;;  %303 = vmatprep.subr.bf16.mxu1 %v805_v1 }
  0x11   :  { %663 = vmatprep.subr.bf16.mxu0 %v752_v13 }
  0x13   :  { %304 = vmatpush1.bf16.msra.mxu1 %v753_v14 }
  0x14   :  { %664 = vmatpush3.bf16.msra.mxu0 %v754_v15  ;;  %305 = vmatprep.subr.bf16.mxu1 %v805_v1 }
  0x15   :  { %665 = vmatprep.subr.bf16.mxu0 %v755_v16 }
  0x17   :  { %306 = vmatpush1.bf16.msra.mxu1 %v756_v17 }
  0x18   :  { %666 = vmatpush3.bf16.msra.mxu0 %v757_v18  ;;  %307 = vmatprep.subr.bf16.mxu1 %v805_v1 }
  0x19   :  { %667 = vmatprep.subr.bf16.mxu0 %v758_v19 }
  0x1b   :  { %308 = vmatpush1.bf16.msra.mxu1 %v759_v20 }
  0x1c   :  { %668 = vmatpush3.bf16.msra.mxu0 %v760_v22  ;;  %309 = vmatprep.subr.bf16.mxu1 %v805_v1 }
  0x1d   :  { %669 = vmatprep.subr.bf16.mxu0 %v761_v23 }
  0x1f   :  { %310 = vmatpush1.bf16.msra.mxu1 %v762_v25 }
  0x20   :  { %670 = vmatpush3.bf16.msra.mxu0 %v763_v29  ;;  %325 = vmatprep.subr.bf16.mxu1 %v805_v1 }
  0x23   :  { %288 = vmatmul.mubr.bf16.vlgmr.msra.gmra.mxu0 %v88_v35  ;;  %326 = vmatpush2.bf16.msra.mxu1 %v764_v33 }
  0x24   :  { %10 = vsyncpa [#allocation3], 0  ;;  %v765_v38 = vld [vmem:[%s1015_s2 + $0x38] sm:$0xff]   ;;  %v807_v39 = vmov 0.0   ;;  %v766_v40 = vld [vmem:[%s1015_s2 + $0x30] sm:$0xff]   ;;  %vm808_vm1 = vmmov 0  }
  0x25   :  { %695 = vmatprep.subr.bf16.mxu0 %v807_v39  ;;  %715 = vmatprep.subr.bf16.mxu1 %v807_v39  ;;  %v767_v41 = vld [vmem:[%s1015_s2 + $0x28] sm:$0xff]   ;;  %v768_v42 = vld [vmem:[%s1015_s2 + $0x20] sm:$0xff]   ;;  %v769_v43 = vld [vmem:[%s1015_s2 + $0x18] sm:$0xff]   ;;  %vm335_vm2 = vcmask 1041408   ;;  %v365_v21 = vsub.s32 0, %v919_v28  ;;  %s809_s30 = smov [#allocation2]  }
  0x26   :  { %328 = vmatmul.mubr.bf16.vlgmr.msra.gmra.mxu1 %v96_v37  ;;  %696 = vmatpush3.bf16.msra.mxu0 %v765_v38  ;;  %v770_v44 = vld [vmem:[%s1015_s2 + $0x10] sm:$0xff]   ;;  %v771_v45 = vld [vmem:[%s1015_s2 + $0x8] sm:$0xff]   ;;  %v772_v46 = vld [vmem:[%s1015_s2] sm:$0xff]   ;;  %s602_s6 = sshll.u32 %s809_s30, 4  ;;  %s603_s6 = int_to_ptr.vmem [resolvable:$true] %s602_s6 }
  0x27   :  { %697 = vmatprep.subr.bf16.mxu0 %v807_v39  ;;  %711 = vmatprep.mubr.msk.bf16.mxu0 %vm808_vm1, %v807_v39  ;;  %v773_v47 = vld [vmem:[%s1016_s3 + $0x38] sm:$0xff]   ;;  %v774_v48 = vld [vmem:[%s1016_s3 + $0x30] sm:$0xff]   ;;  %v775_v49 = vld [vmem:[%s1016_s3 + $0x28] sm:$0xff]   ;;  %p788_p1 = scmp.lt.s32.totalorder %s603_s6, %s603_s6 }
  0x28   :  { %731 = vmatprep.mubr.msk.bf16.mxu1 %vm808_vm1, %v807_v39  ;;  %716 = vmatpush3.bf16.msra.mxu1 %v773_v47  ;;  %v776_v50 = vld [vmem:[%s1016_s3 + $0x20] sm:$0xff]   ;;  %v777_v51 = vld [vmem:[%s1016_s3 + $0x18] sm:$0xff]   ;;  %v778_v52 = vld [vmem:[%s1016_s3 + $0x10] sm:$0xff]  }
  0x29   :  { %717 = vmatprep.subr.bf16.mxu1 %v807_v39  ;;  %v351_v20 = vld [vmem:[%s1017_s4] sm:$0x1]  ;;  %v352_v24 = vld [vmem:[%s1017_s4 + $0x1] sm:$0x1]  ;;  %v779_v34 = vld [vmem:[%s1016_s3 + $0x8] sm:$0xff]  }
  0x2a   :  { %698 = vmatpush3.bf16.msra.mxu0 %v766_v40  ;;  %v780_v28 = vld [vmem:[%s1016_s3] sm:$0xff]   ;;  %s783_s3 = scalar_lea.vmem %s603_s6, 32 }
  0x2b   :  { %699 = vmatprep.subr.bf16.mxu0 %v807_v39  ;;  %v637_v35 = vld [vmem:[%s1017_s4 + $0x2] ss:$0 sm:$0xff]  ;;  %p784_p0 = scmp.ne.s32.totalorder %s603_s6, %s783_s3  ;;  %p789_p2 = scmp.lt.s32.totalorder %s783_s3, %s783_s3 }
  0x2c   :  { %718 = vmatpush3.bf16.msra.mxu1 %v774_v48 }
  0x2d   :  { %719 = vmatprep.subr.bf16.mxu1 %v807_v39  ;;  %p790_p3 = por %p789_p2, %p788_p1 }
  0x2e   :  { %700 = vmatpush3.bf16.msra.mxu0 %v767_v41 }
  0x2f   :  { %701 = vmatprep.subr.bf16.mxu0 %v807_v39  ;;  %p791_p4 = pnand %p790_p3, %p784_p0 }
  0x30   :  { %720 = vmatpush3.bf16.msra.mxu1 %v775_v49 }
  0x31   :  { %721 = vmatprep.subr.bf16.mxu1 %v807_v39 }
  0x32   :  { %702 = vmatpush3.bf16.msra.mxu0 %v768_v42 }
  0x33   :  { %703 = vmatprep.subr.bf16.mxu0 %v807_v39 }
  0x34   :  { %722 = vmatpush3.bf16.msra.mxu1 %v776_v50 }
  0x35   :  { %723 = vmatprep.subr.bf16.mxu1 %v807_v39 }
  0x36   :  { %704 = vmatpush3.bf16.msra.mxu0 %v769_v43 }
  0x37   :  { %705 = vmatprep.subr.bf16.mxu0 %v807_v39 }
  0x38   :  { %724 = vmatpush3.bf16.msra.mxu1 %v777_v51 }
  0x39   :  { %725 = vmatprep.subr.bf16.mxu1 %v807_v39 }
  0x3a   :  { %706 = vmatpush3.bf16.msra.mxu0 %v770_v44 }
  0x3b   :  { %707 = vmatprep.subr.bf16.mxu0 %v807_v39 }
  0x3c   :  { %726 = vmatpush3.bf16.msra.mxu1 %v778_v52 }
  0x3d   :  { %727 = vmatprep.subr.bf16.mxu1 %v807_v39 }
  0x3e   :  { %708 = vmatpush3.bf16.msra.mxu0 %v771_v45 }
  0x3f   :  { %709 = vmatprep.subr.bf16.mxu0 %v807_v39 }
  0x40   :  { %728 = vmatpush3.bf16.msra.mxu1 %v779_v34 }
  0x41   :  { %729 = vmatprep.subr.bf16.mxu1 %v807_v39  ;;  %v646_v39 = vld [vmem:[%s1017_s4 + $0x3] ss:$0 sm:$0xff] }
  0x42   :  { %710 = vmatpush3.bf16.msra.mxu0 %v772_v46 }
  0x44   :  { %730 = vmatpush3.bf16.msra.mxu1 %v780_v28 }
  0xe3   :  { %v671_v53 = vpop.f32.mrf.mxu0 }
  0xe5   :  { %v672_v54 = vpop.f32.mrf.mxu0 }
  0xe6   :  { %v673_v55 = vadd.f32 %v672_v54, %v671_v53  ;;  %v329_v56 = vpop.f32.mrf.mxu1 }
  0xe7   :  { %v674_v57 = vpop.f32.mrf.mxu0 }
  0xe8   :  { %v330_v58 = vadd.f32 %v673_v55, %v329_v56  ;;  %v331_v59 = vpop.f32.mrf.mxu1 }
  0xe9   :  { %v675_v60 = vpop.f32.mrf.mxu0 }
  0xea   :  { %v336_v61 = vsel %vm335_vm2, %v330_v58, 0.0  ;;  %v343_v62 = vmul.f32 %v330_v58, %v330_v58  ;;  %v332_v63 = vpop.f32.mrf.mxu1 }
  0xeb   :  { %v337_v0 = vrot.slane %v336_v61, 4 }
  0xec   :  { %v344_v1 = vsel %vm335_vm2, %v343_v62, 0.0  ;;  %v333_v2 = vpop.f32.mrf.mxu1 }
  0xed   :  { %v338_v3 = vadd.f32 %v337_v0, %v336_v61  ;;  %v345_v4 = vrot.slane %v344_v1, 4 }
  0xef   :  { %v339_v5 = vrot.slane %v338_v3, 2  ;;  %v346_v6 = vadd.f32 %v345_v4, %v344_v1 }
  0xf1   :  { %v340_v7 = vadd.f32 %v339_v5, %v338_v3  ;;  %v347_v8 = vrot.slane %v346_v6, 2 }
  0xf3   :  { %v341_v9 = vrot.slane %v340_v7, 1  ;;  %v348_v10 = vadd.f32 %v347_v8, %v346_v6 }
  0xf5   :  { %v342_v11 = vadd.f32 %v341_v9, %v340_v7  ;;  %v349_v12 = vrot.slane %v348_v10, 1 }
  0xf7   :  { %v350_v13 = vadd.f32 %v349_v12, %v348_v10  ;;  %v353_v14 = vmul.f32 0.5, %v342_v11 }
  0xf9   :  { %v354_v15 = vmul.f32 0.5, %v350_v13  ;;  %v355_v16 = vmul.f32 %v353_v14, %v353_v14 }
  0xfb   :  { %v356_v17 = vsub.f32 %v354_v15, %v355_v16 }
  0xfd   :  { %v357_v18 = vmax.f32 %v356_v17, 0.0 }
  0xff   :  { %v358_v19 = vadd.f32 1e-05, %v357_v18 }
 0x101   :  { %781 = vrsqrt.f32 %v358_v19 }
 0x10e   :  { %v782_v22 = vpop.eup %781 }
 0x10f   :  { %v360_v23 = vmul.f32 %v782_v22, %v351_v20 }
 0x111   :  { %v361_v25 = vmul.f32 %v360_v23, %v353_v14  ;;  %v366_v26 = vrot.slane %v360_v23, %v365_v21 }
 0x113   :  { %v362_v27 = vsub.f32 %v352_v24, %v361_v25  ;;  %v367_v29 = vmul.f32 %v366_v26, %v330_v58 }
 0x115   :  { %v371_v30 = vrot.slane %v362_v27, %v365_v21 }
 0x117   :  { %v372_v31 = vadd.f32 %v371_v30, %v367_v29 }
 0x119   :  { %v373_v32 = vmax.f32 %v372_v31, 0.0 }
 0x11b   :  { %v374_v33 = vpack.c.bf16 %v373_v32, %v373_v32 }
 0x11d   :  { %712 = vmatmul.mubr.bf16.vlgmr.msra.gmra.mxu0 %v374_v33 }
 0x1dd   :  { %v478_v36 = vpop.f32.mrf.mxu0 }
 0x1de   :  { %v479_v37 = vadd.f32 %v637_v35, %v478_v36 }
 0x1df   :  { %v713_v38 = vpop.f32.mrf.mxu0 }
 0x1e0   :  { %v484_v40 = vmax.f32 %v479_v37, 0.0 }
 0x1e1   :  { %v481_v41 = vpop.f32.mrf.mxu0 }
 0x1e2   :  { %v485_v42 = vpack.c.bf16 %v484_v40, %v484_v40 }
 0x1e3   :  { %v714_v43 = vpop.f32.mrf.mxu0 }
 0x1e4   :  { %732 = vmatmul.mubr.bf16.vlgmr.msra.gmra.mxu1 %v485_v42 }
 0x2a4   :  { %v589_v44 = vpop.f32.mrf.mxu1 }
 0x2a5   :  { %v590_v45 = vadd.f32 %v646_v39, %v589_v44 }
 0x2a6   :  { %v733_v46 = vpop.f32.mrf.mxu1 }
 0x2a7   :  { %595 = vst [vmem:[#allocation2] sm:$0x3] %v590_v45 }
 0x2a8   :  { %v592_v47 = vpop.f32.mrf.mxu1 }
 0x2a9   :  { %794 = shalt.err (!%p791_p4)
}
 0x2aa   :  { %605 = dma.vmem_to_hbm [thread:$0]  %s603_s6, 32, %s1018_s5, [#allocation3]   ;;  %v734_v48 = vpop.f32.mrf.mxu1 }
 0x2ab   :  { %803 = dma.done.wait [#allocation3], 32  }
 0x2ac   :  { %804 = vsyncadd [#allocation3], 4294967264 }
 0x2ad   :  { %609 = vsyncpa [#allocation3], 1 }

</bundles_post_ra>
